<compile_context>
chip_gen: v7x
topology: tpu7x:2x2x1
jax: 0.10.0
libtpu: 0.0.40
codegen_flags: <defaults>
</compile_context>

<pallas_src>
import jax
import jax.numpy as jnp
from jax.experimental import pallas as pl
from jax.experimental.pallas import tpu as pltpu

# ---------------- configuration (small shapes consistent with the module) ----
BATCH = 2
H_IN = 16
W_IN = 16
IN_CH = 4                       # input_channels (module default 45; small here)
CONV_CH = [16, 16, 16]          # conv_channels
K = 3                           # kernel_sizes (stride 1, padding 1)
POOL = 2                        # pool_kernels (max pooling)
FC_HIDDEN = [32, 16, 8]         # fc_hidden_dims
N_H = 4                         # n_H
BN_EPS = 1e-5

FEATURE_DIM = (H_IN // 8) * (W_IN // 8) * CONV_CH[-1]   # after 3x (pool 2)
FC_DIMS = [FEATURE_DIM] + FC_HIDDEN + [N_H]

# FC weight slab: all FC weights stacked along the sublane (row) axis;
# every row offset is a multiple of 8 so in-kernel slices stay aligned.
FC_ROW_OFF = [0]
for _d in FC_DIMS[:-1]:
    FC_ROW_OFF.append(FC_ROW_OFF[-1] + _d)          # [0, 64, 96, 112, 120]
FC_SLAB_ROWS = FC_ROW_OFF[-1]
FC_SLAB_COLS = max(FC_DIMS[1:])                     # 32

# Bias / BN vector slab: one 128-lane row per vector (single DMA, aligned reads)
ROW_CONV_B = [0, 1, 2]
ROW_FC_B = [3, 4, 5, 6]
ROW_BN_G = [7, 8, 9]
ROW_BN_B = [10, 11, 12]
VEC_ROWS = 13


# --------------------------- fused Pallas kernel ------------------------------
def encoder_kernel(x_ref, cw1_ref, cw23_ref, fcw_ref, vec_ref, o_ref,
                   pad1, c1, pad2, c2, pad3, c3):
    N = x_ref.shape[0]
    f32 = jnp.float32

    def conv_stage(x_nhwc, pad_ref, c_ref, w, bias, H, W, Ci, Co):
        """3x3 conv (pad 1) + bias + ReLU + 2x2 max-pool, fully in VMEM.

        Shift-and-accumulate conv: one MXU matmul per (kh, kw) tap, f32
        accumulation.  The conv width is padded to a sublane-aligned Wa >= 8
        so every stage uses the same aligned path; the extra columns are zero
        in the padded scratch and their outputs are never read by the pool.
        """
        Wa = max(W, 8)
        Wpad = pad_ref.shape[2]
        assert Wpad == Wa + 2 and pad_ref.shape[1] == H + 2
        Hp, Wp = H // POOL, W // POOL

        # ---- zero only the halo (+ alignment columns); interior overwritten
        zrow = jnp.zeros((N, 1, Wpad, Ci), f32)
        pad_ref[:, 0:1, :, :] = zrow
        pad_ref[:, H + 1:H + 2, :, :] = zrow
        pad_ref[:, 1:H + 1, 0:1, :] = jnp.zeros((N, H, 1, Ci), f32)
        pad_ref[:, 1:H + 1, W + 1:Wpad, :] = jnp.zeros((N, H, Wpad - W - 1, Ci), f32)
        pad_ref[:, 1:H + 1, 1:W + 1, :] = x_nhwc

        # ---- 9 shift-and-accumulate tap matmuls (bf16 in, f32 accumulate)
        acc = jnp.zeros((N * H * Wa, Co), f32)
        for kh in range(K):
            for kw in range(K):
                win = pad_ref[:, kh:kh + H, kw:kw + Wa, :]        # (N, H, Wa, Ci)
                win = win.reshape(N * H * Wa, Ci).astype(jnp.bfloat16)
                acc = acc + jnp.dot(win, w[kh * K + kw],
                                    preferred_element_type=f32)

        # ---- 2x2 max-pool: W via strided sublane reads of the conv-out
        # scratch, H via a leading-dim split (known-robust lowerings).
        c_ref[...] = acc.reshape(N * H, Wa, Co)
        yw = jnp.maximum(c_ref[:, pl.ds(0, Wp, stride=2), :],
                         c_ref[:, pl.ds(1, Wp, stride=2), :])     # (N*H, Wp, Co)
        y4 = yw.reshape(N * Hp, POOL, Wp, Co)
        pooled = jnp.maximum(y4[:, 0], y4[:, 1])                  # (N*Hp, Wp, Co)
        # bias + ReLU hoisted after the pool (exact: shared per-channel bias,
        # monotone activation).
        out = jnp.maximum(pooled + bias, 0.0)
        return out.reshape(N, Hp, Wp, Co)

    # ---- conv stack (activations never leave VMEM) ----
    w1 = cw1_ref[...]                      # (9, IN_CH, Co) bf16
    w23 = cw23_ref[...]                    # (2, 9, Co, Co) bf16
    p = conv_stage(x_ref[...], pad1, c1, w1,
                   vec_ref[ROW_CONV_B[0]:ROW_CONV_B[0] + 1, 0:CONV_CH[0]],
                   H_IN, W_IN, IN_CH, CONV_CH[0])
    p = conv_stage(p, pad2, c2, w23[0],
                   vec_ref[ROW_CONV_B[1]:ROW_CONV_B[1] + 1, 0:CONV_CH[1]],
                   H_IN // 2, W_IN // 2, CONV_CH[0], CONV_CH[1])
    p = conv_stage(p, pad3, c3, w23[1],
                   vec_ref[ROW_CONV_B[2]:ROW_CONV_B[2] + 1, 0:CONV_CH[2]],
                   H_IN // 4, W_IN // 4, CONV_CH[1], CONV_CH[2])

    # ---- FC head: flatten-free FC1 via Hf*Wf row-block matmuls, then
    #      (ReLU -> BatchNorm1d[train, batch stats]) x3 + final Linear.
    Hf, Wf, Cf = H_IN // 8, W_IN // 8, CONV_CH[2]
    D1 = FC_DIMS[1]
    h = jnp.zeros((N, D1), f32)
    for i in range(Hf):
        for j in range(Wf):
            r0 = (i * Wf + j) * Cf          # matches the (h, w, c) flatten order
            h = h + jnp.dot(p[:, i, j, :].astype(jnp.bfloat16),
                            fcw_ref[r0:r0 + Cf, 0:D1],
                            preferred_element_type=f32)
    h = h + vec_ref[ROW_FC_B[0]:ROW_FC_B[0] + 1, 0:D1]

    def relu_bn(y, d, g_row, b_row):
        y = jnp.maximum(y, 0.0)
        mean = jnp.mean(y, axis=0, keepdims=True)
        var = jnp.mean(jnp.square(y - mean), axis=0, keepdims=True)   # biased (train)
        y = (y - mean) * jax.lax.rsqrt(var + BN_EPS)
        return y * vec_ref[g_row:g_row + 1, 0:d] + vec_ref[b_row:b_row + 1, 0:d]

    def linear(hh, layer):
        d_in, d_out = FC_DIMS[layer], FC_DIMS[layer + 1]
        r0 = FC_ROW_OFF[layer]
        return (jnp.dot(hh.astype(jnp.bfloat16),
                        fcw_ref[r0:r0 + d_in, 0:d_out],
                        preferred_element_type=f32)
                + vec_ref[ROW_FC_B[layer]:ROW_FC_B[layer] + 1, 0:d_out])

    h = relu_bn(h, FC_DIMS[1], ROW_BN_G[0], ROW_BN_B[0])
    h = relu_bn(linear(h, 1), FC_DIMS[2], ROW_BN_G[1], ROW_BN_B[1])
    h = relu_bn(linear(h, 2), FC_DIMS[3], ROW_BN_G[2], ROW_BN_B[2])
    o_ref[...] = linear(h, 3)


# --------------------------- parameter packing --------------------------------
def pack_params(params):
    # conv weights: (K, K, Ci, Co) HWIO -> (9, Ci, Co); tap index t = kh*K + kw
    cw = [w.reshape(K * K, w.shape[2], w.shape[3]) for (w, _) in params["conv"]]
    cw1 = cw[0]
    cw23 = jnp.stack([cw[1], cw[2]], axis=0)

    # FC weight slab (sublane-stacked, lane width = max out dim)
    fcw = jnp.zeros((FC_SLAB_ROWS, FC_SLAB_COLS), jnp.bfloat16)
    for layer, (w, _) in enumerate(params["fc"]):
        d_in, d_out = w.shape
        fcw = fcw.at[FC_ROW_OFF[layer]:FC_ROW_OFF[layer] + d_in, :d_out].set(w)

    # bias / BN slab: one 128-lane row per vector
    vecs = jnp.zeros((VEC_ROWS, 128), jnp.float32)
    for i, (_, b) in enumerate(params["conv"]):
        vecs = vecs.at[ROW_CONV_B[i], :b.shape[-1]].set(b.reshape(-1))
    for i, (_, b) in enumerate(params["fc"]):
        vecs = vecs.at[ROW_FC_B[i], :b.shape[-1]].set(b.reshape(-1))
    for i, (g, be) in enumerate(params["bn"]):
        vecs = vecs.at[ROW_BN_G[i], :g.shape[-1]].set(g.reshape(-1))
        vecs = vecs.at[ROW_BN_B[i], :be.shape[-1]].set(be.reshape(-1))
    return cw1, cw23, fcw, vecs


# --------------------------- wrapper ------------------------------------------
def encoder_forward(x, params):
    N = x.shape[0]
    cw1, cw23, fcw, vecs = pack_params(params)

    H1, W1, C1 = H_IN, W_IN, IN_CH
    H2, W2, C2 = H1 // 2, W1 // 2, CONV_CH[0]
    H3, W3, C3 = H2 // 2, W2 // 2, CONV_CH[1]

    scratch = [
        # per-stage padded-input scratch (halo zeroed in-kernel, width padded
        # to a sublane-aligned window) and conv-output scratch for the pool
        pltpu.VMEM((N, H1 + 2, max(W1, 8) + 2, C1), jnp.float32),
        pltpu.VMEM((N * H1, max(W1, 8), CONV_CH[0]), jnp.float32),
        pltpu.VMEM((N, H2 + 2, max(W2, 8) + 2, C2), jnp.float32),
        pltpu.VMEM((N * H2, max(W2, 8), CONV_CH[1]), jnp.float32),
        pltpu.VMEM((N, H3 + 2, max(W3, 8) + 2, C3), jnp.float32),
        pltpu.VMEM((N * H3, max(W3, 8), CONV_CH[2]), jnp.float32),
    ]

    return pl.pallas_call(
        encoder_kernel,
        out_shape=jax.ShapeDtypeStruct((N, N_H), jnp.float32),
        in_specs=[pl.BlockSpec(memory_space=pltpu.MemorySpace.VMEM)] * 5,
        out_specs=pl.BlockSpec(memory_space=pltpu.MemorySpace.VMEM),
        scratch_shapes=scratch,
        compiler_params=pltpu.CompilerParams(vmem_limit_bytes=32 * 1024 * 1024),
    )(x, cw1, cw23, fcw, vecs)


# --------------------------- pure-JAX reference -------------------------------
def encoder_reference(x, params):
    h = x
    for (w, b) in params["conv"]:
        h = jax.lax.conv_general_dilated(
            h.astype(jnp.bfloat16), w, window_strides=(1, 1),
            padding=((1, 1), (1, 1)),
            dimension_numbers=("NHWC", "HWIO", "NHWC"),
            preferred_element_type=jnp.float32)
        h = jnp.maximum(h + b, 0.0)
        h = jax.lax.reduce_window(h, -jnp.inf, jax.lax.max,
                                  (1, POOL, POOL, 1), (1, POOL, POOL, 1), "VALID")
    h = h.reshape(h.shape[0], -1)
    for i in range(3):
        w, b = params["fc"][i]
        g, be = params["bn"][i]
        h = jnp.maximum(jnp.dot(h.astype(jnp.bfloat16), w,
                                preferred_element_type=jnp.float32) + b, 0.0)
        mean = h.mean(axis=0, keepdims=True)
        var = ((h - mean) ** 2).mean(axis=0, keepdims=True)
        h = (h - mean) / jnp.sqrt(var + BN_EPS) * g + be
    w, b = params["fc"][3]
    return jnp.dot(h.astype(jnp.bfloat16), w,
                   preferred_element_type=jnp.float32) + b


# --------------------------- deterministic parameter init ---------------------
def init_params(key):
    params = {"conv": [], "fc": [], "bn": []}
    in_ch = IN_CH
    for out_ch in CONV_CH:
        key, kw, kb = jax.random.split(key, 3)
        fan_in = K * K * in_ch
        w = (jax.random.normal(kw, (K, K, in_ch, out_ch), jnp.float32)
             / jnp.sqrt(fan_in)).astype(jnp.bfloat16)
        b = 0.1 * jax.random.normal(kb, (out_ch,), jnp.float32)
        params["conv"].append((w, b))
        in_ch = out_ch
    for i in range(len(FC_DIMS) - 1):
        d_in, d_out = FC_DIMS[i], FC_DIMS[i + 1]
        key, kw, kb = jax.random.split(key, 3)
        w = (jax.random.normal(kw, (d_in, d_out), jnp.float32)
             / jnp.sqrt(d_in)).astype(jnp.bfloat16)
        b = 0.1 * jax.random.normal(kb, (1, d_out), jnp.float32)
        params["fc"].append((w, b))
        if i < len(FC_DIMS) - 2:
            key, kg, kbe = jax.random.split(key, 3)
            g = 1.0 + 0.1 * jax.random.normal(kg, (1, d_out), jnp.float32)
            be = 0.1 * jax.random.normal(kbe, (1, d_out), jnp.float32)
            params["bn"].append((g, be))
    return params


# --------------------------- main ---------------------------------------------
if __name__ == "__main__":
    key = jax.random.PRNGKey(0)
    key, kx = jax.random.split(key)
    x = jax.random.normal(kx, (BATCH, H_IN, W_IN, IN_CH), jnp.float32)  # NHWC
    params = init_params(key)

    out = jax.block_until_ready(jax.jit(encoder_forward)(x, params))
    assert out.shape == (BATCH, N_H), out.shape
    assert bool(jnp.all(jnp.isfinite(out)))

    ref = jax.block_until_ready(jax.jit(encoder_reference)(x, params))
    if not jnp.allclose(out, ref, atol=5e-2, rtol=5e-2):
        raise AssertionError(
            f"mismatch: max abs diff = {float(jnp.max(jnp.abs(out - ref)))}")

    print("KERNEL_OK")
</pallas_src>

<mosaic_0001>
module attributes {stable_mosaic.version = 11 : i64} {
  func.func @encoder_kernel(%arg0: memref<2x16x16x4xf32, #tpu.memory_space<vmem>>, %arg1: memref<9x4x16xbf16, #tpu.memory_space<vmem>>, %arg2: memref<2x9x16x16xbf16, #tpu.memory_space<vmem>>, %arg3: memref<120x32xbf16, #tpu.memory_space<vmem>>, %arg4: memref<13x128xf32, #tpu.memory_space<vmem>>, %arg5: memref<2x4xf32, #tpu.memory_space<vmem>>, %arg6: memref<2x18x18x4xf32, #tpu.memory_space<vmem>>, %arg7: memref<32x16x16xf32, #tpu.memory_space<vmem>>, %arg8: memref<2x10x10x16xf32, #tpu.memory_space<vmem>>, %arg9: memref<16x8x16xf32, #tpu.memory_space<vmem>>, %arg10: memref<2x6x10x16xf32, #tpu.memory_space<vmem>>, %arg11: memref<8x8x16xf32, #tpu.memory_space<vmem>>) attributes {dimension_semantics = [], scalar_prefetch = 0 : i64, scratch_operands = 6 : i64, tpu.core_type = #tpu.core_type<tc>} {
    %c0 = arith.constant 0 : index
    %c0_0 = arith.constant 0 : index
    %c0_1 = arith.constant 0 : index
    %0 = vector.load %arg1[%c0, %c0_0, %c0_1] : memref<9x4x16xbf16, #tpu.memory_space<vmem>>, vector<9x4x16xbf16>
    %c0_2 = arith.constant 0 : index
    %c0_3 = arith.constant 0 : index
    %c0_4 = arith.constant 0 : index
    %c0_5 = arith.constant 0 : index
    %1 = vector.load %arg2[%c0_2, %c0_3, %c0_4, %c0_5] : memref<2x9x16x16xbf16, #tpu.memory_space<vmem>>, vector<2x9x16x16xbf16>
    %c0_6 = arith.constant 0 : index
    %c0_7 = arith.constant 0 : index
    %c0_8 = arith.constant 0 : index
    %c0_9 = arith.constant 0 : index
    %2 = vector.load %arg0[%c0_6, %c0_7, %c0_8, %c0_9] : memref<2x16x16x4xf32, #tpu.memory_space<vmem>>, vector<2x16x16x4xf32>
    %c0_10 = arith.constant 0 : index
    %c0_11 = arith.constant 0 : index
    %3 = vector.load %arg4[%c0_10, %c0_11] : memref<13x128xf32, #tpu.memory_space<vmem>>, vector<1x16xf32>
    %cst = arith.constant 0.000000e+00 : f32
    %4 = vector.broadcast %cst : f32 to vector<2x1x18x4xf32>
    %c0_12 = arith.constant 0 : index
    %c0_13 = arith.constant 0 : index
    %c0_14 = arith.constant 0 : index
    %c0_15 = arith.constant 0 : index
    %5 = vector.load %arg6[%c0_12, %c0_13, %c0_14, %c0_15] : memref<2x18x18x4xf32, #tpu.memory_space<vmem>>, vector<2x1x18x4xf32>
    tpu.vector_store %arg6[%c0_12, %c0_13, %c0_14, %c0_15], %4 {strides = array<i32>} : memref<2x18x18x4xf32, #tpu.memory_space<vmem>>, vector<2x1x18x4xf32>,
    %c0_16 = arith.constant 0 : index
    %c17 = arith.constant 17 : index
    %c0_17 = arith.constant 0 : index
    %c0_18 = arith.constant 0 : index
    %6 = vector.load %arg6[%c0_16, %c17, %c0_17, %c0_18] : memref<2x18x18x4xf32, #tpu.memory_space<vmem>>, vector<2x1x18x4xf32>
    tpu.vector_store %arg6[%c0_16, %c17, %c0_17, %c0_18], %4 {strides = array<i32>} : memref<2x18x18x4xf32, #tpu.memory_space<vmem>>, vector<2x1x18x4xf32>,
    %cst_19 = arith.constant 0.000000e+00 : f32
    %7 = vector.broadcast %cst_19 : f32 to vector<2x16x1x4xf32>
    %c0_20 = arith.constant 0 : index
    %c1 = arith.constant 1 : index
    %c0_21 = arith.constant 0 : index
    %c0_22 = arith.constant 0 : index
    %8 = vector.load %arg6[%c0_20, %c1, %c0_21, %c0_22] : memref<2x18x18x4xf32, #tpu.memory_space<vmem>>, vector<2x16x1x4xf32>
    tpu.vector_store %arg6[%c0_20, %c1, %c0_21, %c0_22], %7 {strides = array<i32>} : memref<2x18x18x4xf32, #tpu.memory_space<vmem>>, vector<2x16x1x4xf32>,
    %cst_23 = arith.constant 0.000000e+00 : f32
    %9 = vector.broadcast %cst_23 : f32 to vector<2x16x1x4xf32>
    %c0_24 = arith.constant 0 : index
    %c1_25 = arith.constant 1 : index
    %c17_26 = arith.constant 17 : index
    %c0_27 = arith.constant 0 : index
    %10 = vector.load %arg6[%c0_24, %c1_25, %c17_26, %c0_27] : memref<2x18x18x4xf32, #tpu.memory_space<vmem>>, vector<2x16x1x4xf32>
    tpu.vector_store %arg6[%c0_24, %c1_25, %c17_26, %c0_27], %9 {strides = array<i32>} : memref<2x18x18x4xf32, #tpu.memory_space<vmem>>, vector<2x16x1x4xf32>,
    %c0_28 = arith.constant 0 : index
    %c1_29 = arith.constant 1 : index
    %c1_30 = arith.constant 1 : index
    %c0_31 = arith.constant 0 : index
    %11 = vector.load %arg6[%c0_28, %c1_29, %c1_30, %c0_31] : memref<2x18x18x4xf32, #tpu.memory_space<vmem>>, vector<2x16x16x4xf32>
    tpu.vector_store %arg6[%c0_28, %c1_29, %c1_30, %c0_31], %2 {strides = array<i32>} : memref<2x18x18x4xf32, #tpu.memory_space<vmem>>, vector<2x16x16x4xf32>,
    %cst_32 = arith.constant 0.000000e+00 : f32
    %12 = vector.broadcast %cst_32 : f32 to vector<512x16xf32>
    %c0_33 = arith.constant 0 : index
    %c0_34 = arith.constant 0 : index
    %c0_35 = arith.constant 0 : index
    %c0_36 = arith.constant 0 : index
    %13 = vector.load %arg6[%c0_33, %c0_34, %c0_35, %c0_36] : memref<2x18x18x4xf32, #tpu.memory_space<vmem>>, vector<2x16x16x4xf32>
    %14 = vector.shape_cast %13 : vector<2x16x16x4xf32> to vector<512x4xf32>
    %15 = arith.truncf %14 : vector<512x4xf32> to vector<512x4xbf16>
    %16 = vector.extract_strided_slice %0 {offsets = [0, 0, 0], sizes = [1, 4, 16], strides = [1, 1, 1]} : vector<9x4x16xbf16> to vector<1x4x16xbf16>
    %17 = vector.shape_cast %16 : vector<1x4x16xbf16> to vector<4x16xbf16>
    %cst_37 = arith.constant dense<0.000000e+00> : vector<512x16xf32>
    %18 = tpu.matmul %15, %17, %cst_37 {dimension_numbers = #tpu.dot_dimension_numbers<[1], [0], [0], [1], [0, 0, 1, 1], [], []>} : vector<512x4xbf16>, vector<4x16xbf16>, vector<512x16xf32> -> vector<512x16xf32>
    %19 = arith.addf %12, %18 : vector<512x16xf32>
    %c0_38 = arith.constant 0 : index
    %c0_39 = arith.constant 0 : index
    %c1_40 = arith.constant 1 : index
    %c0_41 = arith.constant 0 : index
    %20 = vector.load %arg6[%c0_38, %c0_39, %c1_40, %c0_41] : memref<2x18x18x4xf32, #tpu.memory_space<vmem>>, vector<2x16x16x4xf32>
    %21 = vector.shape_cast %20 : vector<2x16x16x4xf32> to vector<512x4xf32>
    %22 = arith.truncf %21 : vector<512x4xf32> to vector<512x4xbf16>
    %23 = vector.extract_strided_slice %0 {offsets = [1, 0, 0], sizes = [1, 4, 16], strides = [1, 1, 1]} : vector<9x4x16xbf16> to vector<1x4x16xbf16>
    %24 = vector.shape_cast %23 : vector<1x4x16xbf16> to vector<4x16xbf16>
    %cst_42 = arith.constant dense<0.000000e+00> : vector<512x16xf32>
    %25 = tpu.matmul %22, %24, %cst_42 {dimension_numbers = #tpu.dot_dimension_numbers<[1], [0], [0], [1], [0, 0, 1, 1], [], []>} : vector<512x4xbf16>, vector<4x16xbf16>, vector<512x16xf32> -> vector<512x16xf32>
    %26 = arith.addf %19, %25 : vector<512x16xf32>
    %c0_43 = arith.constant 0 : index
    %c0_44 = arith.constant 0 : index
    %c2 = arith.constant 2 : index
    %c0_45 = arith.constant 0 : index
    %27 = vector.load %arg6[%c0_43, %c0_44, %c2, %c0_45] : memref<2x18x18x4xf32, #tpu.memory_space<vmem>>, vector<2x16x16x4xf32>
    %28 = vector.shape_cast %27 : vector<2x16x16x4xf32> to vector<512x4xf32>
    %29 = arith.truncf %28 : vector<512x4xf32> to vector<512x4xbf16>
    %30 = vector.extract_strided_slice %0 {offsets = [2, 0, 0], sizes = [1, 4, 16], strides = [1, 1, 1]} : vector<9x4x16xbf16> to vector<1x4x16xbf16>
    %31 = vector.shape_cast %30 : vector<1x4x16xbf16> to vector<4x16xbf16>
    %cst_46 = arith.constant dense<0.000000e+00> : vector<512x16xf32>
    %32 = tpu.matmul %29, %31, %cst_46 {dimension_numbers = #tpu.dot_dimension_numbers<[1], [0], [0], [1], [0, 0, 1, 1], [], []>} : vector<512x4xbf16>, vector<4x16xbf16>, vector<512x16xf32> -> vector<512x16xf32>
    %33 = arith.addf %26, %32 : vector<512x16xf32>
    %c0_47 = arith.constant 0 : index
    %c1_48 = arith.constant 1 : index
    %c0_49 = arith.constant 0 : index
    %c0_50 = arith.constant 0 : index
    %34 = vector.load %arg6[%c0_47, %c1_48, %c0_49, %c0_50] : memref<2x18x18x4xf32, #tpu.memory_space<vmem>>, vector<2x16x16x4xf32>
    %35 = vector.shape_cast %34 : vector<2x16x16x4xf32> to vector<512x4xf32>
    %36 = arith.truncf %35 : vector<512x4xf32> to vector<512x4xbf16>
    %37 = vector.extract_strided_slice %0 {offsets = [3, 0, 0], sizes = [1, 4, 16], strides = [1, 1, 1]} : vector<9x4x16xbf16> to vector<1x4x16xbf16>
    %38 = vector.shape_cast %37 : vector<1x4x16xbf16> to vector<4x16xbf16>
    %cst_51 = arith.constant dense<0.000000e+00> : vector<512x16xf32>
    %39 = tpu.matmul %36, %38, %cst_51 {dimension_numbers = #tpu.dot_dimension_numbers<[1], [0], [0], [1], [0, 0, 1, 1], [], []>} : vector<512x4xbf16>, vector<4x16xbf16>, vector<512x16xf32> -> vector<512x16xf32>
    %40 = arith.addf %33, %39 : vector<512x16xf32>
    %c0_52 = arith.constant 0 : index
    %c1_53 = arith.constant 1 : index
    %c1_54 = arith.constant 1 : index
    %c0_55 = arith.constant 0 : index
    %41 = vector.load %arg6[%c0_52, %c1_53, %c1_54, %c0_55] : memref<2x18x18x4xf32, #tpu.memory_space<vmem>>, vector<2x16x16x4xf32>
    %42 = vector.shape_cast %41 : vector<2x16x16x4xf32> to vector<512x4xf32>
    %43 = arith.truncf %42 : vector<512x4xf32> to vector<512x4xbf16>
    %44 = vector.extract_strided_slice %0 {offsets = [4, 0, 0], sizes = [1, 4, 16], strides = [1, 1, 1]} : vector<9x4x16xbf16> to vector<1x4x16xbf16>
    %45 = vector.shape_cast %44 : vector<1x4x16xbf16> to vector<4x16xbf16>
    %cst_56 = arith.constant dense<0.000000e+00> : vector<512x16xf32>
    %46 = tpu.matmul %43, %45, %cst_56 {dimension_numbers = #tpu.dot_dimension_numbers<[1], [0], [0], [1], [0, 0, 1, 1], [], []>} : vector<512x4xbf16>, vector<4x16xbf16>, vector<512x16xf32> -> vector<512x16xf32>
    %47 = arith.addf %40, %46 : vector<512x16xf32>
    %c0_57 = arith.constant 0 : index
    %c1_58 = arith.constant 1 : index
    %c2_59 = arith.constant 2 : index
    %c0_60 = arith.constant 0 : index
    %48 = vector.load %arg6[%c0_57, %c1_58, %c2_59, %c0_60] : memref<2x18x18x4xf32, #tpu.memory_space<vmem>>, vector<2x16x16x4xf32>
    %49 = vector.shape_cast %48 : vector<2x16x16x4xf32> to vector<512x4xf32>
    %50 = arith.truncf %49 : vector<512x4xf32> to vector<512x4xbf16>
    %51 = vector.extract_strided_slice %0 {offsets = [5, 0, 0], sizes = [1, 4, 16], strides = [1, 1, 1]} : vector<9x4x16xbf16> to vector<1x4x16xbf16>
    %52 = vector.shape_cast %51 : vector<1x4x16xbf16> to vector<4x16xbf16>
    %cst_61 = arith.constant dense<0.000000e+00> : vector<512x16xf32>
    %53 = tpu.matmul %50, %52, %cst_61 {dimension_numbers = #tpu.dot_dimension_numbers<[1], [0], [0], [1], [0, 0, 1, 1], [], []>} : vector<512x4xbf16>, vector<4x16xbf16>, vector<512x16xf32> -> vector<512x16xf32>
    %54 = arith.addf %47, %53 : vector<512x16xf32>
    %c0_62 = arith.constant 0 : index
    %c2_63 = arith.constant 2 : index
    %c0_64 = arith.constant 0 : index
    %c0_65 = arith.constant 0 : index
    %55 = vector.load %arg6[%c0_62, %c2_63, %c0_64, %c0_65] : memref<2x18x18x4xf32, #tpu.memory_space<vmem>>, vector<2x16x16x4xf32>
    %56 = vector.shape_cast %55 : vector<2x16x16x4xf32> to vector<512x4xf32>
    %57 = arith.truncf %56 : vector<512x4xf32> to vector<512x4xbf16>
    %58 = vector.extract_strided_slice %0 {offsets = [6, 0, 0], sizes = [1, 4, 16], strides = [1, 1, 1]} : vector<9x4x16xbf16> to vector<1x4x16xbf16>
    %59 = vector.shape_cast %58 : vector<1x4x16xbf16> to vector<4x16xbf16>
    %cst_66 = arith.constant dense<0.000000e+00> : vector<512x16xf32>
    %60 = tpu.matmul %57, %59, %cst_66 {dimension_numbers = #tpu.dot_dimension_numbers<[1], [0], [0], [1], [0, 0, 1, 1], [], []>} : vector<512x4xbf16>, vector<4x16xbf16>, vector<512x16xf32> -> vector<512x16xf32>
    %61 = arith.addf %54, %60 : vector<512x16xf32>
    %c0_67 = arith.constant 0 : index
    %c2_68 = arith.constant 2 : index
    %c1_69 = arith.constant 1 : index
    %c0_70 = arith.constant 0 : index
    %62 = vector.load %arg6[%c0_67, %c2_68, %c1_69, %c0_70] : memref<2x18x18x4xf32, #tpu.memory_space<vmem>>, vector<2x16x16x4xf32>
    %63 = vector.shape_cast %62 : vector<2x16x16x4xf32> to vector<512x4xf32>
    %64 = arith.truncf %63 : vector<512x4xf32> to vector<512x4xbf16>
    %65 = vector.extract_strided_slice %0 {offsets = [7, 0, 0], sizes = [1, 4, 16], strides = [1, 1, 1]} : vector<9x4x16xbf16> to vector<1x4x16xbf16>
    %66 = vector.shape_cast %65 : vector<1x4x16xbf16> to vector<4x16xbf16>
    %cst_71 = arith.constant dense<0.000000e+00> : vector<512x16xf32>
    %67 = tpu.matmul %64, %66, %cst_71 {dimension_numbers = #tpu.dot_dimension_numbers<[1], [0], [0], [1], [0, 0, 1, 1], [], []>} : vector<512x4xbf16>, vector<4x16xbf16>, vector<512x16xf32> -> vector<512x16xf32>
    %68 = arith.addf %61, %67 : vector<512x16xf32>
    %c0_72 = arith.constant 0 : index
    %c2_73 = arith.constant 2 : index
    %c2_74 = arith.constant 2 : index
    %c0_75 = arith.constant 0 : index
    %69 = vector.load %arg6[%c0_72, %c2_73, %c2_74, %c0_75] : memref<2x18x18x4xf32, #tpu.memory_space<vmem>>, vector<2x16x16x4xf32>
    %70 = vector.shape_cast %69 : vector<2x16x16x4xf32> to vector<512x4xf32>
    %71 = arith.truncf %70 : vector<512x4xf32> to vector<512x4xbf16>
    %72 = vector.extract_strided_slice %0 {offsets = [8, 0, 0], sizes = [1, 4, 16], strides = [1, 1, 1]} : vector<9x4x16xbf16> to vector<1x4x16xbf16>
    %73 = vector.shape_cast %72 : vector<1x4x16xbf16> to vector<4x16xbf16>
    %cst_76 = arith.constant dense<0.000000e+00> : vector<512x16xf32>
    %74 = tpu.matmul %71, %73, %cst_76 {dimension_numbers = #tpu.dot_dimension_numbers<[1], [0], [0], [1], [0, 0, 1, 1], [], []>} : vector<512x4xbf16>, vector<4x16xbf16>, vector<512x16xf32> -> vector<512x16xf32>
    %75 = arith.addf %68, %74 : vector<512x16xf32>
    %76 = vector.shape_cast %75 : vector<512x16xf32> to vector<32x16x16xf32>
    %c0_77 = arith.constant 0 : index
    %c0_78 = arith.constant 0 : index
    %c0_79 = arith.constant 0 : index
    %77 = vector.load %arg7[%c0_77, %c0_78, %c0_79] : memref<32x16x16xf32, #tpu.memory_space<vmem>>, vector<32x16x16xf32>
    tpu.vector_store %arg7[%c0_77, %c0_78, %c0_79], %76 {strides = array<i32>} : memref<32x16x16xf32, #tpu.memory_space<vmem>>, vector<32x16x16xf32>,
    %c0_80 = arith.constant 0 : index
    %c0_81 = arith.constant 0 : index
    %c0_82 = arith.constant 0 : index
    %78 = tpu.strided_load %arg7[%c0_80, %c0_81, %c0_82] {strides = array<i32: 1, 2, 1>} : memref<32x16x16xf32, #tpu.memory_space<vmem>>, vector<32x8x16xf32>
    %c0_83 = arith.constant 0 : index
    %c1_84 = arith.constant 1 : index
    %c0_85 = arith.constant 0 : index
    %79 = tpu.strided_load %arg7[%c0_83, %c1_84, %c0_85] {strides = array<i32: 1, 2, 1>} : memref<32x16x16xf32, #tpu.memory_space<vmem>>, vector<32x8x16xf32>
    %80 = arith.maximumf %78, %79 : vector<32x8x16xf32>
    %81 = vector.shape_cast %80 : vector<32x8x16xf32> to vector<16x2x8x16xf32>
    %82 = vector.extract_strided_slice %81 {offsets = [0, 0, 0, 0], sizes = [16, 1, 8, 16], strides = [1, 1, 1, 1]} : vector<16x2x8x16xf32> to vector<16x1x8x16xf32>
    %83 = vector.shape_cast %82 : vector<16x1x8x16xf32> to vector<16x8x16xf32>
    %84 = vector.extract_strided_slice %81 {offsets = [0, 1, 0, 0], sizes = [16, 1, 8, 16], strides = [1, 1, 1, 1]} : vector<16x2x8x16xf32> to vector<16x1x8x16xf32>
    %85 = vector.shape_cast %84 : vector<16x1x8x16xf32> to vector<16x8x16xf32>
    %86 = arith.maximumf %83, %85 : vector<16x8x16xf32>
    %87 = vector.shape_cast %3 : vector<1x16xf32> to vector<1x1x16xf32>
    %88 = vector.broadcast %87 : vector<1x1x16xf32> to vector<16x8x16xf32>
    %89 = arith.addf %86, %88 : vector<16x8x16xf32>
    %cst_86 = arith.constant 0.000000e+00 : f32
    %90 = vector.broadcast %cst_86 : f32 to vector<16x8x16xf32>
    %91 = arith.maximumf %89, %90 : vector<16x8x16xf32>
    %92 = vector.shape_cast %91 : vector<16x8x16xf32> to vector<2x8x8x16xf32>
    %93 = vector.extract_strided_slice %1 {offsets = [0, 0, 0, 0], sizes = [1, 9, 16, 16], strides = [1, 1, 1, 1]} : vector<2x9x16x16xbf16> to vector<1x9x16x16xbf16>
    %94 = vector.shape_cast %93 : vector<1x9x16x16xbf16> to vector<9x16x16xbf16>
    %c1_87 = arith.constant 1 : index
    %c0_88 = arith.constant 0 : index
    %95 = vector.load %arg4[%c1_87, %c0_88] : memref<13x128xf32, #tpu.memory_space<vmem>>, vector<1x16xf32>
    %cst_89 = arith.constant 0.000000e+00 : f32
    %96 = vector.broadcast %cst_89 : f32 to vector<2x1x10x16xf32>
    %c0_90 = arith.constant 0 : index
    %c0_91 = arith.constant 0 : index
    %c0_92 = arith.constant 0 : index
    %c0_93 = arith.constant 0 : index
    %97 = vector.load %arg8[%c0_90, %c0_91, %c0_92, %c0_93] : memref<2x10x10x16xf32, #tpu.memory_space<vmem>>, vector<2x1x10x16xf32>
    tpu.vector_store %arg8[%c0_90, %c0_91, %c0_92, %c0_93], %96 {strides = array<i32>} : memref<2x10x10x16xf32, #tpu.memory_space<vmem>>, vector<2x1x10x16xf32>,
    %c0_94 = arith.constant 0 : index
    %c9 = arith.constant 9 : index
    %c0_95 = arith.constant 0 : index
    %c0_96 = arith.constant 0 : index
    %98 = vector.load %arg8[%c0_94, %c9, %c0_95, %c0_96] : memref<2x10x10x16xf32, #tpu.memory_space<vmem>>, vector<2x1x10x16xf32>
    tpu.vector_store %arg8[%c0_94, %c9, %c0_95, %c0_96], %96 {strides = array<i32>} : memref<2x10x10x16xf32, #tpu.memory_space<vmem>>, vector<2x1x10x16xf32>,
    %cst_97 = arith.constant 0.000000e+00 : f32
    %99 = vector.broadcast %cst_97 : f32 to vector<2x8x1x16xf32>
    %c0_98 = arith.constant 0 : index
    %c1_99 = arith.constant 1 : index
    %c0_100 = arith.constant 0 : index
    %c0_101 = arith.constant 0 : index
    %100 = vector.load %arg8[%c0_98, %c1_99, %c0_100, %c0_101] : memref<2x10x10x16xf32, #tpu.memory_space<vmem>>, vector<2x8x1x16xf32>
    tpu.vector_store %arg8[%c0_98, %c1_99, %c0_100, %c0_101], %99 {strides = array<i32>} : memref<2x10x10x16xf32, #tpu.memory_space<vmem>>, vector<2x8x1x16xf32>,
    %cst_102 = arith.constant 0.000000e+00 : f32
    %101 = vector.broadcast %cst_102 : f32 to vector<2x8x1x16xf32>
    %c0_103 = arith.constant 0 : index
    %c1_104 = arith.constant 1 : index
    %c9_105 = arith.constant 9 : index
    %c0_106 = arith.constant 0 : index
    %102 = vector.load %arg8[%c0_103, %c1_104, %c9_105, %c0_106] : memref<2x10x10x16xf32, #tpu.memory_space<vmem>>, vector<2x8x1x16xf32>
    tpu.vector_store %arg8[%c0_103, %c1_104, %c9_105, %c0_106], %101 {strides = array<i32>} : memref<2x10x10x16xf32, #tpu.memory_space<vmem>>, vector<2x8x1x16xf32>,
    %c0_107 = arith.constant 0 : index
    %c1_108 = arith.constant 1 : index
    %c1_109 = arith.constant 1 : index
    %c0_110 = arith.constant 0 : index
    %103 = vector.load %arg8[%c0_107, %c1_108, %c1_109, %c0_110] : memref<2x10x10x16xf32, #tpu.memory_space<vmem>>, vector<2x8x8x16xf32>
    tpu.vector_store %arg8[%c0_107, %c1_108, %c1_109, %c0_110], %92 {strides = array<i32>} : memref<2x10x10x16xf32, #tpu.memory_space<vmem>>, vector<2x8x8x16xf32>,
    %cst_111 = arith.constant 0.000000e+00 : f32
    %104 = vector.broadcast %cst_111 : f32 to vector<128x16xf32>
    %c0_112 = arith.constant 0 : index
    %c0_113 = arith.constant 0 : index
    %c0_114 = arith.constant 0 : index
    %c0_115 = arith.constant 0 : index
    %105 = vector.load %arg8[%c0_112, %c0_113, %c0_114, %c0_115] : memref<2x10x10x16xf32, #tpu.memory_space<vmem>>, vector<2x8x8x16xf32>
    %106 = vector.shape_cast %105 : vector<2x8x8x16xf32> to vector<128x16xf32>
    %107 = arith.truncf %106 : vector<128x16xf32> to vector<128x16xbf16>
    %108 = vector.extract_strided_slice %94 {offsets = [0, 0, 0], sizes = [1, 16, 16], strides = [1, 1, 1]} : vector<9x16x16xbf16> to vector<1x16x16xbf16>
    %109 = vector.shape_cast %108 : vector<1x16x16xbf16> to vector<16x16xbf16>
    %cst_116 = arith.constant dense<0.000000e+00> : vector<128x16xf32>
    %110 = tpu.matmul %107, %109, %cst_116 {dimension_numbers = #tpu.dot_dimension_numbers<[1], [0], [0], [1], [0, 0, 1, 1], [], []>} : vector<128x16xbf16>, vector<16x16xbf16>, vector<128x16xf32> -> vector<128x16xf32>
    %111 = arith.addf %104, %110 : vector<128x16xf32>
    %c0_117 = arith.constant 0 : index
    %c0_118 = arith.constant 0 : index
    %c1_119 = arith.constant 1 : index
    %c0_120 = arith.constant 0 : index
    %112 = vector.load %arg8[%c0_117, %c0_118, %c1_119, %c0_120] : memref<2x10x10x16xf32, #tpu.memory_space<vmem>>, vector<2x8x8x16xf32>
    %113 = vector.shape_cast %112 : vector<2x8x8x16xf32> to vector<128x16xf32>
    %114 = arith.truncf %113 : vector<128x16xf32> to vector<128x16xbf16>
    %115 = vector.extract_strided_slice %94 {offsets = [1, 0, 0], sizes = [1, 16, 16], strides = [1, 1, 1]} : vector<9x16x16xbf16> to vector<1x16x16xbf16>
    %116 = vector.shape_cast %115 : vector<1x16x16xbf16> to vector<16x16xbf16>
    %cst_121 = arith.constant dense<0.000000e+00> : vector<128x16xf32>
    %117 = tpu.matmul %114, %116, %cst_121 {dimension_numbers = #tpu.dot_dimension_numbers<[1], [0], [0], [1], [0, 0, 1, 1], [], []>} : vector<128x16xbf16>, vector<16x16xbf16>, vector<128x16xf32> -> vector<128x16xf32>
    %118 = arith.addf %111, %117 : vector<128x16xf32>
    %c0_122 = arith.constant 0 : index
    %c0_123 = arith.constant 0 : index
    %c2_124 = arith.constant 2 : index
    %c0_125 = arith.constant 0 : index
    %119 = vector.load %arg8[%c0_122, %c0_123, %c2_124, %c0_125] : memref<2x10x10x16xf32, #tpu.memory_space<vmem>>, vector<2x8x8x16xf32>
    %120 = vector.shape_cast %119 : vector<2x8x8x16xf32> to vector<128x16xf32>
    %121 = arith.truncf %120 : vector<128x16xf32> to vector<128x16xbf16>
    %122 = vector.extract_strided_slice %94 {offsets = [2, 0, 0], sizes = [1, 16, 16], strides = [1, 1, 1]} : vector<9x16x16xbf16> to vector<1x16x16xbf16>
    %123 = vector.shape_cast %122 : vector<1x16x16xbf16> to vector<16x16xbf16>
    %cst_126 = arith.constant dense<0.000000e+00> : vector<128x16xf32>
    %124 = tpu.matmul %121, %123, %cst_126 {dimension_numbers = #tpu.dot_dimension_numbers<[1], [0], [0], [1], [0, 0, 1, 1], [], []>} : vector<128x16xbf16>, vector<16x16xbf16>, vector<128x16xf32> -> vector<128x16xf32>
    %125 = arith.addf %118, %124 : vector<128x16xf32>
    %c0_127 = arith.constant 0 : index
    %c1_128 = arith.constant 1 : index
    %c0_129 = arith.constant 0 : index
    %c0_130 = arith.constant 0 : index
    %126 = vector.load %arg8[%c0_127, %c1_128, %c0_129, %c0_130] : memref<2x10x10x16xf32, #tpu.memory_space<vmem>>, vector<2x8x8x16xf32>
    %127 = vector.shape_cast %126 : vector<2x8x8x16xf32> to vector<128x16xf32>
    %128 = arith.truncf %127 : vector<128x16xf32> to vector<128x16xbf16>
    %129 = vector.extract_strided_slice %94 {offsets = [3, 0, 0], sizes = [1, 16, 16], strides = [1, 1, 1]} : vector<9x16x16xbf16> to vector<1x16x16xbf16>
    %130 = vector.shape_cast %129 : vector<1x16x16xbf16> to vector<16x16xbf16>
    %cst_131 = arith.constant dense<0.000000e+00> : vector<128x16xf32>
    %131 = tpu.matmul %128, %130, %cst_131 {dimension_numbers = #tpu.dot_dimension_numbers<[1], [0], [0], [1], [0, 0, 1, 1], [], []>} : vector<128x16xbf16>, vector<16x16xbf16>, vector<128x16xf32> -> vector<128x16xf32>
    %132 = arith.addf %125, %131 : vector<128x16xf32>
    %c0_132 = arith.constant 0 : index
    %c1_133 = arith.constant 1 : index
    %c1_134 = arith.constant 1 : index
    %c0_135 = arith.constant 0 : index
    %133 = vector.load %arg8[%c0_132, %c1_133, %c1_134, %c0_135] : memref<2x10x10x16xf32, #tpu.memory_space<vmem>>, vector<2x8x8x16xf32>
    %134 = vector.shape_cast %133 : vector<2x8x8x16xf32> to vector<128x16xf32>
    %135 = arith.truncf %134 : vector<128x16xf32> to vector<128x16xbf16>
    %136 = vector.extract_strided_slice %94 {offsets = [4, 0, 0], sizes = [1, 16, 16], strides = [1, 1, 1]} : vector<9x16x16xbf16> to vector<1x16x16xbf16>
    %137 = vector.shape_cast %136 : vector<1x16x16xbf16> to vector<16x16xbf16>
    %cst_136 = arith.constant dense<0.000000e+00> : vector<128x16xf32>
    %138 = tpu.matmul %135, %137, %cst_136 {dimension_numbers = #tpu.dot_dimension_numbers<[1], [0], [0], [1], [0, 0, 1, 1], [], []>} : vector<128x16xbf16>, vector<16x16xbf16>, vector<128x16xf32> -> vector<128x16xf32>
    %139 = arith.addf %132, %138 : vector<128x16xf32>
    %c0_137 = arith.constant 0 : index
    %c1_138 = arith.constant 1 : index
    %c2_139 = arith.constant 2 : index
    %c0_140 = arith.constant 0 : index
    %140 = vector.load %arg8[%c0_137, %c1_138, %c2_139, %c0_140] : memref<2x10x10x16xf32, #tpu.memory_space<vmem>>, vector<2x8x8x16xf32>
    %141 = vector.shape_cast %140 : vector<2x8x8x16xf32> to vector<128x16xf32>
    %142 = arith.truncf %141 : vector<128x16xf32> to vector<128x16xbf16>
    %143 = vector.extract_strided_slice %94 {offsets = [5, 0, 0], sizes = [1, 16, 16], strides = [1, 1, 1]} : vector<9x16x16xbf16> to vector<1x16x16xbf16>
    %144 = vector.shape_cast %143 : vector<1x16x16xbf16> to vector<16x16xbf16>
    %cst_141 = arith.constant dense<0.000000e+00> : vector<128x16xf32>
    %145 = tpu.matmul %142, %144, %cst_141 {dimension_numbers = #tpu.dot_dimension_numbers<[1], [0], [0], [1], [0, 0, 1, 1], [], []>} : vector<128x16xbf16>, vector<16x16xbf16>, vector<128x16xf32> -> vector<128x16xf32>
    %146 = arith.addf %139, %145 : vector<128x16xf32>
    %c0_142 = arith.constant 0 : index
    %c2_143 = arith.constant 2 : index
    %c0_144 = arith.constant 0 : index
    %c0_145 = arith.constant 0 : index
    %147 = vector.load %arg8[%c0_142, %c2_143, %c0_144, %c0_145] : memref<2x10x10x16xf32, #tpu.memory_space<vmem>>, vector<2x8x8x16xf32>
    %148 = vector.shape_cast %147 : vector<2x8x8x16xf32> to vector<128x16xf32>
    %149 = arith.truncf %148 : vector<128x16xf32> to vector<128x16xbf16>
    %150 = vector.extract_strided_slice %94 {offsets = [6, 0, 0], sizes = [1, 16, 16], strides = [1, 1, 1]} : vector<9x16x16xbf16> to vector<1x16x16xbf16>
    %151 = vector.shape_cast %150 : vector<1x16x16xbf16> to vector<16x16xbf16>
    %cst_146 = arith.constant dense<0.000000e+00> : vector<128x16xf32>
    %152 = tpu.matmul %149, %151, %cst_146 {dimension_numbers = #tpu.dot_dimension_numbers<[1], [0], [0], [1], [0, 0, 1, 1], [], []>} : vector<128x16xbf16>, vector<16x16xbf16>, vector<128x16xf32> -> vector<128x16xf32>
    %153 = arith.addf %146, %152 : vector<128x16xf32>
    %c0_147 = arith.constant 0 : index
    %c2_148 = arith.constant 2 : index
    %c1_149 = arith.constant 1 : index
    %c0_150 = arith.constant 0 : index
    %154 = vector.load %arg8[%c0_147, %c2_148, %c1_149, %c0_150] : memref<2x10x10x16xf32, #tpu.memory_space<vmem>>, vector<2x8x8x16xf32>
    %155 = vector.shape_cast %154 : vector<2x8x8x16xf32> to vector<128x16xf32>
    %156 = arith.truncf %155 : vector<128x16xf32> to vector<128x16xbf16>
    %157 = vector.extract_strided_slice %94 {offsets = [7, 0, 0], sizes = [1, 16, 16], strides = [1, 1, 1]} : vector<9x16x16xbf16> to vector<1x16x16xbf16>
    %158 = vector.shape_cast %157 : vector<1x16x16xbf16> to vector<16x16xbf16>
    %cst_151 = arith.constant dense<0.000000e+00> : vector<128x16xf32>
    %159 = tpu.matmul %156, %158, %cst_151 {dimension_numbers = #tpu.dot_dimension_numbers<[1], [0], [0], [1], [0, 0, 1, 1], [], []>} : vector<128x16xbf16>, vector<16x16xbf16>, vector<128x16xf32> -> vector<128x16xf32>
    %160 = arith.addf %153, %159 : vector<128x16xf32>
    %c0_152 = arith.constant 0 : index
    %c2_153 = arith.constant 2 : index
    %c2_154 = arith.constant 2 : index
    %c0_155 = arith.constant 0 : index
    %161 = vector.load %arg8[%c0_152, %c2_153, %c2_154, %c0_155] : memref<2x10x10x16xf32, #tpu.memory_space<vmem>>, vector<2x8x8x16xf32>
    %162 = vector.shape_cast %161 : vector<2x8x8x16xf32> to vector<128x16xf32>
    %163 = arith.truncf %162 : vector<128x16xf32> to vector<128x16xbf16>
    %164 = vector.extract_strided_slice %94 {offsets = [8, 0, 0], sizes = [1, 16, 16], strides = [1, 1, 1]} : vector<9x16x16xbf16> to vector<1x16x16xbf16>
    %165 = vector.shape_cast %164 : vector<1x16x16xbf16> to vector<16x16xbf16>
    %cst_156 = arith.constant dense<0.000000e+00> : vector<128x16xf32>
    %166 = tpu.matmul %163, %165, %cst_156 {dimension_numbers = #tpu.dot_dimension_numbers<[1], [0], [0], [1], [0, 0, 1, 1], [], []>} : vector<128x16xbf16>, vector<16x16xbf16>, vector<128x16xf32> -> vector<128x16xf32>
    %167 = arith.addf %160, %166 : vector<128x16xf32>
    %168 = vector.shape_cast %167 : vector<128x16xf32> to vector<16x8x16xf32>
    %c0_157 = arith.constant 0 : index
    %c0_158 = arith.constant 0 : index
    %c0_159 = arith.constant 0 : index
    %169 = vector.load %arg9[%c0_157, %c0_158, %c0_159] : memref<16x8x16xf32, #tpu.memory_space<vmem>>, vector<16x8x16xf32>
    tpu.vector_store %arg9[%c0_157, %c0_158, %c0_159], %168 {strides = array<i32>} : memref<16x8x16xf32, #tpu.memory_space<vmem>>, vector<16x8x16xf32>,
    %c0_160 = arith.constant 0 : index
    %c0_161 = arith.constant 0 : index
    %c0_162 = arith.constant 0 : index
    %170 = tpu.strided_load %arg9[%c0_160, %c0_161, %c0_162] {strides = array<i32: 1, 2, 1>} : memref<16x8x16xf32, #tpu.memory_space<vmem>>, vector<16x4x16xf32>
    %c0_163 = arith.constant 0 : index
    %c1_164 = arith.constant 1 : index
    %c0_165 = arith.constant 0 : index
    %171 = tpu.strided_load %arg9[%c0_163, %c1_164, %c0_165] {strides = array<i32: 1, 2, 1>} : memref<16x8x16xf32, #tpu.memory_space<vmem>>, vector<16x4x16xf32>
    %172 = arith.maximumf %170, %171 : vector<16x4x16xf32>
    %173 = vector.shape_cast %172 : vector<16x4x16xf32> to vector<8x2x4x16xf32>
    %174 = vector.extract_strided_slice %173 {offsets = [0, 0, 0, 0], sizes = [8, 1, 4, 16], strides = [1, 1, 1, 1]} : vector<8x2x4x16xf32> to vector<8x1x4x16xf32>
    %175 = vector.shape_cast %174 : vector<8x1x4x16xf32> to vector<8x4x16xf32>
    %176 = vector.extract_strided_slice %173 {offsets = [0, 1, 0, 0], sizes = [8, 1, 4, 16], strides = [1, 1, 1, 1]} : vector<8x2x4x16xf32> to vector<8x1x4x16xf32>
    %177 = vector.shape_cast %176 : vector<8x1x4x16xf32> to vector<8x4x16xf32>
    %178 = arith.maximumf %175, %177 : vector<8x4x16xf32>
    %179 = vector.shape_cast %95 : vector<1x16xf32> to vector<1x1x16xf32>
    %180 = vector.broadcast %179 : vector<1x1x16xf32> to vector<8x4x16xf32>
    %181 = arith.addf %178, %180 : vector<8x4x16xf32>
    %cst_166 = arith.constant 0.000000e+00 : f32
    %182 = vector.broadcast %cst_166 : f32 to vector<8x4x16xf32>
    %183 = arith.maximumf %181, %182 : vector<8x4x16xf32>
    %184 = vector.shape_cast %183 : vector<8x4x16xf32> to vector<2x4x4x16xf32>
    %185 = vector.extract_strided_slice %1 {offsets = [1, 0, 0, 0], sizes = [1, 9, 16, 16], strides = [1, 1, 1, 1]} : vector<2x9x16x16xbf16> to vector<1x9x16x16xbf16>
    %186 = vector.shape_cast %185 : vector<1x9x16x16xbf16> to vector<9x16x16xbf16>
    %c2_167 = arith.constant 2 : index
    %c0_168 = arith.constant 0 : index
    %187 = vector.load %arg4[%c2_167, %c0_168] : memref<13x128xf32, #tpu.memory_space<vmem>>, vector<1x16xf32>
    %cst_169 = arith.constant 0.000000e+00 : f32
    %188 = vector.broadcast %cst_169 : f32 to vector<2x1x10x16xf32>
    %c0_170 = arith.constant 0 : index
    %c0_171 = arith.constant 0 : index
    %c0_172 = arith.constant 0 : index
    %c0_173 = arith.constant 0 : index
    %189 = vector.load %arg10[%c0_170, %c0_171, %c0_172, %c0_173] : memref<2x6x10x16xf32, #tpu.memory_space<vmem>>, vector<2x1x10x16xf32>
    tpu.vector_store %arg10[%c0_170, %c0_171, %c0_172, %c0_173], %188 {strides = array<i32>} : memref<2x6x10x16xf32, #tpu.memory_space<vmem>>, vector<2x1x10x16xf32>,
    %c0_174 = arith.constant 0 : index
    %c5 = arith.constant 5 : index
    %c0_175 = arith.constant 0 : index
    %c0_176 = arith.constant 0 : index
    %190 = vector.load %arg10[%c0_174, %c5, %c0_175, %c0_176] : memref<2x6x10x16xf32, #tpu.memory_space<vmem>>, vector<2x1x10x16xf32>
    tpu.vector_store %arg10[%c0_174, %c5, %c0_175, %c0_176], %188 {strides = array<i32>} : memref<2x6x10x16xf32, #tpu.memory_space<vmem>>, vector<2x1x10x16xf32>,
    %cst_177 = arith.constant 0.000000e+00 : f32
    %191 = vector.broadcast %cst_177 : f32 to vector<2x4x1x16xf32>
    %c0_178 = arith.constant 0 : index
    %c1_179 = arith.constant 1 : index
    %c0_180 = arith.constant 0 : index
    %c0_181 = arith.constant 0 : index
    %192 = vector.load %arg10[%c0_178, %c1_179, %c0_180, %c0_181] : memref<2x6x10x16xf32, #tpu.memory_space<vmem>>, vector<2x4x1x16xf32>
    tpu.vector_store %arg10[%c0_178, %c1_179, %c0_180, %c0_181], %191 {strides = array<i32>} : memref<2x6x10x16xf32, #tpu.memory_space<vmem>>, vector<2x4x1x16xf32>,
    %cst_182 = arith.constant 0.000000e+00 : f32
    %193 = vector.broadcast %cst_182 : f32 to vector<2x4x5x16xf32>
    %c0_183 = arith.constant 0 : index
    %c1_184 = arith.constant 1 : index
    %c5_185 = arith.constant 5 : index
    %c0_186 = arith.constant 0 : index
    %194 = vector.load %arg10[%c0_183, %c1_184, %c5_185, %c0_186] : memref<2x6x10x16xf32, #tpu.memory_space<vmem>>, vector<2x4x5x16xf32>
    tpu.vector_store %arg10[%c0_183, %c1_184, %c5_185, %c0_186], %193 {strides = array<i32>} : memref<2x6x10x16xf32, #tpu.memory_space<vmem>>, vector<2x4x5x16xf32>,
    %c0_187 = arith.constant 0 : index
    %c1_188 = arith.constant 1 : index
    %c1_189 = arith.constant 1 : index
    %c0_190 = arith.constant 0 : index
    %195 = vector.load %arg10[%c0_187, %c1_188, %c1_189, %c0_190] : memref<2x6x10x16xf32, #tpu.memory_space<vmem>>, vector<2x4x4x16xf32>
    tpu.vector_store %arg10[%c0_187, %c1_188, %c1_189, %c0_190], %184 {strides = array<i32>} : memref<2x6x10x16xf32, #tpu.memory_space<vmem>>, vector<2x4x4x16xf32>,
    %cst_191 = arith.constant 0.000000e+00 : f32
    %196 = vector.broadcast %cst_191 : f32 to vector<64x16xf32>
    %c0_192 = arith.constant 0 : index
    %c0_193 = arith.constant 0 : index
    %c0_194 = arith.constant 0 : index
    %c0_195 = arith.constant 0 : index
    %197 = vector.load %arg10[%c0_192, %c0_193, %c0_194, %c0_195] : memref<2x6x10x16xf32, #tpu.memory_space<vmem>>, vector<2x4x8x16xf32>
    %198 = vector.shape_cast %197 : vector<2x4x8x16xf32> to vector<64x16xf32>
    %199 = arith.truncf %198 : vector<64x16xf32> to vector<64x16xbf16>
    %200 = vector.extract_strided_slice %186 {offsets = [0, 0, 0], sizes = [1, 16, 16], strides = [1, 1, 1]} : vector<9x16x16xbf16> to vector<1x16x16xbf16>
    %201 = vector.shape_cast %200 : vector<1x16x16xbf16> to vector<16x16xbf16>
    %cst_196 = arith.constant dense<0.000000e+00> : vector<64x16xf32>
    %202 = tpu.matmul %199, %201, %cst_196 {dimension_numbers = #tpu.dot_dimension_numbers<[1], [0], [0], [1], [0, 0, 1, 1], [], []>} : vector<64x16xbf16>, vector<16x16xbf16>, vector<64x16xf32> -> vector<64x16xf32>
    %203 = arith.addf %196, %202 : vector<64x16xf32>
    %c0_197 = arith.constant 0 : index
    %c0_198 = arith.constant 0 : index
    %c1_199 = arith.constant 1 : index
    %c0_200 = arith.constant 0 : index
    %204 = vector.load %arg10[%c0_197, %c0_198, %c1_199, %c0_200] : memref<2x6x10x16xf32, #tpu.memory_space<vmem>>, vector<2x4x8x16xf32>
    %205 = vector.shape_cast %204 : vector<2x4x8x16xf32> to vector<64x16xf32>
    %206 = arith.truncf %205 : vector<64x16xf32> to vector<64x16xbf16>
    %207 = vector.extract_strided_slice %186 {offsets = [1, 0, 0], sizes = [1, 16, 16], strides = [1, 1, 1]} : vector<9x16x16xbf16> to vector<1x16x16xbf16>
    %208 = vector.shape_cast %207 : vector<1x16x16xbf16> to vector<16x16xbf16>
    %cst_201 = arith.constant dense<0.000000e+00> : vector<64x16xf32>
    %209 = tpu.matmul %206, %208, %cst_201 {dimension_numbers = #tpu.dot_dimension_numbers<[1], [0], [0], [1], [0, 0, 1, 1], [], []>} : vector<64x16xbf16>, vector<16x16xbf16>, vector<64x16xf32> -> vector<64x16xf32>
    %210 = arith.addf %203, %209 : vector<64x16xf32>
    %c0_202 = arith.constant 0 : index
    %c0_203 = arith.constant 0 : index
    %c2_204 = arith.constant 2 : index
    %c0_205 = arith.constant 0 : index
    %211 = vector.load %arg10[%c0_202, %c0_203, %c2_204, %c0_205] : memref<2x6x10x16xf32, #tpu.memory_space<vmem>>, vector<2x4x8x16xf32>
    %212 = vector.shape_cast %211 : vector<2x4x8x16xf32> to vector<64x16xf32>
    %213 = arith.truncf %212 : vector<64x16xf32> to vector<64x16xbf16>
    %214 = vector.extract_strided_slice %186 {offsets = [2, 0, 0], sizes = [1, 16, 16], strides = [1, 1, 1]} : vector<9x16x16xbf16> to vector<1x16x16xbf16>
    %215 = vector.shape_cast %214 : vector<1x16x16xbf16> to vector<16x16xbf16>
    %cst_206 = arith.constant dense<0.000000e+00> : vector<64x16xf32>
    %216 = tpu.matmul %213, %215, %cst_206 {dimension_numbers = #tpu.dot_dimension_numbers<[1], [0], [0], [1], [0, 0, 1, 1], [], []>} : vector<64x16xbf16>, vector<16x16xbf16>, vector<64x16xf32> -> vector<64x16xf32>
    %217 = arith.addf %210, %216 : vector<64x16xf32>
    %c0_207 = arith.constant 0 : index
    %c1_208 = arith.constant 1 : index
    %c0_209 = arith.constant 0 : index
    %c0_210 = arith.constant 0 : index
    %218 = vector.load %arg10[%c0_207, %c1_208, %c0_209, %c0_210] : memref<2x6x10x16xf32, #tpu.memory_space<vmem>>, vector<2x4x8x16xf32>
    %219 = vector.shape_cast %218 : vector<2x4x8x16xf32> to vector<64x16xf32>
    %220 = arith.truncf %219 : vector<64x16xf32> to vector<64x16xbf16>
    %221 = vector.extract_strided_slice %186 {offsets = [3, 0, 0], sizes = [1, 16, 16], strides = [1, 1, 1]} : vector<9x16x16xbf16> to vector<1x16x16xbf16>
    %222 = vector.shape_cast %221 : vector<1x16x16xbf16> to vector<16x16xbf16>
    %cst_211 = arith.constant dense<0.000000e+00> : vector<64x16xf32>
    %223 = tpu.matmul %220, %222, %cst_211 {dimension_numbers = #tpu.dot_dimension_numbers<[1], [0], [0], [1], [0, 0, 1, 1], [], []>} : vector<64x16xbf16>, vector<16x16xbf16>, vector<64x16xf32> -> vector<64x16xf32>
    %224 = arith.addf %217, %223 : vector<64x16xf32>
    %c0_212 = arith.constant 0 : index
    %c1_213 = arith.constant 1 : index
    %c1_214 = arith.constant 1 : index
    %c0_215 = arith.constant 0 : index
    %225 = vector.load %arg10[%c0_212, %c1_213, %c1_214, %c0_215] : memref<2x6x10x16xf32, #tpu.memory_space<vmem>>, vector<2x4x8x16xf32>
    %226 = vector.shape_cast %225 : vector<2x4x8x16xf32> to vector<64x16xf32>
    %227 = arith.truncf %226 : vector<64x16xf32> to vector<64x16xbf16>
    %228 = vector.extract_strided_slice %186 {offsets = [4, 0, 0], sizes = [1, 16, 16], strides = [1, 1, 1]} : vector<9x16x16xbf16> to vector<1x16x16xbf16>
    %229 = vector.shape_cast %228 : vector<1x16x16xbf16> to vector<16x16xbf16>
    %cst_216 = arith.constant dense<0.000000e+00> : vector<64x16xf32>
    %230 = tpu.matmul %227, %229, %cst_216 {dimension_numbers = #tpu.dot_dimension_numbers<[1], [0], [0], [1], [0, 0, 1, 1], [], []>} : vector<64x16xbf16>, vector<16x16xbf16>, vector<64x16xf32> -> vector<64x16xf32>
    %231 = arith.addf %224, %230 : vector<64x16xf32>
    %c0_217 = arith.constant 0 : index
    %c1_218 = arith.constant 1 : index
    %c2_219 = arith.constant 2 : index
    %c0_220 = arith.constant 0 : index
    %232 = vector.load %arg10[%c0_217, %c1_218, %c2_219, %c0_220] : memref<2x6x10x16xf32, #tpu.memory_space<vmem>>, vector<2x4x8x16xf32>
    %233 = vector.shape_cast %232 : vector<2x4x8x16xf32> to vector<64x16xf32>
    %234 = arith.truncf %233 : vector<64x16xf32> to vector<64x16xbf16>
    %235 = vector.extract_strided_slice %186 {offsets = [5, 0, 0], sizes = [1, 16, 16], strides = [1, 1, 1]} : vector<9x16x16xbf16> to vector<1x16x16xbf16>
    %236 = vector.shape_cast %235 : vector<1x16x16xbf16> to vector<16x16xbf16>
    %cst_221 = arith.constant dense<0.000000e+00> : vector<64x16xf32>
    %237 = tpu.matmul %234, %236, %cst_221 {dimension_numbers = #tpu.dot_dimension_numbers<[1], [0], [0], [1], [0, 0, 1, 1], [], []>} : vector<64x16xbf16>, vector<16x16xbf16>, vector<64x16xf32> -> vector<64x16xf32>
    %238 = arith.addf %231, %237 : vector<64x16xf32>
    %c0_222 = arith.constant 0 : index
    %c2_223 = arith.constant 2 : index
    %c0_224 = arith.constant 0 : index
    %c0_225 = arith.constant 0 : index
    %239 = vector.load %arg10[%c0_222, %c2_223, %c0_224, %c0_225] : memref<2x6x10x16xf32, #tpu.memory_space<vmem>>, vector<2x4x8x16xf32>
    %240 = vector.shape_cast %239 : vector<2x4x8x16xf32> to vector<64x16xf32>
    %241 = arith.truncf %240 : vector<64x16xf32> to vector<64x16xbf16>
    %242 = vector.extract_strided_slice %186 {offsets = [6, 0, 0], sizes = [1, 16, 16], strides = [1, 1, 1]} : vector<9x16x16xbf16> to vector<1x16x16xbf16>
    %243 = vector.shape_cast %242 : vector<1x16x16xbf16> to vector<16x16xbf16>
    %cst_226 = arith.constant dense<0.000000e+00> : vector<64x16xf32>
    %244 = tpu.matmul %241, %243, %cst_226 {dimension_numbers = #tpu.dot_dimension_numbers<[1], [0], [0], [1], [0, 0, 1, 1], [], []>} : vector<64x16xbf16>, vector<16x16xbf16>, vector<64x16xf32> -> vector<64x16xf32>
    %245 = arith.addf %238, %244 : vector<64x16xf32>
    %c0_227 = arith.constant 0 : index
    %c2_228 = arith.constant 2 : index
    %c1_229 = arith.constant 1 : index
    %c0_230 = arith.constant 0 : index
    %246 = vector.load %arg10[%c0_227, %c2_228, %c1_229, %c0_230] : memref<2x6x10x16xf32, #tpu.memory_space<vmem>>, vector<2x4x8x16xf32>
    %247 = vector.shape_cast %246 : vector<2x4x8x16xf32> to vector<64x16xf32>
    %248 = arith.truncf %247 : vector<64x16xf32> to vector<64x16xbf16>
    %249 = vector.extract_strided_slice %186 {offsets = [7, 0, 0], sizes = [1, 16, 16], strides = [1, 1, 1]} : vector<9x16x16xbf16> to vector<1x16x16xbf16>
    %250 = vector.shape_cast %249 : vector<1x16x16xbf16> to vector<16x16xbf16>
    %cst_231 = arith.constant dense<0.000000e+00> : vector<64x16xf32>
    %251 = tpu.matmul %248, %250, %cst_231 {dimension_numbers = #tpu.dot_dimension_numbers<[1], [0], [0], [1], [0, 0, 1, 1], [], []>} : vector<64x16xbf16>, vector<16x16xbf16>, vector<64x16xf32> -> vector<64x16xf32>
    %252 = arith.addf %245, %251 : vector<64x16xf32>
    %c0_232 = arith.constant 0 : index
    %c2_233 = arith.constant 2 : index
    %c2_234 = arith.constant 2 : index
    %c0_235 = arith.constant 0 : index
    %253 = vector.load %arg10[%c0_232, %c2_233, %c2_234, %c0_235] : memref<2x6x10x16xf32, #tpu.memory_space<vmem>>, vector<2x4x8x16xf32>
    %254 = vector.shape_cast %253 : vector<2x4x8x16xf32> to vector<64x16xf32>
    %255 = arith.truncf %254 : vector<64x16xf32> to vector<64x16xbf16>
    %256 = vector.extract_strided_slice %186 {offsets = [8, 0, 0], sizes = [1, 16, 16], strides = [1, 1, 1]} : vector<9x16x16xbf16> to vector<1x16x16xbf16>
    %257 = vector.shape_cast %256 : vector<1x16x16xbf16> to vector<16x16xbf16>
    %cst_236 = arith.constant dense<0.000000e+00> : vector<64x16xf32>
    %258 = tpu.matmul %255, %257, %cst_236 {dimension_numbers = #tpu.dot_dimension_numbers<[1], [0], [0], [1], [0, 0, 1, 1], [], []>} : vector<64x16xbf16>, vector<16x16xbf16>, vector<64x16xf32> -> vector<64x16xf32>
    %259 = arith.addf %252, %258 : vector<64x16xf32>
    %260 = vector.shape_cast %259 : vector<64x16xf32> to vector<8x8x16xf32>
    %c0_237 = arith.constant 0 : index
    %c0_238 = arith.constant 0 : index
    %c0_239 = arith.constant 0 : index
    %261 = vector.load %arg11[%c0_237, %c0_238, %c0_239] : memref<8x8x16xf32, #tpu.memory_space<vmem>>, vector<8x8x16xf32>
    tpu.vector_store %arg11[%c0_237, %c0_238, %c0_239], %260 {strides = array<i32>} : memref<8x8x16xf32, #tpu.memory_space<vmem>>, vector<8x8x16xf32>,
    %c0_240 = arith.constant 0 : index
    %c0_241 = arith.constant 0 : index
    %c0_242 = arith.constant 0 : index
    %262 = tpu.strided_load %arg11[%c0_240, %c0_241, %c0_242] {strides = array<i32: 1, 2, 1>} : memref<8x8x16xf32, #tpu.memory_space<vmem>>, vector<8x2x16xf32>
    %c0_243 = arith.constant 0 : index
    %c1_244 = arith.constant 1 : index
    %c0_245 = arith.constant 0 : index
    %263 = tpu.strided_load %arg11[%c0_243, %c1_244, %c0_245] {strides = array<i32: 1, 2, 1>} : memref<8x8x16xf32, #tpu.memory_space<vmem>>, vector<8x2x16xf32>
    %264 = arith.maximumf %262, %263 : vector<8x2x16xf32>
    %265 = vector.shape_cast %264 : vector<8x2x16xf32> to vector<4x2x2x16xf32>
    %266 = vector.extract_strided_slice %265 {offsets = [0, 0, 0, 0], sizes = [4, 1, 2, 16], strides = [1, 1, 1, 1]} : vector<4x2x2x16xf32> to vector<4x1x2x16xf32>
    %267 = vector.shape_cast %266 : vector<4x1x2x16xf32> to vector<4x2x16xf32>
    %268 = vector.extract_strided_slice %265 {offsets = [0, 1, 0, 0], sizes = [4, 1, 2, 16], strides = [1, 1, 1, 1]} : vector<4x2x2x16xf32> to vector<4x1x2x16xf32>
    %269 = vector.shape_cast %268 : vector<4x1x2x16xf32> to vector<4x2x16xf32>
    %270 = arith.maximumf %267, %269 : vector<4x2x16xf32>
    %271 = vector.shape_cast %187 : vector<1x16xf32> to vector<1x1x16xf32>
    %272 = vector.broadcast %271 : vector<1x1x16xf32> to vector<4x2x16xf32>
    %273 = arith.addf %270, %272 : vector<4x2x16xf32>
    %cst_246 = arith.constant 0.000000e+00 : f32
    %274 = vector.broadcast %cst_246 : f32 to vector<4x2x16xf32>
    %275 = arith.maximumf %273, %274 : vector<4x2x16xf32>
    %276 = vector.shape_cast %275 : vector<4x2x16xf32> to vector<2x2x2x16xf32>
    %cst_247 = arith.constant 0.000000e+00 : f32
    %277 = vector.broadcast %cst_247 : f32 to vector<2x32xf32>
    %278 = vector.extract_strided_slice %276 {offsets = [0, 0, 0, 0], sizes = [2, 1, 1, 16], strides = [1, 1, 1, 1]} : vector<2x2x2x16xf32> to vector<2x1x1x16xf32>
    %279 = vector.shape_cast %278 : vector<2x1x1x16xf32> to vector<2x16xf32>
    %280 = arith.truncf %279 : vector<2x16xf32> to vector<2x16xbf16>
    %c0_248 = arith.constant 0 : index
    %c0_249 = arith.constant 0 : index
    %281 = vector.load %arg3[%c0_248, %c0_249] : memref<120x32xbf16, #tpu.memory_space<vmem>>, vector<16x32xbf16>
    %cst_250 = arith.constant dense<0.000000e+00> : vector<2x32xf32>
    %282 = tpu.matmul %280, %281, %cst_250 {dimension_numbers = #tpu.dot_dimension_numbers<[1], [0], [0], [1], [0, 0, 1, 1], [], []>} : vector<2x16xbf16>, vector<16x32xbf16>, vector<2x32xf32> -> vector<2x32xf32>
    %283 = arith.addf %277, %282 : vector<2x32xf32>
    %284 = vector.extract_strided_slice %276 {offsets = [0, 0, 1, 0], sizes = [2, 1, 1, 16], strides = [1, 1, 1, 1]} : vector<2x2x2x16xf32> to vector<2x1x1x16xf32>
    %285 = vector.shape_cast %284 : vector<2x1x1x16xf32> to vector<2x16xf32>
    %286 = arith.truncf %285 : vector<2x16xf32> to vector<2x16xbf16>
    %c16 = arith.constant 16 : index
    %c0_251 = arith.constant 0 : index
    %287 = vector.load %arg3[%c16, %c0_251] : memref<120x32xbf16, #tpu.memory_space<vmem>>, vector<16x32xbf16>
    %cst_252 = arith.constant dense<0.000000e+00> : vector<2x32xf32>
    %288 = tpu.matmul %286, %287, %cst_252 {dimension_numbers = #tpu.dot_dimension_numbers<[1], [0], [0], [1], [0, 0, 1, 1], [], []>} : vector<2x16xbf16>, vector<16x32xbf16>, vector<2x32xf32> -> vector<2x32xf32>
    %289 = arith.addf %283, %288 : vector<2x32xf32>
    %290 = vector.extract_strided_slice %276 {offsets = [0, 1, 0, 0], sizes = [2, 1, 1, 16], strides = [1, 1, 1, 1]} : vector<2x2x2x16xf32> to vector<2x1x1x16xf32>
    %291 = vector.shape_cast %290 : vector<2x1x1x16xf32> to vector<2x16xf32>
    %292 = arith.truncf %291 : vector<2x16xf32> to vector<2x16xbf16>
    %c32 = arith.constant 32 : index
    %c0_253 = arith.constant 0 : index
    %293 = vector.load %arg3[%c32, %c0_253] : memref<120x32xbf16, #tpu.memory_space<vmem>>, vector<16x32xbf16>
    %cst_254 = arith.constant dense<0.000000e+00> : vector<2x32xf32>
    %294 = tpu.matmul %292, %293, %cst_254 {dimension_numbers = #tpu.dot_dimension_numbers<[1], [0], [0], [1], [0, 0, 1, 1], [], []>} : vector<2x16xbf16>, vector<16x32xbf16>, vector<2x32xf32> -> vector<2x32xf32>
    %295 = arith.addf %289, %294 : vector<2x32xf32>
    %296 = vector.extract_strided_slice %276 {offsets = [0, 1, 1, 0], sizes = [2, 1, 1, 16], strides = [1, 1, 1, 1]} : vector<2x2x2x16xf32> to vector<2x1x1x16xf32>
    %297 = vector.shape_cast %296 : vector<2x1x1x16xf32> to vector<2x16xf32>
    %298 = arith.truncf %297 : vector<2x16xf32> to vector<2x16xbf16>
    %c48 = arith.constant 48 : index
    %c0_255 = arith.constant 0 : index
    %299 = vector.load %arg3[%c48, %c0_255] : memref<120x32xbf16, #tpu.memory_space<vmem>>, vector<16x32xbf16>
    %cst_256 = arith.constant dense<0.000000e+00> : vector<2x32xf32>
    %300 = tpu.matmul %298, %299, %cst_256 {dimension_numbers = #tpu.dot_dimension_numbers<[1], [0], [0], [1], [0, 0, 1, 1], [], []>} : vector<2x16xbf16>, vector<16x32xbf16>, vector<2x32xf32> -> vector<2x32xf32>
    %301 = arith.addf %295, %300 : vector<2x32xf32>
    %c3 = arith.constant 3 : index
    %c0_257 = arith.constant 0 : index
    %302 = vector.load %arg4[%c3, %c0_257] : memref<13x128xf32, #tpu.memory_space<vmem>>, vector<1x32xf32>
    %303 = vector.broadcast %302 : vector<1x32xf32> to vector<2x32xf32>
    %304 = arith.addf %301, %303 : vector<2x32xf32>
    %cst_258 = arith.constant 0.000000e+00 : f32
    %305 = vector.broadcast %cst_258 : f32 to vector<2x32xf32>
    %306 = arith.maximumf %304, %305 : vector<2x32xf32>
    %cst_259 = arith.constant dense<0.000000e+00> : vector<32xf32>
    %307 = vector.multi_reduction <add>, %306, %cst_259 [0] : vector<2x32xf32> to vector<32xf32>
    %308 = vector.shape_cast %307 : vector<32xf32> to vector<1x32xf32>
    %cst_260 = arith.constant 2.000000e+00 : f32
    %309 = vector.broadcast %cst_260 : f32 to vector<1x32xf32>
    %310 = arith.divf %308, %309 : vector<1x32xf32>
    %311 = vector.broadcast %310 : vector<1x32xf32> to vector<2x32xf32>
    %312 = arith.subf %306, %311 : vector<2x32xf32>
    %313 = arith.mulf %312, %312 : vector<2x32xf32>
    %cst_261 = arith.constant dense<0.000000e+00> : vector<32xf32>
    %314 = vector.multi_reduction <add>, %313, %cst_261 [0] : vector<2x32xf32> to vector<32xf32>
    %315 = vector.shape_cast %314 : vector<32xf32> to vector<1x32xf32>
    %cst_262 = arith.constant 2.000000e+00 : f32
    %316 = vector.broadcast %cst_262 : f32 to vector<1x32xf32>
    %317 = arith.divf %315, %316 : vector<1x32xf32>
    %318 = vector.broadcast %310 : vector<1x32xf32> to vector<2x32xf32>
    %319 = arith.subf %306, %318 : vector<2x32xf32>
    %cst_263 = arith.constant 9.99999974E-6 : f32
    %320 = vector.broadcast %cst_263 : f32 to vector<1x32xf32>
    %321 = arith.addf %317, %320 : vector<1x32xf32>
    %322 = math.rsqrt %321 : vector<1x32xf32>
    %323 = vector.broadcast %322 : vector<1x32xf32> to vector<2x32xf32>
    %324 = arith.mulf %319, %323 : vector<2x32xf32>
    %c7 = arith.constant 7 : index
    %c0_264 = arith.constant 0 : index
    %325 = vector.load %arg4[%c7, %c0_264] : memref<13x128xf32, #tpu.memory_space<vmem>>, vector<1x32xf32>
    %326 = vector.broadcast %325 : vector<1x32xf32> to vector<2x32xf32>
    %327 = arith.mulf %324, %326 : vector<2x32xf32>
    %c10 = arith.constant 10 : index
    %c0_265 = arith.constant 0 : index
    %328 = vector.load %arg4[%c10, %c0_265] : memref<13x128xf32, #tpu.memory_space<vmem>>, vector<1x32xf32>
    %329 = vector.broadcast %328 : vector<1x32xf32> to vector<2x32xf32>
    %330 = arith.addf %327, %329 : vector<2x32xf32>
    %331 = arith.truncf %330 : vector<2x32xf32> to vector<2x32xbf16>
    %c64 = arith.constant 64 : index
    %c0_266 = arith.constant 0 : index
    %332 = vector.load %arg3[%c64, %c0_266] : memref<120x32xbf16, #tpu.memory_space<vmem>>, vector<32x16xbf16>
    %cst_267 = arith.constant dense<0.000000e+00> : vector<2x16xf32>
    %333 = tpu.matmul %331, %332, %cst_267 {dimension_numbers = #tpu.dot_dimension_numbers<[1], [0], [0], [1], [0, 0, 1, 1], [], []>} : vector<2x32xbf16>, vector<32x16xbf16>, vector<2x16xf32> -> vector<2x16xf32>
    %c4 = arith.constant 4 : index
    %c0_268 = arith.constant 0 : index
    %334 = vector.load %arg4[%c4, %c0_268] : memref<13x128xf32, #tpu.memory_space<vmem>>, vector<1x16xf32>
    %335 = vector.broadcast %334 : vector<1x16xf32> to vector<2x16xf32>
    %336 = arith.addf %333, %335 : vector<2x16xf32>
    %cst_269 = arith.constant 0.000000e+00 : f32
    %337 = vector.broadcast %cst_269 : f32 to vector<2x16xf32>
    %338 = arith.maximumf %336, %337 : vector<2x16xf32>
    %cst_270 = arith.constant dense<0.000000e+00> : vector<16xf32>
    %339 = vector.multi_reduction <add>, %338, %cst_270 [0] : vector<2x16xf32> to vector<16xf32>
    %340 = vector.shape_cast %339 : vector<16xf32> to vector<1x16xf32>
    %cst_271 = arith.constant 2.000000e+00 : f32
    %341 = vector.broadcast %cst_271 : f32 to vector<1x16xf32>
    %342 = arith.divf %340, %341 : vector<1x16xf32>
    %343 = vector.broadcast %342 : vector<1x16xf32> to vector<2x16xf32>
    %344 = arith.subf %338, %343 : vector<2x16xf32>
    %345 = arith.mulf %344, %344 : vector<2x16xf32>
    %cst_272 = arith.constant dense<0.000000e+00> : vector<16xf32>
    %346 = vector.multi_reduction <add>, %345, %cst_272 [0] : vector<2x16xf32> to vector<16xf32>
    %347 = vector.shape_cast %346 : vector<16xf32> to vector<1x16xf32>
    %cst_273 = arith.constant 2.000000e+00 : f32
    %348 = vector.broadcast %cst_273 : f32 to vector<1x16xf32>
    %349 = arith.divf %347, %348 : vector<1x16xf32>
    %350 = vector.broadcast %342 : vector<1x16xf32> to vector<2x16xf32>
    %351 = arith.subf %338, %350 : vector<2x16xf32>
    %cst_274 = arith.constant 9.99999974E-6 : f32
    %352 = vector.broadcast %cst_274 : f32 to vector<1x16xf32>
    %353 = arith.addf %349, %352 : vector<1x16xf32>
    %354 = math.rsqrt %353 : vector<1x16xf32>
    %355 = vector.broadcast %354 : vector<1x16xf32> to vector<2x16xf32>
    %356 = arith.mulf %351, %355 : vector<2x16xf32>
    %c8 = arith.constant 8 : index
    %c0_275 = arith.constant 0 : index
    %357 = vector.load %arg4[%c8, %c0_275] : memref<13x128xf32, #tpu.memory_space<vmem>>, vector<1x16xf32>
    %358 = vector.broadcast %357 : vector<1x16xf32> to vector<2x16xf32>
    %359 = arith.mulf %356, %358 : vector<2x16xf32>
    %c11 = arith.constant 11 : index
    %c0_276 = arith.constant 0 : index
    %360 = vector.load %arg4[%c11, %c0_276] : memref<13x128xf32, #tpu.memory_space<vmem>>, vector<1x16xf32>
    %361 = vector.broadcast %360 : vector<1x16xf32> to vector<2x16xf32>
    %362 = arith.addf %359, %361 : vector<2x16xf32>
    %363 = arith.truncf %362 : vector<2x16xf32> to vector<2x16xbf16>
    %c96 = arith.constant 96 : index
    %c0_277 = arith.constant 0 : index
    %364 = vector.load %arg3[%c96, %c0_277] : memref<120x32xbf16, #tpu.memory_space<vmem>>, vector<16x8xbf16>
    %cst_278 = arith.constant dense<0.000000e+00> : vector<2x8xf32>
    %365 = tpu.matmul %363, %364, %cst_278 {dimension_numbers = #tpu.dot_dimension_numbers<[1], [0], [0], [1], [0, 0, 1, 1], [], []>} : vector<2x16xbf16>, vector<16x8xbf16>, vector<2x8xf32> -> vector<2x8xf32>
    %c5_279 = arith.constant 5 : index
    %c0_280 = arith.constant 0 : index
    %366 = vector.load %arg4[%c5_279, %c0_280] : memref<13x128xf32, #tpu.memory_space<vmem>>, vector<1x8xf32>
    %367 = vector.broadcast %366 : vector<1x8xf32> to vector<2x8xf32>
    %368 = arith.addf %365, %367 : vector<2x8xf32>
    %cst_281 = arith.constant 0.000000e+00 : f32
    %369 = vector.broadcast %cst_281 : f32 to vector<2x8xf32>
    %370 = arith.maximumf %368, %369 : vector<2x8xf32>
    %cst_282 = arith.constant dense<0.000000e+00> : vector<8xf32>
    %371 = vector.multi_reduction <add>, %370, %cst_282 [0] : vector<2x8xf32> to vector<8xf32>
    %372 = vector.shape_cast %371 : vector<8xf32> to vector<1x8xf32>
    %cst_283 = arith.constant 2.000000e+00 : f32
    %373 = vector.broadcast %cst_283 : f32 to vector<1x8xf32>
    %374 = arith.divf %372, %373 : vector<1x8xf32>
    %375 = vector.broadcast %374 : vector<1x8xf32> to vector<2x8xf32>
    %376 = arith.subf %370, %375 : vector<2x8xf32>
    %377 = arith.mulf %376, %376 : vector<2x8xf32>
    %cst_284 = arith.constant dense<0.000000e+00> : vector<8xf32>
    %378 = vector.multi_reduction <add>, %377, %cst_284 [0] : vector<2x8xf32> to vector<8xf32>
    %379 = vector.shape_cast %378 : vector<8xf32> to vector<1x8xf32>
    %cst_285 = arith.constant 2.000000e+00 : f32
    %380 = vector.broadcast %cst_285 : f32 to vector<1x8xf32>
    %381 = arith.divf %379, %380 : vector<1x8xf32>
    %382 = vector.broadcast %374 : vector<1x8xf32> to vector<2x8xf32>
    %383 = arith.subf %370, %382 : vector<2x8xf32>
    %cst_286 = arith.constant 9.99999974E-6 : f32
    %384 = vector.broadcast %cst_286 : f32 to vector<1x8xf32>
    %385 = arith.addf %381, %384 : vector<1x8xf32>
    %386 = math.rsqrt %385 : vector<1x8xf32>
    %387 = vector.broadcast %386 : vector<1x8xf32> to vector<2x8xf32>
    %388 = arith.mulf %383, %387 : vector<2x8xf32>
    %c9_287 = arith.constant 9 : index
    %c0_288 = arith.constant 0 : index
    %389 = vector.load %arg4[%c9_287, %c0_288] : memref<13x128xf32, #tpu.memory_space<vmem>>, vector<1x8xf32>
    %390 = vector.broadcast %389 : vector<1x8xf32> to vector<2x8xf32>
    %391 = arith.mulf %388, %390 : vector<2x8xf32>
    %c12 = arith.constant 12 : index
    %c0_289 = arith.constant 0 : index
    %392 = vector.load %arg4[%c12, %c0_289] : memref<13x128xf32, #tpu.memory_space<vmem>>, vector<1x8xf32>
    %393 = vector.broadcast %392 : vector<1x8xf32> to vector<2x8xf32>
    %394 = arith.addf %391, %393 : vector<2x8xf32>
    %395 = arith.truncf %394 : vector<2x8xf32> to vector<2x8xbf16>
    %c112 = arith.constant 112 : index
    %c0_290 = arith.constant 0 : index
    %396 = vector.load %arg3[%c112, %c0_290] : memref<120x32xbf16, #tpu.memory_space<vmem>>, vector<8x4xbf16>
    %cst_291 = arith.constant dense<0.000000e+00> : vector<2x4xf32>
    %397 = tpu.matmul %395, %396, %cst_291 {dimension_numbers = #tpu.dot_dimension_numbers<[1], [0], [0], [1], [0, 0, 1, 1], [], []>} : vector<2x8xbf16>, vector<8x4xbf16>, vector<2x4xf32> -> vector<2x4xf32>
    %c6 = arith.constant 6 : index
    %c0_292 = arith.constant 0 : index
    %398 = vector.load %arg4[%c6, %c0_292] : memref<13x128xf32, #tpu.memory_space<vmem>>, vector<1x4xf32>
    %399 = vector.broadcast %398 : vector<1x4xf32> to vector<2x4xf32>
    %400 = arith.addf %397, %399 : vector<2x4xf32>
    %c0_293 = arith.constant 0 : index
    %c0_294 = arith.constant 0 : index
    %401 = vector.load %arg5[%c0_293, %c0_294] : memref<2x4xf32, #tpu.memory_space<vmem>>, vector<2x4xf32>
    tpu.vector_store %arg5[%c0_293, %c0_294], %400 {strides = array<i32>} : memref<2x4xf32, #tpu.memory_space<vmem>>, vector<2x4xf32>,
    return
  }
}

</mosaic_0001>

<bundles_post_ra>
// kernel: encoder_forward.1
= control target key start
LH: loop header
LB: loop body
LE: loop exit
PB: predicated region body
PF: predicated region fallthrough
CT: control target
= control target key end

     0   :  { %vm565_vm0 = vcmask 1041408   ;;  %vm132_vm1 = vcmask 31744   ;;  %vm135_vm2 = vcmask 25600   ;;  %v13116_v2 = vmov 0.0   ;;  %s13110_s0 = inlined_call_operand.vmem [shape: f32[2,16,16,4], index: 0, kind: input, shape index: {}]   ;;  %s13111_s1 = inlined_call_operand.vmem [shape: bf16[9,4,16], index: 1, kind: input, shape index: {}]   ;;  %s13112_s2 = inlined_call_operand.vmem [shape: bf16[2,9,16,16], index: 2, kind: input, shape index: {}]   ;;  %s13113_s3 = inlined_call_operand.vmem [shape: bf16[120,32], index: 3, kind: input, shape index: {}]   ;;  %s13114_s4 = inlined_call_operand.vmem [shape: f32[13,128], index: 4, kind: input, shape index: {}]   ;;  %s13115_s5 = inlined_call_operand.hbm [shape: f32[2,4], index: 5, kind: output, shape index: {}]  }
   0x1   :  { %v24_v0 = vld [vmem:[%s13111_s1 + $0x4] sm:$0x3]  ;;  %133 = vst.msk [vmem:[#allocation2] sm:$0xff] %vm132_vm1, %v13116_v2  ;;  %134 = vst.msk [vmem:[#allocation2 + $0x8] sm:$0xff] %vm132_vm1, %v13116_v2  ;;  %v11173_v3 = vld [vmem:[%s13111_s1 + $0x6] sm:$0x3] }
   0x2   :  { %11039 = vmatprep.subr.msk.bf16.mxu0 %vm565_vm0, %v24_v0  ;;  %v11144_v1 = vsel %vm565_vm0, %v24_v0, 0  ;;  %136 = vst.msk [vmem:[#allocation2 + $0x10] sm:$0x3] %vm135_vm2, %v13116_v2  ;;  %139 = vst.msk [vmem:[#allocation2 + $0x1c0] sm:$0x3] %vm135_vm2, %v13116_v2  ;;  %v67_v4 = vld [vmem:[%s13110_s0] sm:$0xff] }
   0x3   :  { %137 = vst.msk [vmem:[#allocation2 + $0x1b0] sm:$0xff] %vm132_vm1, %v13116_v2  ;;  %138 = vst.msk [vmem:[#allocation2 + $0x1b8] sm:$0xff] %vm132_vm1, %v13116_v2  ;;  %v68_v5 = vld [vmem:[%s13110_s0 + $0x8] sm:$0xff]  ;;  %vm148_vm3 = vcmask 24576   ;;  %9574 = vmatpush3.bf16.msra.mxu0 %v11144_v1  ;;  %v69_v6 = vld [vmem:[%s13110_s0 + $0x10] sm:$0xff]  ;;  %v1987_v32 = vsel %vm565_vm0, %v11173_v3, 0 }
   0x4   :  { %141 = vst.msk [vmem:[#allocation2 + $0x198] sm:$0xff] %vm132_vm1, %v13116_v2  ;;  %142 = vst.msk [vmem:[#allocation2 + $0x1a0] sm:$0xff] %vm132_vm1, %v13116_v2  ;;  %v70_v7 = vld [vmem:[%s13110_s0 + $0x18] sm:$0xff]  ;;  %v71_v8 = vld [vmem:[%s13110_s0 + $0x20] sm:$0xff]  ;;  %11041 = vmatprep.subr.msk.bf16.mxu0 %vm565_vm0, %v11173_v3 }
   0x5   :  { %143 = vst.msk [vmem:[#allocation2 + $0x1a8] sm:$0x3] %vm135_vm2, %v13116_v2  ;;  %146 = vst.msk [vmem:[#allocation2 + $0x358] sm:$0x3] %vm135_vm2, %v13116_v2  ;;  %v72_v9 = vld [vmem:[%s13110_s0 + $0x28] sm:$0xff]  ;;  %v73_v10 = vld [vmem:[%s13110_s0 + $0x30] sm:$0xff] }
   0x6   :  { %144 = vst.msk [vmem:[#allocation2 + $0x348] sm:$0xff] %vm132_vm1, %v13116_v2  ;;  %145 = vst.msk [vmem:[#allocation2 + $0x350] sm:$0xff] %vm132_vm1, %v13116_v2  ;;  %v74_v11 = vld [vmem:[%s13110_s0 + $0x38] sm:$0xff]  ;;  %v75_v12 = vld [vmem:[%s13110_s0 + $0x40] sm:$0xff] }
   0x7   :  { %181 = vst.msk [vmem:[#allocation2 + $0x29] sm:$0x1] %vm148_vm3, %v13116_v2  ;;  %149 = vst.msk [vmem:[#allocation2 + $0x18] sm:$0x1] %vm148_vm3, %v13116_v2  ;;  %v76_v13 = vld [vmem:[%s13110_s0 + $0x48] sm:$0xff]  ;;  %v77_v14 = vld [vmem:[%s13110_s0 + $0x50] sm:$0xff] }
   0x8   :  { %213 = vst.msk [vmem:[#allocation2 + $0x19] sm:$0xff] %vm132_vm1, %v67_v4  ;;  %214 = vst.msk [vmem:[#allocation2 + $0x21] sm:$0xff] %vm132_vm1, %v68_v5  ;;  %v78_v15 = vld [vmem:[%s13110_s0 + $0x58] sm:$0xff]  ;;  %v79_v16 = vld [vmem:[%s13110_s0 + $0x60] sm:$0xff] }
   0x9   :  { %150 = vst.msk [vmem:[#allocation2 + $0x30] sm:$0x1] %vm148_vm3, %v13116_v2  ;;  %151 = vst.msk [vmem:[#allocation2 + $0x48] sm:$0x1] %vm148_vm3, %v13116_v2  ;;  %v80_v17 = vld [vmem:[%s13110_s0 + $0x68] sm:$0xff]  ;;  %v81_v18 = vld [vmem:[%s13110_s0 + $0x70] sm:$0xff] }
   0xa   :  { %152 = vst.msk [vmem:[#allocation2 + $0x60] sm:$0x1] %vm148_vm3, %v13116_v2  ;;  %153 = vst.msk [vmem:[#allocation2 + $0x78] sm:$0x1] %vm148_vm3, %v13116_v2  ;;  %v82_v19 = vld [vmem:[%s13110_s0 + $0x78] sm:$0xff]  ;;  %v83_v20 = vld [vmem:[%s13110_s0 + $0x80] sm:$0xff] }
   0xb   :  { %154 = vst.msk [vmem:[#allocation2 + $0x90] sm:$0x1] %vm148_vm3, %v13116_v2  ;;  %155 = vst.msk [vmem:[#allocation2 + $0xa8] sm:$0x1] %vm148_vm3, %v13116_v2  ;;  %v84_v21 = vld [vmem:[%s13110_s0 + $0x88] sm:$0xff]  ;;  %v85_v22 = vld [vmem:[%s13110_s0 + $0x90] sm:$0xff] }
   0xc   :  { %156 = vst.msk [vmem:[#allocation2 + $0xc0] sm:$0x1] %vm148_vm3, %v13116_v2  ;;  %157 = vst.msk [vmem:[#allocation2 + $0xd8] sm:$0x1] %vm148_vm3, %v13116_v2  ;;  %v86_v23 = vld [vmem:[%s13110_s0 + $0x98] sm:$0xff]  ;;  %v1246_v24 = vld [vmem:[#allocation2 + $0x2] sm:$0xff] }
   0xd   :  { %158 = vst.msk [vmem:[#allocation2 + $0xf0] sm:$0x1] %vm148_vm3, %v13116_v2  ;;  %159 = vst.msk [vmem:[#allocation2 + $0x108] sm:$0x1] %vm148_vm3, %v13116_v2  ;;  %v1247_v25 = vld [vmem:[#allocation2 + $0xa] sm:$0xff]  ;;  %v87_v26 = vld [vmem:[%s13110_s0 + $0xa0] sm:$0xff] }
   0xe   :  { %160 = vst.msk [vmem:[#allocation2 + $0x120] sm:$0x1] %vm148_vm3, %v13116_v2  ;;  %161 = vst.msk [vmem:[#allocation2 + $0x138] sm:$0x1] %vm148_vm3, %v13116_v2  ;;  %v1310_v27 = vpack.c.bf16 %v1247_v25, %v1246_v24  ;;  %v88_v30 = vld [vmem:[%s13110_s0 + $0xa8] sm:$0xff]  ;;  %v89_v35 = vld [vmem:[%s13110_s0 + $0xb0] sm:$0xff] }
   0xf   :  { %162 = vst.msk [vmem:[#allocation2 + $0x150] sm:$0x1] %vm148_vm3, %v13116_v2  ;;  %163 = vst.msk [vmem:[#allocation2 + $0x168] sm:$0x1] %vm148_vm3, %v13116_v2  ;;  %v1248_v28 = vld [vmem:[#allocation2 + $0x1a] sm:$0xff]  ;;  %v1249_v29 = vld [vmem:[#allocation2 + $0x22] sm:$0xff] }
  0x10   :  { %164 = vst.msk [vmem:[#allocation2 + $0x180] sm:$0x1] %vm148_vm3, %v13116_v2  ;;  %165 = vst.msk [vmem:[#allocation2 + $0x1c8] sm:$0x1] %vm148_vm3, %v13116_v2  ;;  %v1311_v31 = vpack.c.bf16 %v1249_v29, %v1248_v28  ;;  %9575 = vmatprep.mubr.msk.bf16.mxu0 %vm132_vm1, %v1310_v27  ;;  %v90_v42 = vld [vmem:[%s13110_s0 + $0xb8] sm:$0xff]  ;;  %v91_v43 = vld [vmem:[%s13110_s0 + $0xc0] sm:$0xff] }
  0x11   :  { %166 = vst.msk [vmem:[#allocation2 + $0x1e0] sm:$0x1] %vm148_vm3, %v13116_v2  ;;  %167 = vst.msk [vmem:[#allocation2 + $0x1f8] sm:$0x1] %vm148_vm3, %v13116_v2  ;;  %v92_v45 = vld [vmem:[%s13110_s0 + $0xc8] sm:$0xff]  ;;  %v93_v57 = vld [vmem:[%s13110_s0 + $0xd0] sm:$0xff] }
  0x12   :  { %168 = vst.msk [vmem:[#allocation2 + $0x210] sm:$0x1] %vm148_vm3, %v13116_v2  ;;  %169 = vst.msk [vmem:[#allocation2 + $0x228] sm:$0x1] %vm148_vm3, %v13116_v2  ;;  %9576 = vmatmul.mubr.msk.bf16.vlgmr.msra.gmra.mrb[0].mxu0 %vm132_vm1, %v1311_v31  ;;  %v11425_v46 = vld [vmem:[%s13111_s1 + $0x8] sm:$0x3] }
  0x13   :  { %170 = vst.msk [vmem:[#allocation2 + $0x240] sm:$0x1] %vm148_vm3, %v13116_v2  ;;  %171 = vst.msk [vmem:[#allocation2 + $0x258] sm:$0x1] %vm148_vm3, %v13116_v2  ;;  %9640 = vmatpush3.bf16.msra.mxu0 %v1987_v32  ;;  %v94_v58 = vld [vmem:[%s13110_s0 + $0xd8] sm:$0xff]  ;;  %v95_v59 = vld [vmem:[%s13110_s0 + $0xe0] sm:$0xff] }
  0x14   :  { %172 = vst.msk [vmem:[#allocation2 + $0x270] sm:$0x1] %vm148_vm3, %v13116_v2  ;;  %173 = vst.msk [vmem:[#allocation2 + $0x288] sm:$0x1] %vm148_vm3, %v13116_v2  ;;  %11042 = vmatprep.subr.msk.bf16.mxu0 %vm565_vm0, %v11425_v46  ;;  %v96_v60 = vld [vmem:[%s13110_s0 + $0xe8] sm:$0xff]  ;;  %v97_v61 = vld [vmem:[%s13110_s0 + $0xf0] sm:$0xff] }
  0x15   :  { %174 = vst.msk [vmem:[#allocation2 + $0x2a0] sm:$0x1] %vm148_vm3, %v13116_v2  ;;  %175 = vst.msk [vmem:[#allocation2 + $0x2b8] sm:$0x1] %vm148_vm3, %v13116_v2  ;;  %v98_v62 = vld [vmem:[%s13110_s0 + $0xf8] sm:$0xff]  ;;  %v99_v63 = vld [vmem:[%s13110_s0 + $0x100] sm:$0xff] }
  0x16   :  { %176 = vst.msk [vmem:[#allocation2 + $0x2d0] sm:$0x1] %vm148_vm3, %v13116_v2  ;;  %177 = vst.msk [vmem:[#allocation2 + $0x2e8] sm:$0x1] %vm148_vm3, %v13116_v2  ;;  %v100_v0 = vld [vmem:[%s13110_s0 + $0x108] sm:$0xff]  ;;  %v101_v3 = vld [vmem:[%s13110_s0 + $0x110] sm:$0xff] }
  0x17   :  { %178 = vst.msk [vmem:[#allocation2 + $0x300] sm:$0x1] %vm148_vm3, %v13116_v2  ;;  %179 = vst.msk [vmem:[#allocation2 + $0x318] sm:$0x1] %vm148_vm3, %v13116_v2  ;;  %v102_v4 = vld [vmem:[%s13110_s0 + $0x118] sm:$0xff]  ;;  %v103_v5 = vld [vmem:[%s13110_s0 + $0x120] sm:$0xff] }
  0x18   :  { %180 = vst.msk [vmem:[#allocation2 + $0x330] sm:$0x1] %vm148_vm3, %v13116_v2  ;;  %182 = vst.msk [vmem:[#allocation2 + $0x41] sm:$0x1] %vm148_vm3, %v13116_v2  ;;  %v117_v31 = vld [vmem:[%s13110_s0 + $0x190] sm:$0xff]  ;;  %v118_v32 = vld [vmem:[%s13110_s0 + $0x198] sm:$0xff] }
  0x19   :  { %183 = vst.msk [vmem:[#allocation2 + $0x59] sm:$0x1] %vm148_vm3, %v13116_v2  ;;  %184 = vst.msk [vmem:[#allocation2 + $0x71] sm:$0x1] %vm148_vm3, %v13116_v2 }
  0x1a   :  { %185 = vst.msk [vmem:[#allocation2 + $0x89] sm:$0x1] %vm148_vm3, %v13116_v2  ;;  %186 = vst.msk [vmem:[#allocation2 + $0xa1] sm:$0x1] %vm148_vm3, %v13116_v2 }
  0x1b   :  { %187 = vst.msk [vmem:[#allocation2 + $0xb9] sm:$0x1] %vm148_vm3, %v13116_v2  ;;  %188 = vst.msk [vmem:[#allocation2 + $0xd1] sm:$0x1] %vm148_vm3, %v13116_v2 }
  0x1c   :  { %189 = vst.msk [vmem:[#allocation2 + $0xe9] sm:$0x1] %vm148_vm3, %v13116_v2  ;;  %190 = vst.msk [vmem:[#allocation2 + $0x101] sm:$0x1] %vm148_vm3, %v13116_v2 }
  0x1d   :  { %191 = vst.msk [vmem:[#allocation2 + $0x119] sm:$0x1] %vm148_vm3, %v13116_v2  ;;  %192 = vst.msk [vmem:[#allocation2 + $0x131] sm:$0x1] %vm148_vm3, %v13116_v2 }
  0x1e   :  { %193 = vst.msk [vmem:[#allocation2 + $0x149] sm:$0x1] %vm148_vm3, %v13116_v2  ;;  %194 = vst.msk [vmem:[#allocation2 + $0x161] sm:$0x1] %vm148_vm3, %v13116_v2 }
  0x1f   :  { %195 = vst.msk [vmem:[#allocation2 + $0x179] sm:$0x1] %vm148_vm3, %v13116_v2  ;;  %196 = vst.msk [vmem:[#allocation2 + $0x191] sm:$0x1] %vm148_vm3, %v13116_v2 }
  0x20   :  { %197 = vst.msk [vmem:[#allocation2 + $0x1d9] sm:$0x1] %vm148_vm3, %v13116_v2  ;;  %198 = vst.msk [vmem:[#allocation2 + $0x1f1] sm:$0x1] %vm148_vm3, %v13116_v2 }
  0x21   :  { %199 = vst.msk [vmem:[#allocation2 + $0x209] sm:$0x1] %vm148_vm3, %v13116_v2  ;;  %200 = vst.msk [vmem:[#allocation2 + $0x221] sm:$0x1] %vm148_vm3, %v13116_v2 }
  0x22   :  { %201 = vst.msk [vmem:[#allocation2 + $0x239] sm:$0x1] %vm148_vm3, %v13116_v2  ;;  %202 = vst.msk [vmem:[#allocation2 + $0x251] sm:$0x1] %vm148_vm3, %v13116_v2 }
  0x23   :  { %203 = vst.msk [vmem:[#allocation2 + $0x269] sm:$0x1] %vm148_vm3, %v13116_v2  ;;  %204 = vst.msk [vmem:[#allocation2 + $0x281] sm:$0x1] %vm148_vm3, %v13116_v2 }
  0x24   :  { %205 = vst.msk [vmem:[#allocation2 + $0x299] sm:$0x1] %vm148_vm3, %v13116_v2  ;;  %206 = vst.msk [vmem:[#allocation2 + $0x2b1] sm:$0x1] %vm148_vm3, %v13116_v2 }
  0x25   :  { %207 = vst.msk [vmem:[#allocation2 + $0x2c9] sm:$0x1] %vm148_vm3, %v13116_v2  ;;  %208 = vst.msk [vmem:[#allocation2 + $0x2e1] sm:$0x1] %vm148_vm3, %v13116_v2 }
  0x26   :  { %209 = vst.msk [vmem:[#allocation2 + $0x2f9] sm:$0x1] %vm148_vm3, %v13116_v2  ;;  %210 = vst.msk [vmem:[#allocation2 + $0x311] sm:$0x1] %vm148_vm3, %v13116_v2 }
  0x27   :  { %211 = vst.msk [vmem:[#allocation2 + $0x329] sm:$0x1] %vm148_vm3, %v13116_v2  ;;  %212 = vst.msk [vmem:[#allocation2 + $0x341] sm:$0x1] %vm148_vm3, %v13116_v2 }
  0x28   :  { %215 = vst.msk [vmem:[#allocation2 + $0x31] sm:$0xff] %vm132_vm1, %v69_v6  ;;  %216 = vst.msk [vmem:[#allocation2 + $0x39] sm:$0xff] %vm132_vm1, %v70_v7  ;;  %v104_v7 = vld [vmem:[%s13110_s0 + $0x128] sm:$0xff] }
  0x29   :  { %217 = vst.msk [vmem:[#allocation2 + $0x49] sm:$0xff] %vm132_vm1, %v71_v8  ;;  %218 = vst.msk [vmem:[#allocation2 + $0x51] sm:$0xff] %vm132_vm1, %v72_v9  ;;  %v105_v8 = vld [vmem:[%s13110_s0 + $0x130] sm:$0xff]  ;;  %v106_v9 = vld [vmem:[%s13110_s0 + $0x138] sm:$0xff] }
  0x2a   :  { %219 = vst.msk [vmem:[#allocation2 + $0x61] sm:$0xff] %vm132_vm1, %v73_v10  ;;  %220 = vst.msk [vmem:[#allocation2 + $0x69] sm:$0xff] %vm132_vm1, %v74_v11  ;;  %v107_v11 = vld [vmem:[%s13110_s0 + $0x140] sm:$0xff] }
  0x2b   :  { %221 = vst.msk [vmem:[#allocation2 + $0x79] sm:$0xff] %vm132_vm1, %v75_v12  ;;  %222 = vst.msk [vmem:[#allocation2 + $0x81] sm:$0xff] %vm132_vm1, %v76_v13  ;;  %v108_v12 = vld [vmem:[%s13110_s0 + $0x148] sm:$0xff]  ;;  %v109_v13 = vld [vmem:[%s13110_s0 + $0x150] sm:$0xff] }
  0x2c   :  { %223 = vst.msk [vmem:[#allocation2 + $0x91] sm:$0xff] %vm132_vm1, %v77_v14  ;;  %224 = vst.msk [vmem:[#allocation2 + $0x99] sm:$0xff] %vm132_vm1, %v78_v15  ;;  %v110_v14 = vld [vmem:[%s13110_s0 + $0x158] sm:$0xff]  ;;  %v111_v15 = vld [vmem:[%s13110_s0 + $0x160] sm:$0xff] }
  0x2d   :  { %225 = vst.msk [vmem:[#allocation2 + $0xa9] sm:$0xff] %vm132_vm1, %v79_v16  ;;  %226 = vst.msk [vmem:[#allocation2 + $0xb1] sm:$0xff] %vm132_vm1, %v80_v17  ;;  %v112_v16 = vld [vmem:[%s13110_s0 + $0x168] sm:$0xff]  ;;  %v113_v17 = vld [vmem:[%s13110_s0 + $0x170] sm:$0xff] }
  0x2e   :  { %227 = vst.msk [vmem:[#allocation2 + $0xc1] sm:$0xff] %vm132_vm1, %v81_v18  ;;  %228 = vst.msk [vmem:[#allocation2 + $0xc9] sm:$0xff] %vm132_vm1, %v82_v19  ;;  %v114_v18 = vld [vmem:[%s13110_s0 + $0x178] sm:$0xff]  ;;  %v115_v19 = vld [vmem:[%s13110_s0 + $0x180] sm:$0xff] }
  0x2f   :  { %229 = vst.msk [vmem:[#allocation2 + $0xd9] sm:$0xff] %vm132_vm1, %v83_v20  ;;  %230 = vst.msk [vmem:[#allocation2 + $0xe1] sm:$0xff] %vm132_vm1, %v84_v21  ;;  %v1250_v33 = vld [vmem:[#allocation2 + $0x32] sm:$0xff]  ;;  %v1251_v34 = vld [vmem:[#allocation2 + $0x3a] sm:$0xff] }
  0x30   :  { %231 = vst.msk [vmem:[#allocation2 + $0xf1] sm:$0xff] %vm132_vm1, %v85_v22  ;;  %232 = vst.msk [vmem:[#allocation2 + $0xf9] sm:$0xff] %vm132_vm1, %v86_v23  ;;  %v11400_v36 = vpack.c.bf16 %v1251_v34, %v1250_v33  ;;  %v1252_v37 = vld [vmem:[#allocation2 + $0x4a] sm:$0xff]  ;;  %v1253_v38 = vld [vmem:[#allocation2 + $0x52] sm:$0xff] }
  0x31   :  { %233 = vst.msk [vmem:[#allocation2 + $0x109] sm:$0xff] %vm132_vm1, %v87_v26  ;;  %234 = vst.msk [vmem:[#allocation2 + $0x111] sm:$0xff] %vm132_vm1, %v88_v30  ;;  %v1254_v39 = vld [vmem:[#allocation2 + $0x62] sm:$0xff]  ;;  %v1255_v40 = vld [vmem:[#allocation2 + $0x6a] sm:$0xff]  ;;  %v11406_v41 = vpack.c.bf16 %v1253_v38, %v1252_v37 }
  0x32   :  { %235 = vst.msk [vmem:[#allocation2 + $0x121] sm:$0xff] %vm132_vm1, %v89_v35  ;;  %9579 = vmatprep.mubr.msk.bf16.mxu0 %vm132_vm1, %v11400_v36  ;;  %v11414_v44 = vpack.c.bf16 %v1255_v40, %v1254_v39  ;;  %236 = vst.msk [vmem:[#allocation2 + $0x129] sm:$0xff] %vm132_vm1, %v90_v42  ;;  %v1256_v47 = vld [vmem:[#allocation2 + $0x7a] sm:$0xff]  ;;  %v1257_v48 = vld [vmem:[#allocation2 + $0x82] sm:$0xff] }
  0x33   :  { %237 = vst.msk [vmem:[#allocation2 + $0x139] sm:$0xff] %vm132_vm1, %v91_v43  ;;  %238 = vst.msk [vmem:[#allocation2 + $0x141] sm:$0xff] %vm132_vm1, %v92_v45  ;;  %9580 = vmatmul.mubr.msk.bf16.gmra.mrb[4].mxu0 %vm132_vm1, %v11406_v41  ;;  %v1258_v49 = vld [vmem:[#allocation2 + $0x92] sm:$0xff]  ;;  %v1259_v50 = vld [vmem:[#allocation2 + $0x9a] sm:$0xff]  ;;  %v11433_v51 = vpack.c.bf16 %v1257_v48, %v1256_v47 }
  0x34   :  { %9583 = vmatprep.mubr.msk.bf16.mxu0 %vm132_vm1, %v11414_v44  ;;  %v11435_v52 = vpack.c.bf16 %v1259_v50, %v1258_v49  ;;  %v1260_v53 = vld [vmem:[#allocation2 + $0xaa] sm:$0xff]  ;;  %v1261_v54 = vld [vmem:[#allocation2 + $0xb2] sm:$0xff]  ;;  %239 = vst.msk [vmem:[#allocation2 + $0x151] sm:$0xff] %vm132_vm1, %v93_v57  ;;  %240 = vst.msk [vmem:[#allocation2 + $0x159] sm:$0xff] %vm132_vm1, %v94_v58 }
  0x35   :  { %v1262_v55 = vld [vmem:[#allocation2 + $0xc2] sm:$0xff]  ;;  %v1263_v56 = vld [vmem:[#allocation2 + $0xca] sm:$0xff]  ;;  %241 = vst.msk [vmem:[#allocation2 + $0x169] sm:$0xff] %vm132_vm1, %v95_v59  ;;  %242 = vst.msk [vmem:[#allocation2 + $0x171] sm:$0xff] %vm132_vm1, %v96_v60  ;;  %v11482_v6 = vpack.c.bf16 %v1261_v54, %v1260_v53 }
  0x36   :  { %243 = vst.msk [vmem:[#allocation2 + $0x181] sm:$0xff] %vm132_vm1, %v97_v61  ;;  %244 = vst.msk [vmem:[#allocation2 + $0x189] sm:$0xff] %vm132_vm1, %v98_v62  ;;  %v11496_v10 = vpack.c.bf16 %v1263_v56, %v1262_v55  ;;  %v116_v20 = vld [vmem:[%s13110_s0 + $0x188] sm:$0xff]  ;;  %v1264_v21 = vld [vmem:[#allocation2 + $0xda] sm:$0xff]  ;;  %v2535_v61 = vsel %vm565_vm0, %v11425_v46, 0 }
  0x37   :  { %245 = vst.msk [vmem:[#allocation2 + $0x1c9] sm:$0xff] %vm132_vm1, %v99_v63  ;;  %246 = vst.msk [vmem:[#allocation2 + $0x1d1] sm:$0xff] %vm132_vm1, %v100_v0  ;;  %v1265_v22 = vld [vmem:[#allocation2 + $0xe2] sm:$0xff]  ;;  %v1266_v23 = vld [vmem:[#allocation2 + $0xf2] sm:$0xff] }
  0x38   :  { %247 = vst.msk [vmem:[#allocation2 + $0x1e1] sm:$0xff] %vm132_vm1, %v101_v3  ;;  %248 = vst.msk [vmem:[#allocation2 + $0x1e9] sm:$0xff] %vm132_vm1, %v102_v4  ;;  %v1267_v24 = vld [vmem:[#allocation2 + $0xfa] sm:$0xff]  ;;  %v11545_v25 = vpack.c.bf16 %v1265_v22, %v1264_v21  ;;  %v1268_v27 = vld [vmem:[#allocation2 + $0x10a] sm:$0xff] }
  0x39   :  { %249 = vst.msk [vmem:[#allocation2 + $0x1f9] sm:$0xff] %vm132_vm1, %v103_v5  ;;  %250 = vst.msk [vmem:[#allocation2 + $0x201] sm:$0xff] %vm132_vm1, %v104_v7  ;;  %v11547_v26 = vpack.c.bf16 %v1267_v24, %v1266_v23  ;;  %v1269_v28 = vld [vmem:[#allocation2 + $0x112] sm:$0xff]  ;;  %v1270_v29 = vld [vmem:[#allocation2 + $0x122] sm:$0xff] }
  0x3a   :  { %251 = vst.msk [vmem:[#allocation2 + $0x211] sm:$0xff] %vm132_vm1, %v105_v8  ;;  %252 = vst.msk [vmem:[#allocation2 + $0x219] sm:$0xff] %vm132_vm1, %v106_v9  ;;  %v1271_v30 = vld [vmem:[#allocation2 + $0x12a] sm:$0xff]  ;;  %v119_v33 = vld [vmem:[%s13110_s0 + $0x1a0] sm:$0xff]  ;;  %v11591_v43 = vpack.c.bf16 %v1269_v28, %v1268_v27 }
  0x3b   :  { %9584 = vmatmul.mubr.msk.bf16.gmra.mrb[8].mxu0 %vm132_vm1, %v11433_v51  ;;  %253 = vst.msk [vmem:[#allocation2 + $0x229] sm:$0xff] %vm132_vm1, %v107_v11  ;;  %254 = vst.msk [vmem:[#allocation2 + $0x231] sm:$0xff] %vm132_vm1, %v108_v12  ;;  %v120_v34 = vld [vmem:[%s13110_s0 + $0x1a8] sm:$0xff]  ;;  %v121_v35 = vld [vmem:[%s13110_s0 + $0x1b0] sm:$0xff]  ;;  %v11601_v48 = vpack.c.bf16 %v1271_v30, %v1270_v29 }
  0x3c   :  { %9587 = vmatprep.mubr.msk.bf16.mxu0 %vm132_vm1, %v11435_v52  ;;  %255 = vst.msk [vmem:[#allocation2 + $0x241] sm:$0xff] %vm132_vm1, %v109_v13  ;;  %256 = vst.msk [vmem:[#allocation2 + $0x249] sm:$0xff] %vm132_vm1, %v110_v14  ;;  %v122_v37 = vld [vmem:[%s13110_s0 + $0x1b8] sm:$0xff]  ;;  %v123_v38 = vld [vmem:[%s13110_s0 + $0x1c0] sm:$0xff] }
  0x3d   :  { %257 = vst.msk [vmem:[#allocation2 + $0x259] sm:$0xff] %vm132_vm1, %v111_v15  ;;  %258 = vst.msk [vmem:[#allocation2 + $0x261] sm:$0xff] %vm132_vm1, %v112_v16  ;;  %v124_v39 = vld [vmem:[%s13110_s0 + $0x1c8] sm:$0xff]  ;;  %v125_v40 = vld [vmem:[%s13110_s0 + $0x1d0] sm:$0xff] }
  0x3e   :  { %259 = vst.msk [vmem:[#allocation2 + $0x271] sm:$0xff] %vm132_vm1, %v113_v17  ;;  %260 = vst.msk [vmem:[#allocation2 + $0x279] sm:$0xff] %vm132_vm1, %v114_v18  ;;  %v126_v42 = vld [vmem:[%s13110_s0 + $0x1d8] sm:$0xff]  ;;  %v127_v45 = vld [vmem:[%s13110_s0 + $0x1e0] sm:$0xff] }
  0x3f   :  { %261 = vst.msk [vmem:[#allocation2 + $0x289] sm:$0xff] %vm132_vm1, %v115_v19  ;;  %262 = vst.msk [vmem:[#allocation2 + $0x291] sm:$0xff] %vm132_vm1, %v116_v20  ;;  %v128_v47 = vld [vmem:[%s13110_s0 + $0x1e8] sm:$0xff]  ;;  %v129_v49 = vld [vmem:[%s13110_s0 + $0x1f0] sm:$0xff] }
  0x40   :  { %263 = vst.msk [vmem:[#allocation2 + $0x2a1] sm:$0xff] %vm132_vm1, %v117_v31  ;;  %264 = vst.msk [vmem:[#allocation2 + $0x2a9] sm:$0xff] %vm132_vm1, %v118_v32  ;;  %v130_v50 = vld [vmem:[%s13110_s0 + $0x1f8] sm:$0xff]  ;;  %v1273_v54 = vld [vmem:[#allocation2 + $0x142] sm:$0xff] }
  0x41   :  { %265 = vst.msk [vmem:[#allocation2 + $0x2b9] sm:$0xff] %vm132_vm1, %v119_v33  ;;  %266 = vst.msk [vmem:[#allocation2 + $0x2c1] sm:$0xff] %vm132_vm1, %v120_v34  ;;  %v1272_v53 = vld [vmem:[#allocation2 + $0x13a] sm:$0xff]  ;;  %v1796_v59 = vld [vmem:[#allocation2 + $0x30] sm:$0xff] }
  0x42   :  { %267 = vst.msk [vmem:[#allocation2 + $0x2d1] sm:$0xff] %vm132_vm1, %v121_v35  ;;  %268 = vst.msk [vmem:[#allocation2 + $0x2d9] sm:$0xff] %vm132_vm1, %v122_v37  ;;  %v1794_v55 = vld [vmem:[#allocation2 + $0x18] sm:$0xff]  ;;  %v1795_v56 = vld [vmem:[#allocation2 + $0x20] sm:$0xff]  ;;  %v11617_v57 = vpack.c.bf16 %v1273_v54, %v1272_v53 }
  0x43   :  { %9588 = vmatmul.mubr.msk.bf16.gmra.mrb[12].mxu0 %vm132_vm1, %v11482_v6  ;;  %269 = vst.msk [vmem:[#allocation2 + $0x2e9] sm:$0xff] %vm132_vm1, %v123_v38  ;;  %270 = vst.msk [vmem:[#allocation2 + $0x2f1] sm:$0xff] %vm132_vm1, %v124_v39  ;;  %v1858_v58 = vpack.c.bf16 %v1795_v56, %v1794_v55  ;;  %v1797_v60 = vld [vmem:[#allocation2 + $0x38] sm:$0xff]  ;;  %v1798_v62 = vld [vmem:[#allocation2 + $0x48] sm:$0xff] }
  0x44   :  { %9591 = vmatprep.mubr.msk.bf16.mxu0 %vm132_vm1, %v11496_v10  ;;  %271 = vst.msk [vmem:[#allocation2 + $0x301] sm:$0xff] %vm132_vm1, %v125_v40  ;;  %272 = vst.msk [vmem:[#allocation2 + $0x309] sm:$0xff] %vm132_vm1, %v126_v42  ;;  %v1799_v63 = vld [vmem:[#allocation2 + $0x50] sm:$0xff]  ;;  %v1859_v0 = vpack.c.bf16 %v1797_v60, %v1796_v59  ;;  %v11627_v4 = vld [vmem:[%s13111_s1 + $0xa] sm:$0x3] }
  0x45   :  { %273 = vst.msk [vmem:[#allocation2 + $0x319] sm:$0xff] %vm132_vm1, %v127_v45  ;;  %274 = vst.msk [vmem:[#allocation2 + $0x321] sm:$0xff] %vm132_vm1, %v128_v47  ;;  %v1860_v3 = vpack.c.bf16 %v1799_v63, %v1798_v62  ;;  %v1800_v5 = vld [vmem:[#allocation2 + $0x60] sm:$0xff]  ;;  %v1801_v7 = vld [vmem:[#allocation2 + $0x68] sm:$0xff] }
  0x46   :  { %275 = vst.msk [vmem:[#allocation2 + $0x331] sm:$0xff] %vm132_vm1, %v129_v49  ;;  %276 = vst.msk [vmem:[#allocation2 + $0x339] sm:$0xff] %vm132_vm1, %v130_v50  ;;  %v1802_v8 = vld [vmem:[#allocation2 + $0x78] sm:$0xff]  ;;  %v1803_v9 = vld [vmem:[#allocation2 + $0x80] sm:$0xff]  ;;  %v1861_v46 = vpack.c.bf16 %v1801_v7, %v1800_v5 }
  0x47   :  { %v1862_v11 = vpack.c.bf16 %v1803_v9, %v1802_v8 }
  0x4b   :  { %9592 = vmatmul.mubr.msk.bf16.gmra.mrb[16].mxu0 %vm132_vm1, %v11545_v25 }
  0x4c   :  { %9595 = vmatprep.mubr.msk.bf16.mxu0 %vm132_vm1, %v11547_v26 }
  0x53   :  { %9596 = vmatmul.mubr.msk.bf16.gmra.mrb[20].mxu0 %vm132_vm1, %v11591_v43 }
  0x54   :  { %9599 = vmatprep.mubr.msk.bf16.mxu0 %vm132_vm1, %v11601_v48 }
  0x5b   :  { %9600 = vmatmul.mubr.msk.bf16.gmra.mrb[24].mxu0 %vm132_vm1, %v11617_v57 }
  0x5c   :  { %9641 = vmatprep.mubr.msk.bf16.mxu0 %vm132_vm1, %v1858_v58 }
  0x63   :  { %9642 = vmatmul.mubr.msk.bf16.vlgmr.msra.gmra.mrb[0].mxu0 %vm132_vm1, %v1859_v0 }
  0x64   :  { %9706 = vmatpush3.bf16.msra.mxu0 %v2535_v61  ;;  %9645 = vmatprep.mubr.msk.bf16.mxu0 %vm132_vm1, %v1860_v3 }
  0x65   :  { %11043 = vmatprep.subr.msk.bf16.mxu0 %vm565_vm0, %v11627_v4 }
  0x66   :  { %10 = vsyncpa [#allocation9], 0  ;;  %v1804_v12 = vld [vmem:[#allocation2 + $0x90] sm:$0xff]  ;;  %v1805_v13 = vld [vmem:[#allocation2 + $0x98] sm:$0xff]  ;;  %vm5083_vm4 = vcmask 130048   ;;  %vm5361_vm5 = vcmask 123904  }
  0x67   :  { %v1806_v14 = vld [vmem:[#allocation2 + $0xa8] sm:$0xff]  ;;  %v1807_v15 = vld [vmem:[#allocation2 + $0xb0] sm:$0xff]  ;;  %v1863_v16 = vpack.c.bf16 %v1805_v13, %v1804_v12  ;;  %v1808_v18 = vld [vmem:[#allocation2 + $0xc0] sm:$0xff]  ;;  %vm5371_vm6 = vcmask 122880   ;;  %vm7034_vm7 = vcmask 126976   ;;  %vm7043_vm8 = vcmask 125952  }
  0x68   :  { %v1864_v17 = vpack.c.bf16 %v1807_v15, %v1806_v14  ;;  %v1809_v19 = vld [vmem:[#allocation2 + $0xc8] sm:$0xff]  ;;  %v1810_v20 = vld [vmem:[#allocation2 + $0xd8] sm:$0xff]  ;;  %v1811_v21 = vld [vmem:[#allocation2 + $0xe0] sm:$0xff]  ;;  %vm11107_vm9 = vmmov 0   ;;  %vm8038_vm10 = vcmask 1041409   ;;  %vm8265_vm11 = vcmask 254976  }
  0x69   :  { %v1865_v22 = vpack.c.bf16 %v1809_v19, %v1808_v18  ;;  %v1866_v23 = vpack.c.bf16 %v1811_v21, %v1810_v20  ;;  %v1812_v24 = vld [vmem:[#allocation2 + $0xf0] sm:$0xff]  ;;  %v1813_v27 = vld [vmem:[#allocation2 + $0xf8] sm:$0xff]  ;;  %v1814_v28 = vld [vmem:[#allocation2 + $0x108] sm:$0xff]  ;;  %vm8322_vm12 = vcmask 261120   ;;  %vm8503_vm13 = vcmask 1043456   ;;  %s11108_s9 = smov [#allocation8]  }
  0x6a   :  { %v1815_v29 = vld [vmem:[#allocation2 + $0x110] sm:$0xff]  ;;  %v1867_v30 = vpack.c.bf16 %v1813_v27, %v1812_v24  ;;  %v1816_v32 = vld [vmem:[#allocation2 + $0x120] sm:$0xff]  ;;  %v1817_v33 = vld [vmem:[#allocation2 + $0x128] sm:$0xff]  ;;  %vm8458_vm14 = vcmask 58368   ;;  %vm8499_vm15 = vcmask 64512   ;;  %s8554_s10 = sshll.u32 %s11108_s9, 4  ;;  %s8555_s10 = int_to_ptr.vmem [resolvable:$true] %s8554_s10 }
  0x6b   :  { %9646 = vmatmul.mubr.msk.bf16.gmra.mrb[4].mxu0 %vm132_vm1, %v1861_v46  ;;  %v1868_v31 = vpack.c.bf16 %v1815_v29, %v1814_v28  ;;  %v1818_v34 = vld [vmem:[#allocation2 + $0x138] sm:$0xff]  ;;  %v1819_v35 = vld [vmem:[#allocation2 + $0x140] sm:$0xff]  ;;  %v1869_v37 = vpack.c.bf16 %v1817_v33, %v1816_v32  ;;  %v1820_v39 = vld [vmem:[#allocation2 + $0x150] sm:$0xff]  ;;  %s11082_s11 = scalar_lea.vmem %s8555_s10, 32  ;;  %p11087_p1 = scmp.lt.s32.totalorder %s8555_s10, %s8555_s10 }
  0x6c   :  { %9649 = vmatprep.mubr.msk.bf16.mxu0 %vm132_vm1, %v1862_v11  ;;  %v1870_v38 = vpack.c.bf16 %v1819_v35, %v1818_v34  ;;  %v1821_v40 = vld [vmem:[#allocation2 + $0x158] sm:$0xff]  ;;  %v1822_v42 = vld [vmem:[#allocation2 + $0x168] sm:$0xff]  ;;  %v1823_v45 = vld [vmem:[#allocation2 + $0x170] sm:$0xff]  ;;  %p11083_p0 = scmp.ne.s32.totalorder %s8555_s10, %s11082_s11  ;;  %p11088_p2 = scmp.lt.s32.totalorder %s11082_s11, %s11082_s11 }
  0x6d   :  { %v1871_v47 = vpack.c.bf16 %v1821_v40, %v1820_v39  ;;  %v1872_v49 = vpack.c.bf16 %v1823_v45, %v1822_v42  ;;  %v1824_v50 = vld [vmem:[#allocation2 + $0x180] sm:$0xff]  ;;  %v1825_v53 = vld [vmem:[#allocation2 + $0x188] sm:$0xff]  ;;  %v1827_v55 = vld [vmem:[#allocation2 + $0x1d0] sm:$0xff] }
  0x6e   :  { %v1826_v54 = vld [vmem:[#allocation2 + $0x1c8] sm:$0xff]  ;;  %v1873_v56 = vpack.c.bf16 %v1825_v53, %v1824_v50  ;;  %v1828_v59 = vld [vmem:[#allocation2 + $0x1e0] sm:$0xff]  ;;  %v1830_v61 = vld [vmem:[#allocation2 + $0x1f8] sm:$0xff]  ;;  %p11089_p3 = por %p11088_p2, %p11087_p1 }
  0x6f   :  { %v1874_v58 = vpack.c.bf16 %v1827_v55, %v1826_v54  ;;  %v1829_v60 = vld [vmem:[#allocation2 + $0x1e8] sm:$0xff]  ;;  %v1831_v62 = vld [vmem:[#allocation2 + $0x200] sm:$0xff]  ;;  %v1832_v3 = vld [vmem:[#allocation2 + $0x210] sm:$0xff] }
  0x70   :  { %v1875_v63 = vpack.c.bf16 %v1829_v60, %v1828_v59  ;;  %v1876_v0 = vpack.c.bf16 %v1831_v62, %v1830_v61  ;;  %v1833_v5 = vld [vmem:[#allocation2 + $0x218] sm:$0xff]  ;;  %v1834_v7 = vld [vmem:[#allocation2 + $0x228] sm:$0xff]  ;;  %v1835_v8 = vld [vmem:[#allocation2 + $0x230] sm:$0xff]  ;;  %p11090_p4 = pnand %p11089_p3, %p11083_p0 }
  0x71   :  { %v1877_v9 = vpack.c.bf16 %v1833_v5, %v1832_v3  ;;  %v1878_v46 = vpack.c.bf16 %v1835_v8, %v1834_v7  ;;  %v1836_v11 = vld [vmem:[#allocation2 + $0x240] sm:$0xff]  ;;  %v1837_v12 = vld [vmem:[#allocation2 + $0x248] sm:$0xff]  ;;  %v1838_v13 = vld [vmem:[#allocation2 + $0x258] sm:$0xff] }
  0x72   :  { %v1839_v14 = vld [vmem:[#allocation2 + $0x260] sm:$0xff]  ;;  %v1879_v15 = vpack.c.bf16 %v1837_v12, %v1836_v11  ;;  %v1841_v18 = vld [vmem:[#allocation2 + $0x278] sm:$0xff]  ;;  %v1842_v19 = vld [vmem:[#allocation2 + $0x288] sm:$0xff] }
  0x73   :  { %9650 = vmatmul.mubr.msk.bf16.gmra.mrb[8].mxu0 %vm132_vm1, %v1863_v16  ;;  %v1880_v16 = vpack.c.bf16 %v1839_v14, %v1838_v13  ;;  %v1843_v20 = vld [vmem:[#allocation2 + $0x290] sm:$0xff]  ;;  %v1845_v24 = vld [vmem:[#allocation2 + $0x2a8] sm:$0xff]  ;;  %v1846_v27 = vld [vmem:[#allocation2 + $0x2b8] sm:$0xff] }
  0x74   :  { %9653 = vmatprep.mubr.msk.bf16.mxu0 %vm132_vm1, %v1864_v17  ;;  %v1840_v17 = vld [vmem:[#allocation2 + $0x270] sm:$0xff]  ;;  %v1847_v28 = vld [vmem:[#allocation2 + $0x2c0] sm:$0xff]  ;;  %v1849_v32 = vld [vmem:[#allocation2 + $0x2d8] sm:$0xff] }
  0x75   :  { %v1881_v21 = vpack.c.bf16 %v1841_v18, %v1840_v17  ;;  %v1850_v33 = vld [vmem:[#allocation2 + $0x2e8] sm:$0xff]  ;;  %v1851_v34 = vld [vmem:[#allocation2 + $0x2f0] sm:$0xff]  ;;  %v2342_v39 = vld [vmem:[#allocation2 + $0x19] sm:$0xff]  ;;  %v3083_v18 = vsel %vm565_vm0, %v11627_v4, 0 }
  0x76   :  { %v2343_v40 = vld [vmem:[#allocation2 + $0x21] sm:$0xff]  ;;  %v2344_v50 = vld [vmem:[#allocation2 + $0x31] sm:$0xff]  ;;  %v2345_v53 = vld [vmem:[#allocation2 + $0x39] sm:$0xff] }
  0x77   :  { %v23_v42 = vld [vmem:[%s13111_s1 + $0x2] sm:$0x3]  ;;  %v2406_v59 = vpack.c.bf16 %v2343_v40, %v2342_v39  ;;  %v2407_v61 = vpack.c.bf16 %v2345_v53, %v2344_v50  ;;  %v2347_v3 = vld [vmem:[#allocation2 + $0x51] sm:$0xff]  ;;  %v2349_v8 = vld [vmem:[#allocation2 + $0x69] sm:$0xff] }
  0x78   :  { %v373_v45 = vld [vmem:[#allocation2 + $0x1] sm:$0xff]  ;;  %11037 = vmatprep.subr.msk.bf16.mxu1 %vm565_vm0, %v23_v42  ;;  %v567_v54 = vsel %vm565_vm0, %v23_v42, 0  ;;  %v1857_v5 = vld [vmem:[#allocation2 + $0x338] sm:$0xff]  ;;  %v2370_v53 = vld [vmem:[#allocation2 + $0x169] sm:$0xff] }
  0x79   :  { %9442 = vmatpush3.bf16.msra.mxu1 %v567_v54  ;;  %v2348_v7 = vld [vmem:[#allocation2 + $0x61] sm:$0xff]  ;;  %v2350_v12 = vld [vmem:[#allocation2 + $0x79] sm:$0xff]  ;;  %v2352_v14 = vld [vmem:[#allocation2 + $0x91] sm:$0xff] }
  0x7a   :  { %v2409_v11 = vpack.c.bf16 %v2349_v8, %v2348_v7  ;;  %v2351_v13 = vld [vmem:[#allocation2 + $0x81] sm:$0xff]  ;;  %v2366_v40 = vld [vmem:[#allocation2 + $0x139] sm:$0xff]  ;;  %v2371_v54 = vld [vmem:[#allocation2 + $0x171] sm:$0xff] }
  0x7b   :  { %9654 = vmatmul.mubr.msk.bf16.gmra.mrb[12].mxu0 %vm132_vm1, %v1865_v22  ;;  %v1882_v22 = vpack.c.bf16 %v1843_v20, %v1842_v19  ;;  %v11680_v19 = vld [vmem:[%s13111_s1 + $0xc] sm:$0x3]  ;;  %v2367_v42 = vld [vmem:[#allocation2 + $0x141] sm:$0xff]  ;;  %v2378_v7 = vld [vmem:[#allocation2 + $0x1f9] sm:$0xff] }
  0x7c   :  { %9657 = vmatprep.mubr.msk.bf16.mxu0 %vm132_vm1, %v1866_v23  ;;  %v1844_v23 = vld [vmem:[#allocation2 + $0x2a0] sm:$0xff]  ;;  %v2354_v20 = vld [vmem:[#allocation2 + $0xa9] sm:$0xff] }
  0x7d   :  { %v1883_v29 = vpack.c.bf16 %v1845_v24, %v1844_v23  ;;  %v2357_v23 = vld [vmem:[#allocation2 + $0xc9] sm:$0xff]  ;;  %v2379_v8 = vld [vmem:[#allocation2 + $0x201] sm:$0xff] }
  0x83   :  { %9658 = vmatmul.mubr.msk.bf16.gmra.mrb[16].mxu0 %vm132_vm1, %v1867_v30  ;;  %v1884_v30 = vpack.c.bf16 %v1847_v28, %v1846_v27  ;;  %v2358_v27 = vld [vmem:[#allocation2 + $0xd9] sm:$0xff]  ;;  %v2359_v28 = vld [vmem:[#allocation2 + $0xe1] sm:$0xff] }
  0x84   :  { %9661 = vmatprep.mubr.msk.bf16.mxu0 %vm132_vm1, %v1868_v31  ;;  %v1848_v31 = vld [vmem:[#allocation2 + $0x2d0] sm:$0xff] }
  0x85   :  { %v1885_v35 = vpack.c.bf16 %v1849_v32, %v1848_v31  ;;  %v2414_v31 = vpack.c.bf16 %v2359_v28, %v2358_v27 }
  0x8b   :  { %9662 = vmatmul.mubr.msk.bf16.gmra.mrb[20].mxu0 %vm132_vm1, %v1869_v37  ;;  %v1886_v37 = vpack.c.bf16 %v1851_v34, %v1850_v33  ;;  %v2362_v33 = vld [vmem:[#allocation2 + $0x109] sm:$0xff]  ;;  %v2363_v34 = vld [vmem:[#allocation2 + $0x111] sm:$0xff] }
  0x8c   :  { %9665 = vmatprep.mubr.msk.bf16.mxu0 %vm132_vm1, %v1870_v38  ;;  %v1852_v38 = vld [vmem:[#allocation2 + $0x300] sm:$0xff] }
  0x93   :  { %9666 = vmatmul.mubr.msk.bf16.gmra.mrb[24].mxu0 %vm132_vm1, %v1871_v47  ;;  %v374_v47 = vld [vmem:[#allocation2 + $0x9] sm:$0xff] }
  0x94   :  { %9669 = vmatprep.mubr.msk.bf16.mxu0 %vm132_vm1, %v1872_v49  ;;  %v1853_v49 = vld [vmem:[#allocation2 + $0x308] sm:$0xff]  ;;  %v437_v55 = vpack.c.bf16 %v374_v47, %v373_v45  ;;  %v2368_v45 = vld [vmem:[#allocation2 + $0x151] sm:$0xff]  ;;  %v2369_v47 = vld [vmem:[#allocation2 + $0x159] sm:$0xff] }
  0x95   :  { %v1887_v60 = vpack.c.bf16 %v1853_v49, %v1852_v38  ;;  %v2416_v38 = vpack.c.bf16 %v2363_v34, %v2362_v33  ;;  %v2418_v49 = vpack.c.bf16 %v2367_v42, %v2366_v40  ;;  %v2419_v50 = vpack.c.bf16 %v2369_v47, %v2368_v45  ;;  %v2398_v45 = vld [vmem:[#allocation2 + $0x2e9] sm:$0xff]  ;;  %v2399_v47 = vld [vmem:[#allocation2 + $0x2f1] sm:$0xff] }
  0x96   :  { %9443 = vmatprep.mubr.msk.bf16.mxu1 %vm132_vm1, %v437_v55  ;;  %v2420_v55 = vpack.c.bf16 %v2371_v54, %v2370_v53  ;;  %v2434_v53 = vpack.c.bf16 %v2399_v47, %v2398_v45  ;;  %v302_v47 = vld [vmem:[#allocation2 + $0x128] sm:$0xff] }
  0x97   :  { %9444 = vmatmul.mubr.msk.bf16.vlgmr.msra.gmra.mrb[0].mxu1 %vm132_vm1, %v2406_v59 }
  0x98   :  { %9447 = vmatprep.mubr.msk.bf16.mxu1 %vm132_vm1, %v2407_v61 }
  0x9b   :  { %9670 = vmatmul.mubr.msk.bf16.gmra.mrb[28].mxu0 %vm132_vm1, %v1873_v56  ;;  %v1854_v56 = vld [vmem:[#allocation2 + $0x318] sm:$0xff] }
  0x9c   :  { %9673 = vmatprep.mubr.msk.bf16.mxu0 %vm132_vm1, %v1874_v58  ;;  %v1855_v58 = vld [vmem:[#allocation2 + $0x320] sm:$0xff] }
  0x9d   :  { %v1888_v62 = vpack.c.bf16 %v1855_v58, %v1854_v56  ;;  %v2374_v56 = vld [vmem:[#allocation2 + $0x1c9] sm:$0xff]  ;;  %v2375_v58 = vld [vmem:[#allocation2 + $0x1d1] sm:$0xff] }
  0xa3   :  { %9674 = vmatmul.mubr.msk.bf16.gmra.mrb[32].mxu0 %vm132_vm1, %v1875_v63  ;;  %v1856_v63 = vld [vmem:[#allocation2 + $0x330] sm:$0xff] }
  0xa4   :  { %9677 = vmatprep.mubr.msk.bf16.mxu0 %vm132_vm1, %v1876_v0  ;;  %v2346_v0 = vld [vmem:[#allocation2 + $0x49] sm:$0xff] }
  0xab   :  { %9678 = vmatmul.mubr.msk.bf16.gmra.mrb[36].mxu0 %vm132_vm1, %v1877_v9  ;;  %v2408_v9 = vpack.c.bf16 %v2347_v3, %v2346_v0  ;;  %v2422_v0 = vpack.c.bf16 %v2375_v58, %v2374_v56  ;;  %v2403_v56 = vld [vmem:[#allocation2 + $0x321] sm:$0xff] }
  0xac   :  { %9681 = vmatprep.mubr.msk.bf16.mxu0 %vm132_vm1, %v1878_v46  ;;  %v1889_v46 = vpack.c.bf16 %v1857_v5, %v1856_v63  ;;  %v2372_v5 = vld [vmem:[#allocation2 + $0x181] sm:$0xff] }
  0xad   :  { %9448 = vmatmul.mubr.msk.bf16.gmra.mrb[4].mxu1 %vm132_vm1, %v2408_v9 }
  0xae   :  { %9451 = vmatprep.mubr.msk.bf16.mxu1 %vm132_vm1, %v2409_v11 }
  0xb3   :  { %9682 = vmatmul.mubr.msk.bf16.gmra.mrb[40].mxu0 %vm132_vm1, %v1879_v15  ;;  %v2353_v15 = vld [vmem:[#allocation2 + $0x99] sm:$0xff] }
  0xb4   :  { %9685 = vmatprep.mubr.msk.bf16.mxu0 %vm132_vm1, %v1880_v16  ;;  %v2410_v16 = vpack.c.bf16 %v2351_v13, %v2350_v12  ;;  %v2411_v17 = vpack.c.bf16 %v2353_v15, %v2352_v14  ;;  %v2424_v12 = vpack.c.bf16 %v2379_v8, %v2378_v7  ;;  %v2382_v15 = vld [vmem:[#allocation2 + $0x229] sm:$0xff]  ;;  %v11081_v7 = vld [vmem:[%s13111_s1 + $0x4] sm:$0x3] }
  0xb5   :  { %v281_v8 = vld [vmem:[#allocation2 + $0x30] sm:$0xff] }
  0xb6   :  { %9452 = vmatmul.mubr.msk.bf16.gmra.mrb[8].mxu1 %vm132_vm1, %v2410_v16 }
  0xb7   :  { %9455 = vmatprep.mubr.msk.bf16.mxu1 %vm132_vm1, %v2411_v17 }
  0xbb   :  { %9686 = vmatmul.mubr.msk.bf16.gmra.mrb[44].mxu0 %vm132_vm1, %v1881_v21  ;;  %v2355_v21 = vld [vmem:[#allocation2 + $0xb1] sm:$0xff] }
  0xbc   :  { %9689 = vmatprep.mubr.msk.bf16.mxu0 %vm132_vm1, %v1882_v22  ;;  %v2356_v22 = vld [vmem:[#allocation2 + $0xc1] sm:$0xff]  ;;  %v2412_v4 = vpack.c.bf16 %v2355_v21, %v2354_v20 }
  0xbd   :  { %v2413_v24 = vpack.c.bf16 %v2357_v23, %v2356_v22  ;;  %v2386_v22 = vld [vmem:[#allocation2 + $0x259] sm:$0xff]  ;;  %v2387_v23 = vld [vmem:[#allocation2 + $0x261] sm:$0xff] }
  0xbe   :  { %9456 = vmatmul.mubr.msk.bf16.gmra.mrb[12].mxu1 %vm132_vm1, %v2412_v4  ;;  %v2428_v27 = vpack.c.bf16 %v2387_v23, %v2386_v22  ;;  %v287_v22 = vld [vmem:[#allocation2 + $0x78] sm:$0xff] }
  0xbf   :  { %9459 = vmatprep.mubr.msk.bf16.mxu1 %vm132_vm1, %v2413_v24 }
  0xc3   :  { %9690 = vmatmul.mubr.msk.bf16.gmra.mrb[48].mxu0 %vm132_vm1, %v1883_v29  ;;  %v2360_v29 = vld [vmem:[#allocation2 + $0xf1] sm:$0xff] }
  0xc4   :  { %9693 = vmatprep.mubr.msk.bf16.mxu0 %vm132_vm1, %v1884_v30  ;;  %v2361_v30 = vld [vmem:[#allocation2 + $0xf9] sm:$0xff] }
  0xc5   :  { %v2415_v32 = vpack.c.bf16 %v2361_v30, %v2360_v29  ;;  %v2390_v29 = vld [vmem:[#allocation2 + $0x289] sm:$0xff]  ;;  %v2391_v30 = vld [vmem:[#allocation2 + $0x291] sm:$0xff] }
  0xc6   :  { %9460 = vmatmul.mubr.msk.bf16.gmra.mrb[16].mxu1 %vm132_vm1, %v2414_v31  ;;  %v2430_v33 = vpack.c.bf16 %v2391_v30, %v2390_v29  ;;  %v289_v29 = vld [vmem:[#allocation2 + $0x90] sm:$0xff]  ;;  %v290_v30 = vld [vmem:[#allocation2 + $0x98] sm:$0xff] }
  0xc7   :  { %9463 = vmatprep.mubr.msk.bf16.mxu1 %vm132_vm1, %v2415_v32 }
  0xcb   :  { %9694 = vmatmul.mubr.msk.bf16.gmra.mrb[52].mxu0 %vm132_vm1, %v1885_v35  ;;  %v2364_v35 = vld [vmem:[#allocation2 + $0x121] sm:$0xff] }
  0xcc   :  { %9697 = vmatprep.mubr.msk.bf16.mxu0 %vm132_vm1, %v1886_v37  ;;  %v2365_v37 = vld [vmem:[#allocation2 + $0x129] sm:$0xff] }
  0xcd   :  { %v2417_v39 = vpack.c.bf16 %v2365_v37, %v2364_v35  ;;  %v2394_v35 = vld [vmem:[#allocation2 + $0x2b9] sm:$0xff]  ;;  %v2395_v37 = vld [vmem:[#allocation2 + $0x2c1] sm:$0xff] }
  0xce   :  { %9464 = vmatmul.mubr.msk.bf16.gmra.mrb[20].mxu1 %vm132_vm1, %v2416_v38  ;;  %v2432_v40 = vpack.c.bf16 %v2395_v37, %v2394_v35  ;;  %v296_v37 = vld [vmem:[#allocation2 + $0xe0] sm:$0xff] }
  0xcf   :  { %9467 = vmatprep.mubr.msk.bf16.mxu1 %vm132_vm1, %v2417_v39 }
  0xd3   :  { %9698 = vmatmul.mubr.msk.bf16.gmra.mrb[56].mxu0 %vm132_vm1, %v1887_v60  ;;  %v406_v60 = vld [vmem:[#allocation2 + $0x1b9] sm:$0xff] }
  0xd4   :  { %9701 = vmatprep.mubr.msk.bf16.mxu0 %vm132_vm1, %v1888_v62  ;;  %v2377_v62 = vld [vmem:[#allocation2 + $0x1e9] sm:$0xff] }
  0xd6   :  { %9468 = vmatmul.mubr.msk.bf16.gmra.mrb[24].mxu1 %vm132_vm1, %v2418_v49 }
  0xd7   :  { %9471 = vmatprep.mubr.msk.bf16.mxu1 %vm132_vm1, %v2419_v50 }
  0xdb   :  { %9702 = vmatmul.mubr.msk.bf16.gmra.mrb[60].mxu0 %vm132_vm1, %v1889_v46  ;;  %v2380_v46 = vld [vmem:[#allocation2 + $0x211] sm:$0xff] }
  0xdc   :  { %9707 = vmatprep.mubr.msk.bf16.mxu0 %vm132_vm1, %v2406_v59  ;;  %v405_v59 = vld [vmem:[#allocation2 + $0x1b1] sm:$0xff] }
  0xdd   :  { %v453_v63 = vpack.c.bf16 %v406_v60, %v405_v59  ;;  %v22_v59 = vld [vmem:[%s13111_s1] sm:$0x3] }
  0xde   :  { %9472 = vmatmul.mubr.msk.bf16.gmra.mrb[28].mxu1 %vm132_vm1, %v2420_v55  ;;  %v277_v60 = vld [vmem:[#allocation2] sm:$0xff]  ;;  %11038 = vmatprep.subr.msk.bf16.mxu1 %vm565_vm0, %v22_v59 }
  0xdf   :  { %9475 = vmatprep.mubr.msk.bf16.mxu1 %vm132_vm1, %v453_v63 }
  0xe3   :  { %9708 = vmatmul.mubr.msk.bf16.vlgmr.msra.gmra.mrb[0].mxu0 %vm132_vm1, %v2407_v61  ;;  %v2376_v61 = vld [vmem:[#allocation2 + $0x1e1] sm:$0xff] }
  0xe4   :  { %9772 = vmatpush3.bf16.msra.mxu0 %v3083_v18  ;;  %9711 = vmatprep.mubr.msk.bf16.mxu0 %vm132_vm1, %v2408_v9  ;;  %v2423_v3 = vpack.c.bf16 %v2377_v62, %v2376_v61  ;;  %v2373_v9 = vld [vmem:[#allocation2 + $0x189] sm:$0xff]  ;;  %v955_v62 = vsel %vm565_vm0, %v22_v59, 0  ;;  %v310_v59 = vld [vmem:[#allocation2 + $0x1b8] sm:$0xff] }
  0xe5   :  { %11044 = vmatprep.subr.msk.bf16.mxu0 %vm565_vm0, %v11680_v19  ;;  %v2421_v13 = vpack.c.bf16 %v2373_v9, %v2372_v5  ;;  %v2385_v18 = vld [vmem:[#allocation2 + $0x249] sm:$0xff]  ;;  %9508 = vmatpush3.bf16.msra.mxu1 %v955_v62  ;;  %v282_v9 = vld [vmem:[#allocation2 + $0x38] sm:$0xff] }
  0xe6   :  { %9476 = vmatmul.mubr.msk.bf16.gmra.mrb[32].mxu1 %vm132_vm1, %v2422_v0  ;;  %v278_v61 = vld [vmem:[#allocation2 + $0x8] sm:$0xff]  ;;  %11040 = vmatprep.subr.msk.bf16.mxu1 %vm565_vm0, %v11081_v7 }
  0xe7   :  { %9479 = vmatprep.mubr.msk.bf16.mxu1 %vm132_vm1, %v2423_v3  ;;  %v341_v63 = vpack.c.bf16 %v278_v61, %v277_v60  ;;  %v311_v60 = vld [vmem:[#allocation2 + $0x1c8] sm:$0xff]  ;;  %v2917_v61 = vld [vmem:[#allocation2 + $0x15a] sm:$0xff] }
  0xeb   :  { %9712 = vmatmul.mubr.msk.bf16.gmra.mrb[4].mxu0 %vm132_vm1, %v2409_v11  ;;  %v2381_v11 = vld [vmem:[#allocation2 + $0x219] sm:$0xff] }
  0xec   :  { %9715 = vmatprep.mubr.msk.bf16.mxu0 %vm132_vm1, %v2410_v16  ;;  %v2425_v14 = vpack.c.bf16 %v2381_v11, %v2380_v46  ;;  %v2383_v16 = vld [vmem:[#allocation2 + $0x231] sm:$0xff]  ;;  %v283_v46 = vld [vmem:[#allocation2 + $0x48] sm:$0xff] }
  0xed   :  { %v2426_v20 = vpack.c.bf16 %v2383_v16, %v2382_v15  ;;  %v2404_v11 = vld [vmem:[#allocation2 + $0x331] sm:$0xff]  ;;  %v2890_v15 = vld [vmem:[#allocation2 + $0x1a] sm:$0xff]  ;;  %v2891_v16 = vld [vmem:[#allocation2 + $0x22] sm:$0xff] }
  0xee   :  { %9480 = vmatmul.mubr.msk.bf16.gmra.mrb[36].mxu1 %vm132_vm1, %v2424_v12 }
  0xef   :  { %9483 = vmatprep.mubr.msk.bf16.mxu1 %vm132_vm1, %v2425_v14 }
  0xf3   :  { %9716 = vmatmul.mubr.msk.bf16.gmra.mrb[8].mxu0 %vm132_vm1, %v2411_v17  ;;  %v2384_v17 = vld [vmem:[#allocation2 + $0x241] sm:$0xff] }
  0xf4   :  { %9719 = vmatprep.mubr.msk.bf16.mxu0 %vm132_vm1, %v2412_v4  ;;  %v2427_v21 = vpack.c.bf16 %v2385_v18, %v2384_v17  ;;  %v2388_v4 = vld [vmem:[#allocation2 + $0x271] sm:$0xff]  ;;  %v2954_v18 = vpack.c.bf16 %v2891_v16, %v2890_v15 }
  0xf5   :  { %v2922_v15 = vld [vmem:[#allocation2 + $0x1ca] sm:$0xff]  ;;  %v2923_v16 = vld [vmem:[#allocation2 + $0x1d2] sm:$0xff] }
  0xf6   :  { %9484 = vmatmul.mubr.msk.bf16.gmra.mrb[40].mxu1 %vm132_vm1, %v2426_v20 }
  0xf7   :  { %9487 = vmatprep.mubr.msk.bf16.mxu1 %vm132_vm1, %v2427_v21 }
  0xfb   :  { %9720 = vmatmul.mubr.msk.bf16.gmra.mrb[12].mxu0 %vm132_vm1, %v2413_v24  ;;  %v2389_v24 = vld [vmem:[#allocation2 + $0x279] sm:$0xff] }
  0xfc   :  { %9723 = vmatprep.mubr.msk.bf16.mxu0 %vm132_vm1, %v2414_v31  ;;  %v2429_v28 = vpack.c.bf16 %v2389_v24, %v2388_v4  ;;  %v2392_v31 = vld [vmem:[#allocation2 + $0x2a1] sm:$0xff] }
  0xfd   :  { %v288_v4 = vld [vmem:[#allocation2 + $0x80] sm:$0xff] }
  0xfe   :  { %9488 = vmatmul.mubr.msk.bf16.gmra.mrb[44].mxu1 %vm132_vm1, %v2428_v27  ;;  %v11763_v24 = vpack.c.bf16 %v288_v4, %v287_v22  ;;  %v318_v22 = vld [vmem:[#allocation2 + $0x218] sm:$0xff]  ;;  %v319_v4 = vld [vmem:[#allocation2 + $0x228] sm:$0xff] }
  0xff   :  { %9491 = vmatprep.mubr.msk.bf16.mxu1 %vm132_vm1, %v2429_v28 }
 0x103   :  { %9724 = vmatmul.mubr.msk.bf16.gmra.mrb[16].mxu0 %vm132_vm1, %v2415_v32  ;;  %v2393_v32 = vld [vmem:[#allocation2 + $0x2a9] sm:$0xff] }
 0x104   :  { %9727 = vmatprep.mubr.msk.bf16.mxu0 %vm132_vm1, %v2416_v38  ;;  %v2431_v34 = vpack.c.bf16 %v2393_v32, %v2392_v31  ;;  %v2396_v38 = vld [vmem:[#allocation2 + $0x2d1] sm:$0xff]  ;;  %v291_v31 = vld [vmem:[#allocation2 + $0xa8] sm:$0xff]  ;;  %v11782_v32 = vpack.c.bf16 %v290_v30, %v289_v29 }
 0x105   :  { %v2925_v29 = vld [vmem:[#allocation2 + $0x1ea] sm:$0xff] }
 0x106   :  { %9492 = vmatmul.mubr.msk.bf16.gmra.mrb[48].mxu1 %vm132_vm1, %v2430_v33 }
 0x107   :  { %9495 = vmatprep.mubr.msk.bf16.mxu1 %vm132_vm1, %v2431_v34 }
 0x10b   :  { %9728 = vmatmul.mubr.msk.bf16.gmra.mrb[20].mxu0 %vm132_vm1, %v2417_v39  ;;  %v2397_v39 = vld [vmem:[#allocation2 + $0x2d9] sm:$0xff] }
 0x10c   :  { %9731 = vmatprep.mubr.msk.bf16.mxu0 %vm132_vm1, %v2418_v49  ;;  %v2433_v42 = vpack.c.bf16 %v2397_v39, %v2396_v38  ;;  %v2400_v49 = vld [vmem:[#allocation2 + $0x301] sm:$0xff]  ;;  %v298_v39 = vld [vmem:[#allocation2 + $0xf8] sm:$0xff] }
 0x10e   :  { %9496 = vmatmul.mubr.msk.bf16.gmra.mrb[52].mxu1 %vm132_vm1, %v2432_v40 }
 0x10f   :  { %9499 = vmatprep.mubr.msk.bf16.mxu1 %vm132_vm1, %v2433_v42 }
 0x113   :  { %9732 = vmatmul.mubr.msk.bf16.gmra.mrb[24].mxu0 %vm132_vm1, %v2419_v50  ;;  %v2401_v50 = vld [vmem:[#allocation2 + $0x309] sm:$0xff] }
 0x114   :  { %9735 = vmatprep.mubr.msk.bf16.mxu0 %vm132_vm1, %v2420_v55  ;;  %v2435_v54 = vpack.c.bf16 %v2401_v50, %v2400_v49  ;;  %v2402_v55 = vld [vmem:[#allocation2 + $0x319] sm:$0xff] }
 0x115   :  { %v2436_v58 = vpack.c.bf16 %v2403_v56, %v2402_v55  ;;  %v303_v49 = vld [vmem:[#allocation2 + $0x138] sm:$0xff]  ;;  %v304_v50 = vld [vmem:[#allocation2 + $0x140] sm:$0xff]  ;;  %v307_v55 = vld [vmem:[#allocation2 + $0x168] sm:$0xff] }
 0x116   :  { %9500 = vmatmul.mubr.msk.bf16.gmra.mrb[56].mxu1 %vm132_vm1, %v2434_v53  ;;  %v308_v56 = vld [vmem:[#allocation2 + $0x170] sm:$0xff] }
 0x117   :  { %9503 = vmatprep.mubr.msk.bf16.mxu1 %vm132_vm1, %v2435_v54 }
 0x11b   :  { %9736 = vmatmul.mubr.msk.bf16.gmra.mrb[28].mxu0 %vm132_vm1, %v2421_v13  ;;  %v11751_v13 = vpack.c.bf16 %v282_v9, %v281_v8  ;;  %v315_v9 = vld [vmem:[#allocation2 + $0x1f8] sm:$0xff] }
 0x11c   :  { %9739 = vmatprep.mubr.msk.bf16.mxu0 %vm132_vm1, %v2422_v0  ;;  %v279_v0 = vld [vmem:[#allocation2 + $0x18] sm:$0xff] }
 0x11e   :  { %9504 = vmatmul.mubr.msk.bf16.gmra.mrb[60].mxu1 %vm132_vm1, %v2436_v58 }
 0x11f   :  { %9509 = vmatprep.mubr.msk.bf16.mxu1 %vm132_vm1, %v341_v63  ;;  %v312_v63 = vld [vmem:[#allocation2 + $0x1d0] sm:$0xff] }
 0x123   :  { %9740 = vmatmul.mubr.msk.bf16.gmra.mrb[32].mxu0 %vm132_vm1, %v2423_v3  ;;  %v280_v3 = vld [vmem:[#allocation2 + $0x20] sm:$0xff] }
 0x124   :  { %9743 = vmatprep.mubr.msk.bf16.mxu0 %vm132_vm1, %v2424_v12  ;;  %v342_v5 = vpack.c.bf16 %v280_v3, %v279_v0  ;;  %v2405_v12 = vld [vmem:[#allocation2 + $0x339] sm:$0xff]  ;;  %v2918_v0 = vld [vmem:[#allocation2 + $0x16a] sm:$0xff] }
 0x125   :  { %v2919_v3 = vld [vmem:[#allocation2 + $0x172] sm:$0xff] }
 0x126   :  { %9510 = vmatmul.mubr.msk.bf16.vlgmr.msra.gmra.mrb[0].mxu1 %vm132_vm1, %v342_v5  ;;  %v358_v5 = vpack.c.bf16 %v312_v63, %v311_v60  ;;  %v11845_v8 = vpack.c.bf16 %v2919_v3, %v2918_v0  ;;  %v327_v60 = vld [vmem:[#allocation2 + $0x288] sm:$0xff]  ;;  %v328_v63 = vld [vmem:[#allocation2 + $0x290] sm:$0xff]  ;;  %v2934_v0 = vld [vmem:[#allocation2 + $0x25a] sm:$0xff] }
 0x127   :  { %10332 = vmatpush3.bf16.msra.mxu1 %v11144_v1  ;;  %9513 = vmatprep.mubr.msk.bf16.mxu1 %vm132_vm1, %v11751_v13  ;;  %v2437_v1 = vpack.c.bf16 %v2405_v12, %v2404_v11  ;;  %v2921_v11 = vld [vmem:[#allocation2 + $0x18a] sm:$0xff]  ;;  %v2935_v3 = vld [vmem:[#allocation2 + $0x262] sm:$0xff] }
 0x12b   :  { %9744 = vmatmul.mubr.msk.bf16.gmra.mrb[36].mxu0 %vm132_vm1, %v2425_v14  ;;  %v284_v14 = vld [vmem:[#allocation2 + $0x50] sm:$0xff] }
 0x12c   :  { %9747 = vmatprep.mubr.msk.bf16.mxu0 %vm132_vm1, %v2426_v20  ;;  %v11753_v17 = vpack.c.bf16 %v284_v14, %v283_v46  ;;  %v285_v20 = vld [vmem:[#allocation2 + $0x60] sm:$0xff] }
 0x12d   :  { %v2920_v46 = vld [vmem:[#allocation2 + $0x182] sm:$0xff] }
 0x12e   :  { %9514 = vmatmul.mubr.msk.bf16.gmra.mrb[4].mxu1 %vm132_vm1, %v11753_v17  ;;  %v316_v14 = vld [vmem:[#allocation2 + $0x200] sm:$0xff] }
 0x133   :  { %9748 = vmatmul.mubr.msk.bf16.gmra.mrb[40].mxu0 %vm132_vm1, %v2427_v21  ;;  %v286_v21 = vld [vmem:[#allocation2 + $0x68] sm:$0xff] }
 0x134   :  { %9751 = vmatprep.mubr.msk.bf16.mxu0 %vm132_vm1, %v2428_v27  ;;  %v11761_v23 = vpack.c.bf16 %v286_v21, %v285_v20  ;;  %v3632_v27 = vsel %vm565_vm0, %v11680_v19, 0  ;;  %v292_v19 = vld [vmem:[#allocation2 + $0xb0] sm:$0xff]  ;;  %v11858_v20 = vpack.c.bf16 %v2923_v16, %v2922_v15  ;;  %v2937_v15 = vld [vmem:[#allocation2 + $0x27a] sm:$0xff] }
 0x135   :  { %v317_v21 = vld [vmem:[#allocation2 + $0x210] sm:$0xff] }
 0x136   :  { %9517 = vmatprep.mubr.msk.bf16.mxu1 %vm132_vm1, %v11761_v23  ;;  %v11865_v30 = vpack.c.bf16 %v318_v22, %v317_v21  ;;  %v2938_v21 = vld [vmem:[#allocation2 + $0x28a] sm:$0xff]  ;;  %v2939_v22 = vld [vmem:[#allocation2 + $0x292] sm:$0xff] }
 0x137   :  { %9518 = vmatmul.mubr.msk.bf16.gmra.mrb[8].mxu1 %vm132_vm1, %v11763_v24 }
 0x138   :  { %9521 = vmatprep.mubr.msk.bf16.mxu1 %vm132_vm1, %v11782_v32 }
 0x13b   :  { %9752 = vmatmul.mubr.msk.bf16.gmra.mrb[44].mxu0 %vm132_vm1, %v2429_v28  ;;  %v11774_v28 = vld [vmem:[%s13111_s1 + $0xe] sm:$0x3] }
 0x13c   :  { %9755 = vmatprep.mubr.msk.bf16.mxu0 %vm132_vm1, %v2430_v33  ;;  %v11784_v33 = vpack.c.bf16 %v292_v19, %v291_v31  ;;  %v320_v31 = vld [vmem:[#allocation2 + $0x230] sm:$0xff]  ;;  %v2926_v19 = vld [vmem:[#allocation2 + $0x1fa] sm:$0xff] }
 0x13f   :  { %9522 = vmatmul.mubr.msk.bf16.gmra.mrb[12].mxu1 %vm132_vm1, %v11784_v33 }
 0x143   :  { %9756 = vmatmul.mubr.msk.bf16.gmra.mrb[48].mxu0 %vm132_vm1, %v2431_v34  ;;  %v295_v34 = vld [vmem:[#allocation2 + $0xd8] sm:$0xff] }
 0x144   :  { %9759 = vmatprep.mubr.msk.bf16.mxu0 %vm132_vm1, %v2432_v40  ;;  %v11796_v38 = vpack.c.bf16 %v296_v37, %v295_v34  ;;  %v299_v40 = vld [vmem:[#allocation2 + $0x108] sm:$0xff] }
 0x14b   :  { %9760 = vmatmul.mubr.msk.bf16.gmra.mrb[52].mxu0 %vm132_vm1, %v2433_v42  ;;  %v300_v42 = vld [vmem:[#allocation2 + $0x110] sm:$0xff] }
 0x14c   :  { %9763 = vmatprep.mubr.msk.bf16.mxu0 %vm132_vm1, %v2434_v53  ;;  %v11808_v45 = vpack.c.bf16 %v300_v42, %v299_v40  ;;  %v11820_v53 = vpack.c.bf16 %v304_v50, %v303_v49  ;;  %v323_v40 = vld [vmem:[#allocation2 + $0x258] sm:$0xff]  ;;  %v324_v49 = vld [vmem:[#allocation2 + $0x260] sm:$0xff]  ;;  %v2930_v50 = vld [vmem:[#allocation2 + $0x22a] sm:$0xff] }
 0x14d   :  { %v2928_v42 = vld [vmem:[#allocation2 + $0x212] sm:$0xff] }
 0x153   :  { %9764 = vmatmul.mubr.msk.bf16.gmra.mrb[56].mxu0 %vm132_vm1, %v2435_v54  ;;  %v306_v54 = vld [vmem:[#allocation2 + $0x158] sm:$0xff] }
 0x154   :  { %9767 = vmatprep.mubr.msk.bf16.mxu0 %vm132_vm1, %v2436_v58  ;;  %v11832_v58 = vpack.c.bf16 %v308_v56, %v307_v55 }
 0x15b   :  { %9768 = vmatmul.mubr.msk.bf16.gmra.mrb[60].mxu0 %vm132_vm1, %v2437_v1  ;;  %v11854_v1 = vpack.c.bf16 %v316_v14, %v315_v9  ;;  %v329_v9 = vld [vmem:[#allocation2 + $0x2a0] sm:$0xff]  ;;  %v2936_v14 = vld [vmem:[#allocation2 + $0x272] sm:$0xff] }
 0x15c   :  { %9773 = vmatprep.mubr.msk.bf16.mxu0 %vm132_vm1, %v2954_v18  ;;  %v2969_v18 = vpack.c.bf16 %v2921_v11, %v2920_v46  ;;  %v330_v46 = vld [vmem:[#allocation2 + $0x2a8] sm:$0xff]  ;;  %v331_v11 = vld [vmem:[#allocation2 + $0x2b8] sm:$0xff] }
 0x15d   :  { %v11913_v16 = vpack.c.bf16 %v330_v46, %v329_v9  ;;  %v2946_v9 = vld [vmem:[#allocation2 + $0x2ea] sm:$0xff]  ;;  %v2947_v46 = vld [vmem:[#allocation2 + $0x2f2] sm:$0xff] }
 0x163   :  { %9774 = vmatmul.mubr.msk.bf16.vlgmr.msra.gmra.mrb[0].mxu0 %vm132_vm1, %v11400_v36  ;;  %v293_v36 = vld [vmem:[#allocation2 + $0xc0] sm:$0xff] }
 0x164   :  { %9838 = vmatpush3.bf16.msra.mxu0 %v3632_v27  ;;  %9777 = vmatprep.mubr.msk.bf16.mxu0 %vm132_vm1, %v11406_v41  ;;  %v294_v41 = vld [vmem:[#allocation2 + $0xc8] sm:$0xff] }
 0x165   :  { %11045 = vmatprep.subr.msk.bf16.mxu0 %vm565_vm0, %v11774_v28  ;;  %v11794_v35 = vpack.c.bf16 %v294_v41, %v293_v36  ;;  %v2924_v27 = vld [vmem:[#allocation2 + $0x1e2] sm:$0xff]  ;;  %v11867_v41 = vpack.c.bf16 %v320_v31, %v319_v4  ;;  %v333_v31 = vld [vmem:[#allocation2 + $0x2d0] sm:$0xff] }
 0x166   :  { %v2927_v36 = vld [vmem:[#allocation2 + $0x202] sm:$0xff]  ;;  %v11871_v34 = vpack.c.bf16 %v2925_v29, %v2924_v27  ;;  %v11919_v27 = vpack.c.bf16 %v2937_v15, %v2936_v14  ;;  %v11921_v29 = vpack.c.bf16 %v2939_v22, %v2938_v21  ;;  %v2982_v15 = vpack.c.bf16 %v2947_v46, %v2946_v9  ;;  %v2949_v21 = vld [vmem:[#allocation2 + $0x30a] sm:$0xff]  ;;  %v2950_v22 = vld [vmem:[#allocation2 + $0x31a] sm:$0xff] }
 0x167   :  { %9525 = vmatprep.mubr.msk.bf16.mxu1 %vm132_vm1, %v11794_v35  ;;  %v11873_v37 = vpack.c.bf16 %v2927_v36, %v2926_v19  ;;  %v334_v19 = vld [vmem:[#allocation2 + $0x2d8] sm:$0xff]  ;;  %v335_v36 = vld [vmem:[#allocation2 + $0x2e8] sm:$0xff] }
 0x168   :  { %9526 = vmatmul.mubr.msk.bf16.gmra.mrb[16].mxu1 %vm132_vm1, %v11796_v38  ;;  %v4004_v9 = vld [vmem:[#allocation2 + $0xf9] sm:$0xff] }
 0x16b   :  { %9778 = vmatmul.mubr.msk.bf16.gmra.mrb[4].mxu0 %vm132_vm1, %v11414_v44  ;;  %v297_v44 = vld [vmem:[#allocation2 + $0xf0] sm:$0xff] }
 0x16c   :  { %9781 = vmatprep.mubr.msk.bf16.mxu0 %vm132_vm1, %v11433_v51  ;;  %v11806_v51 = vpack.c.bf16 %v298_v39, %v297_v44  ;;  %v321_v44 = vld [vmem:[#allocation2 + $0x240] sm:$0xff]  ;;  %v322_v39 = vld [vmem:[#allocation2 + $0x248] sm:$0xff] }
 0x16e   :  { %9529 = vmatprep.mubr.msk.bf16.mxu1 %vm132_vm1, %v11806_v51 }
 0x170   :  { %9530 = vmatmul.mubr.msk.bf16.gmra.mrb[20].mxu1 %vm132_vm1, %v11808_v45 }
 0x173   :  { %9782 = vmatmul.mubr.msk.bf16.gmra.mrb[8].mxu0 %vm132_vm1, %v11435_v52  ;;  %v301_v52 = vld [vmem:[#allocation2 + $0x120] sm:$0xff] }
 0x174   :  { %9785 = vmatprep.mubr.msk.bf16.mxu0 %vm132_vm1, %v11482_v6  ;;  %v11818_v6 = vpack.c.bf16 %v302_v47, %v301_v52  ;;  %v2929_v52 = vld [vmem:[#allocation2 + $0x21a] sm:$0xff]  ;;  %v11881_v47 = vpack.c.bf16 %v322_v39, %v321_v44  ;;  %v2940_v44 = vld [vmem:[#allocation2 + $0x2a2] sm:$0xff]  ;;  %v2941_v39 = vld [vmem:[#allocation2 + $0x2aa] sm:$0xff] }
 0x175   :  { %v11887_v55 = vpack.c.bf16 %v2929_v52, %v2928_v42  ;;  %v336_v42 = vld [vmem:[#allocation2 + $0x2f0] sm:$0xff]  ;;  %v2942_v52 = vld [vmem:[#allocation2 + $0x2ba] sm:$0xff] }
 0x176   :  { %9533 = vmatprep.mubr.msk.bf16.mxu1 %vm132_vm1, %v11818_v6 }
 0x178   :  { %9534 = vmatmul.mubr.msk.bf16.gmra.mrb[24].mxu1 %vm132_vm1, %v11820_v53 }
 0x17b   :  { %9786 = vmatmul.mubr.msk.bf16.gmra.mrb[12].mxu0 %vm132_vm1, %v11496_v10  ;;  %v305_v10 = vld [vmem:[#allocation2 + $0x150] sm:$0xff] }
 0x17c   :  { %9789 = vmatprep.mubr.msk.bf16.mxu0 %vm132_vm1, %v11545_v25  ;;  %v11830_v25 = vpack.c.bf16 %v306_v54, %v305_v10  ;;  %v2931_v10 = vld [vmem:[#allocation2 + $0x232] sm:$0xff]  ;;  %v11883_v54 = vpack.c.bf16 %v324_v49, %v323_v40  ;;  %v11929_v40 = vpack.c.bf16 %v334_v19, %v333_v31  ;;  %v2943_v49 = vld [vmem:[#allocation2 + $0x2c2] sm:$0xff] }
 0x17d   :  { %v11889_v56 = vpack.c.bf16 %v2931_v10, %v2930_v50  ;;  %v11931_v50 = vpack.c.bf16 %v336_v42, %v335_v36  ;;  %v2979_v10 = vpack.c.bf16 %v2941_v39, %v2940_v44  ;;  %v2951_v31 = vld [vmem:[#allocation2 + $0x322] sm:$0xff]  ;;  %v1278_v44 = vld [vmem:[#allocation2 + $0x1b2] sm:$0xff]  ;;  %v1279_v39 = vld [vmem:[#allocation2 + $0x1ba] sm:$0xff] }
 0x17e   :  { %9537 = vmatprep.mubr.msk.bf16.mxu1 %vm132_vm1, %v11830_v25  ;;  %v2984_v36 = vpack.c.bf16 %v2951_v31, %v2950_v22  ;;  %v2953_v42 = vld [vmem:[#allocation2 + $0x33a] sm:$0xff]  ;;  %v4006_v22 = vld [vmem:[#allocation2 + $0x111] sm:$0xff] }
 0x180   :  { %9538 = vmatmul.mubr.msk.bf16.gmra.mrb[28].mxu1 %vm132_vm1, %v11832_v58 }
 0x183   :  { %9790 = vmatmul.mubr.msk.bf16.gmra.mrb[16].mxu0 %vm132_vm1, %v11547_v26  ;;  %v309_v26 = vld [vmem:[#allocation2 + $0x1b0] sm:$0xff] }
 0x184   :  { %9793 = vmatprep.mubr.msk.bf16.mxu0 %vm132_vm1, %v11591_v43  ;;  %v2916_v43 = vld [vmem:[#allocation2 + $0x152] sm:$0xff]  ;;  %v357_v62 = vpack.c.bf16 %v310_v59, %v309_v26 }
 0x185   :  { %v11843_v7 = vpack.c.bf16 %v2917_v61, %v2916_v43  ;;  %v325_v26 = vld [vmem:[#allocation2 + $0x270] sm:$0xff]  ;;  %v326_v59 = vld [vmem:[#allocation2 + $0x278] sm:$0xff]  ;;  %v2932_v43 = vld [vmem:[#allocation2 + $0x242] sm:$0xff] }
 0x186   :  { %9541 = vmatprep.mubr.msk.bf16.mxu1 %vm132_vm1, %v357_v62  ;;  %v2933_v61 = vld [vmem:[#allocation2 + $0x24a] sm:$0xff]  ;;  %v11897_v62 = vpack.c.bf16 %v326_v59, %v325_v26  ;;  %v2980_v26 = vpack.c.bf16 %v2943_v49, %v2942_v52  ;;  %v337_v59 = vld [vmem:[#allocation2 + $0x300] sm:$0xff]  ;;  %v1326_v52 = vpack.c.bf16 %v1279_v39, %v1278_v44 }
 0x188   :  { %9542 = vmatmul.mubr.msk.bf16.gmra.mrb[32].mxu1 %vm132_vm1, %v358_v5  ;;  %v11899_v5 = vpack.c.bf16 %v328_v63, %v327_v60  ;;  %v338_v60 = vld [vmem:[#allocation2 + $0x308] sm:$0xff]  ;;  %v2945_v63 = vld [vmem:[#allocation2 + $0x2da] sm:$0xff] }
 0x18b   :  { %9794 = vmatmul.mubr.msk.bf16.gmra.mrb[20].mxu0 %vm132_vm1, %v11601_v48  ;;  %v313_v48 = vld [vmem:[#allocation2 + $0x1e0] sm:$0xff] }
 0x18c   :  { %9797 = vmatprep.mubr.msk.bf16.mxu0 %vm132_vm1, %v11617_v57  ;;  %v314_v57 = vld [vmem:[#allocation2 + $0x1e8] sm:$0xff] }
 0x18d   :  { %v11852_v12 = vpack.c.bf16 %v314_v57, %v313_v48  ;;  %v11903_v48 = vpack.c.bf16 %v2933_v61, %v2932_v43  ;;  %v11905_v57 = vpack.c.bf16 %v2935_v3, %v2934_v0  ;;  %v339_v43 = vld [vmem:[#allocation2 + $0x318] sm:$0xff]  ;;  %v11939_v0 = vpack.c.bf16 %v338_v60, %v337_v59  ;;  %v340_v3 = vld [vmem:[#allocation2 + $0x320] sm:$0xff] }
 0x18e   :  { %v2944_v61 = vld [vmem:[#allocation2 + $0x2d2] sm:$0xff] }
 0x18f   :  { %9545 = vmatprep.mubr.msk.bf16.mxu1 %vm132_vm1, %v11852_v12  ;;  %v2981_v14 = vpack.c.bf16 %v2945_v63, %v2944_v61  ;;  %v4001_v61 = vld [vmem:[#allocation2 + $0xd9] sm:$0xff]  ;;  %v4002_v63 = vld [vmem:[#allocation2 + $0xe1] sm:$0xff] }
 0x190   :  { %9546 = vmatmul.mubr.msk.bf16.gmra.mrb[36].mxu1 %vm132_vm1, %v11854_v1 }
 0x191   :  { %9549 = vmatprep.mubr.msk.bf16.mxu1 %vm132_vm1, %v11865_v30 }
 0x193   :  { %9798 = vmatmul.mubr.msk.bf16.gmra.mrb[24].mxu0 %vm132_vm1, %v11843_v7 }
 0x194   :  { %9801 = vmatprep.mubr.msk.bf16.mxu0 %vm132_vm1, %v11845_v8 }
 0x198   :  { %9550 = vmatmul.mubr.msk.bf16.gmra.mrb[40].mxu1 %vm132_vm1, %v11867_v41 }
 0x199   :  { %9553 = vmatprep.mubr.msk.bf16.mxu1 %vm132_vm1, %v11881_v47 }
 0x19b   :  { %9802 = vmatmul.mubr.msk.bf16.gmra.mrb[28].mxu0 %vm132_vm1, %v2969_v18  ;;  %v332_v18 = vld [vmem:[#allocation2 + $0x2c0] sm:$0xff] }
 0x19c   :  { %9805 = vmatprep.mubr.msk.bf16.mxu0 %vm132_vm1, %v11858_v20  ;;  %v11915_v4 = vpack.c.bf16 %v332_v18, %v331_v11  ;;  %v11941_v11 = vpack.c.bf16 %v340_v3, %v339_v43  ;;  %v2948_v18 = vld [vmem:[#allocation2 + $0x302] sm:$0xff]  ;;  %v4003_v3 = vld [vmem:[#allocation2 + $0xf1] sm:$0xff] }
 0x19d   :  { %v2983_v19 = vpack.c.bf16 %v2949_v21, %v2948_v18  ;;  %v4005_v21 = vld [vmem:[#allocation2 + $0x109] sm:$0xff] }
 0x1a0   :  { %9554 = vmatmul.mubr.msk.bf16.gmra.mrb[44].mxu1 %vm132_vm1, %v11883_v54 }
 0x1a1   :  { %9557 = vmatprep.mubr.msk.bf16.mxu1 %vm132_vm1, %v11897_v62 }
 0x1a3   :  { %9806 = vmatmul.mubr.msk.bf16.gmra.mrb[32].mxu0 %vm132_vm1, %v11871_v34 }
 0x1a4   :  { %9809 = vmatprep.mubr.msk.bf16.mxu0 %vm132_vm1, %v11873_v37 }
 0x1a8   :  { %9558 = vmatmul.mubr.msk.bf16.gmra.mrb[48].mxu1 %vm132_vm1, %v11899_v5 }
 0x1a9   :  { %9561 = vmatprep.mubr.msk.bf16.mxu1 %vm132_vm1, %v11913_v16 }
 0x1ab   :  { %9810 = vmatmul.mubr.msk.bf16.gmra.mrb[36].mxu0 %vm132_vm1, %v11887_v55 }
 0x1ac   :  { %9813 = vmatprep.mubr.msk.bf16.mxu0 %vm132_vm1, %v11889_v56 }
 0x1b0   :  { %9562 = vmatmul.mubr.msk.bf16.gmra.mrb[52].mxu1 %vm132_vm1, %v11915_v4 }
 0x1b1   :  { %9565 = vmatprep.mubr.msk.bf16.mxu1 %vm132_vm1, %v11929_v40 }
 0x1b3   :  { %9814 = vmatmul.mubr.msk.bf16.gmra.mrb[40].mxu0 %vm132_vm1, %v11903_v48 }
 0x1b4   :  { %9817 = vmatprep.mubr.msk.bf16.mxu0 %vm132_vm1, %v11905_v57 }
 0x1b8   :  { %9566 = vmatmul.mubr.msk.bf16.gmra.mrb[56].mxu1 %vm132_vm1, %v11931_v50 }
 0x1b9   :  { %9569 = vmatprep.mubr.msk.bf16.mxu1 %vm132_vm1, %v11939_v0 }
 0x1bb   :  { %9818 = vmatmul.mubr.msk.bf16.gmra.mrb[44].mxu0 %vm132_vm1, %v11919_v27 }
 0x1bc   :  { %9821 = vmatprep.mubr.msk.bf16.mxu0 %vm132_vm1, %v11921_v29 }
 0x1c0   :  { %9570 = vmatmul.mubr.msk.bf16.gmra.mrb[60].mxu1 %vm132_vm1, %v11941_v11 }
 0x1c1   :  { %9603 = vmatprep.mubr.msk.bf16.mxu1 %vm132_vm1, %v11843_v7  ;;  %v2952_v7 = vld [vmem:[#allocation2 + $0x332] sm:$0xff] }
 0x1c2   :  { %v2985_v49 = vpack.c.bf16 %v2953_v42, %v2952_v7  ;;  %v4060_v7 = vpack.c.bf16 %v4006_v22, %v4005_v21  ;;  %v4028_v21 = vld [vmem:[#allocation2 + $0x249] sm:$0xff] }
 0x1c3   :  { %9822 = vmatmul.mubr.msk.bf16.gmra.mrb[48].mxu0 %vm132_vm1, %v2979_v10 }
 0x1c4   :  { %9825 = vmatprep.mubr.msk.bf16.mxu0 %vm132_vm1, %v2980_v26 }
 0x1c8   :  { %9604 = vmatmul.mubr.msk.bf16.vlgmr.msra.gmra.mrb[28].mxu1 %vm132_vm1, %v11845_v8  ;;  %v4180_v8 = vsel %vm565_vm0, %v11774_v28, 0  ;;  %v3470_v28 = vld [vmem:[#allocation2 + $0x1a0] sm:$0xff] }
 0x1c9   :  { %9607 = vmatprep.mubr.msk.bf16.mxu1 %vm132_vm1, %v1326_v52 }
 0x1cb   :  { %9826 = vmatmul.mubr.msk.bf16.gmra.mrb[52].mxu0 %vm132_vm1, %v2981_v14 }
 0x1cc   :  { %9829 = vmatprep.mubr.msk.bf16.mxu0 %vm132_vm1, %v2982_v15 }
 0x1d0   :  { %9608 = vmatmul.mubr.msk.bf16.gmra.mrb[32].mxu1 %vm132_vm1, %v11858_v20  ;;  %v11972_v20 = vld [vmem:[%s13111_s1 + $0x10] sm:$0x3] }
 0x1d1   :  { %9611 = vmatprep.mubr.msk.bf16.mxu1 %vm132_vm1, %v11871_v34 }
 0x1d3   :  { %9830 = vmatmul.mubr.msk.bf16.gmra.mrb[56].mxu0 %vm132_vm1, %v2983_v19 }
 0x1d4   :  { %9833 = vmatprep.mubr.msk.bf16.mxu0 %vm132_vm1, %v2984_v36 }
 0x1d8   :  { %9612 = vmatmul.mubr.msk.bf16.gmra.mrb[36].mxu1 %vm132_vm1, %v11873_v37 }
 0x1d9   :  { %9615 = vmatprep.mubr.msk.bf16.mxu1 %vm132_vm1, %v11887_v55  ;;  %v3994_v55 = vld [vmem:[#allocation2 + $0x81] sm:$0xff] }
 0x1db   :  { %9834 = vmatmul.mubr.msk.bf16.gmra.mrb[60].mxu0 %vm132_vm1, %v2985_v49  ;;  %v4009_v49 = vld [vmem:[#allocation2 + $0x139] sm:$0xff] }
 0x1dc   :  { %9839 = vmatprep.mubr.msk.bf16.mxu0 %vm132_vm1, %v11751_v13  ;;  %v3467_v13 = vld [vmem:[#allocation2 + $0x180] sm:$0xff] }
 0x1e0   :  { %9616 = vmatmul.mubr.msk.bf16.gmra.mrb[40].mxu1 %vm132_vm1, %v11889_v56 }
 0x1e1   :  { %9619 = vmatprep.mubr.msk.bf16.mxu1 %vm132_vm1, %v11903_v48 }
 0x1e3   :  { %9840 = vmatmul.mubr.msk.bf16.vlgmr.msra.gmra.mrb[0].mxu0 %vm132_vm1, %v11753_v17  ;;  %v3468_v17 = vld [vmem:[#allocation2 + $0x188] sm:$0xff] }
 0x1e4   :  { %9904 = vmatpush3.bf16.msra.mxu0 %v4180_v8  ;;  %9843 = vmatprep.mubr.msk.bf16.mxu0 %vm132_vm1, %v11761_v23  ;;  %v3517_v23 = vpack.c.bf16 %v3468_v17, %v3467_v13  ;;  %v4010_v8 = vld [vmem:[#allocation2 + $0x141] sm:$0xff]  ;;  %v4011_v13 = vld [vmem:[#allocation2 + $0x151] sm:$0xff]  ;;  %v4012_v17 = vld [vmem:[#allocation2 + $0x159] sm:$0xff] }
 0x1e5   :  { %11046 = vmatprep.subr.msk.bf16.mxu0 %vm565_vm0, %v11972_v20 }
 0x1e8   :  { %9620 = vmatmul.mubr.msk.bf16.gmra.mrb[44].mxu1 %vm132_vm1, %v11905_v57 }
 0x1e9   :  { %9623 = vmatprep.mubr.msk.bf16.mxu1 %vm132_vm1, %v11919_v27  ;;  %v3998_v27 = vld [vmem:[#allocation2 + $0xb1] sm:$0xff] }
 0x1eb   :  { %9844 = vmatmul.mubr.msk.bf16.gmra.mrb[4].mxu0 %vm132_vm1, %v11763_v24  ;;  %v3469_v24 = vld [vmem:[#allocation2 + $0x198] sm:$0xff] }
 0x1ec   :  { %9847 = vmatprep.mubr.msk.bf16.mxu0 %vm132_vm1, %v11782_v32  ;;  %v3518_v32 = vpack.c.bf16 %v3470_v28, %v3469_v24  ;;  %v4062_v28 = vpack.c.bf16 %v4010_v8, %v4009_v49  ;;  %v4029_v49 = vld [vmem:[#allocation2 + $0x259] sm:$0xff]  ;;  %v4030_v8 = vld [vmem:[#allocation2 + $0x261] sm:$0xff] }
 0x1f0   :  { %9624 = vmatmul.mubr.msk.bf16.gmra.mrb[48].mxu1 %vm132_vm1, %v11921_v29 }
 0x1f1   :  { %9627 = vmatprep.mubr.msk.bf16.mxu1 %vm132_vm1, %v2979_v10 }
 0x1f3   :  { %9848 = vmatmul.mubr.msk.bf16.gmra.mrb[8].mxu0 %vm132_vm1, %v11784_v33  ;;  %v3499_v33 = vld [vmem:[#allocation2 + $0x330] sm:$0xff] }
 0x1f4   :  { %9851 = vmatprep.mubr.msk.bf16.mxu0 %vm132_vm1, %v11794_v35  ;;  %v3500_v35 = vld [vmem:[#allocation2 + $0x338] sm:$0xff] }
 0x1f8   :  { %9628 = vmatmul.mubr.msk.bf16.gmra.mrb[52].mxu1 %vm132_vm1, %v2980_v26 }
 0x1f9   :  { %9631 = vmatprep.mubr.msk.bf16.mxu1 %vm132_vm1, %v2981_v14  ;;  %v12055_v56 = vpop.f32.mrb[0].mxu1  ;;  %v4058_v14 = vpack.c.bf16 %v4002_v63, %v4001_v61 }
 0x1fb   :  { %9852 = vmatmul.mubr.msk.bf16.gmra.mrb[12].mxu0 %vm132_vm1, %v11796_v38  ;;  %v3533_v38 = vpack.c.bf16 %v3500_v35, %v3499_v33  ;;  %v4013_v35 = vld [vmem:[#allocation2 + $0x169] sm:$0xff] }
 0x1fc   :  { %9855 = vmatprep.mubr.msk.bf16.mxu0 %vm132_vm1, %v11806_v51  ;;  %v3501_v51 = vld [vmem:[#allocation2 + $0x348] sm:$0xff] }
 0x200   :  { %9632 = vmatmul.mubr.msk.bf16.gmra.mrb[56].mxu1 %vm132_vm1, %v2982_v15  ;;  %v4059_v15 = vpack.c.bf16 %v4004_v9, %v4003_v3  ;;  %v4025_v3 = vld [vmem:[#allocation2 + $0x229] sm:$0xff]  ;;  %v4026_v9 = vld [vmem:[#allocation2 + $0x231] sm:$0xff] }
 0x201   :  { %9635 = vmatprep.mubr.msk.bf16.mxu1 %vm132_vm1, %v2983_v19  ;;  %v4007_v19 = vld [vmem:[#allocation2 + $0x121] sm:$0xff] }
 0x203   :  { %9856 = vmatmul.mubr.msk.bf16.gmra.mrb[16].mxu0 %vm132_vm1, %v11808_v45  ;;  %v3502_v45 = vld [vmem:[#allocation2 + $0x350] sm:$0xff] }
 0x204   :  { %9859 = vmatprep.mubr.msk.bf16.mxu0 %vm132_vm1, %v11818_v6  ;;  %v3987_v6 = vld [vmem:[#allocation2 + $0x31] sm:$0xff] }
 0x208   :  { %9636 = vmatmul.mubr.msk.bf16.gmra.mrb[60].mxu1 %vm132_vm1, %v2984_v36  ;;  %v4008_v36 = vld [vmem:[#allocation2 + $0x129] sm:$0xff] }
 0x209   :  { %v4061_v42 = vpack.c.bf16 %v4008_v36, %v4007_v19  ;;  %v4070_v36 = vpack.c.bf16 %v4026_v9, %v4025_v3  ;;  %v4040_v3 = vld [vmem:[#allocation2 + $0x2d9] sm:$0xff] }
 0x20b   :  { %9860 = vmatmul.mubr.msk.bf16.gmra.mrb[20].mxu0 %vm132_vm1, %v11820_v53  ;;  %v3988_v53 = vld [vmem:[#allocation2 + $0x39] sm:$0xff] }
 0x20c   :  { %9863 = vmatprep.mubr.msk.bf16.mxu0 %vm132_vm1, %v11830_v25  ;;  %v3534_v25 = vpack.c.bf16 %v3502_v45, %v3501_v51  ;;  %v4015_v45 = vld [vmem:[#allocation2 + $0x181] sm:$0xff] }
 0x213   :  { %9864 = vmatmul.mubr.msk.bf16.gmra.mrb[24].mxu0 %vm132_vm1, %v11832_v58  ;;  %v4051_v58 = vpack.c.bf16 %v3988_v53, %v3987_v6  ;;  %v4016_v6 = vld [vmem:[#allocation2 + $0x189] sm:$0xff] }
 0x214   :  { %9867 = vmatprep.mubr.msk.bf16.mxu0 %vm132_vm1, %v3517_v23 }
 0x21b   :  { %9868 = vmatmul.mubr.msk.bf16.gmra.mrb[28].mxu0 %vm132_vm1, %v3518_v32  ;;  %v4063_v32 = vpack.c.bf16 %v4012_v17, %v4011_v13  ;;  %v4031_v17 = vld [vmem:[#allocation2 + $0x271] sm:$0xff] }
 0x21c   :  { %9871 = vmatprep.mubr.msk.bf16.mxu0 %vm132_vm1, %v11852_v12  ;;  %v3989_v12 = vld [vmem:[#allocation2 + $0x49] sm:$0xff] }
 0x223   :  { %9872 = vmatmul.mubr.msk.bf16.gmra.mrb[32].mxu0 %vm132_vm1, %v11854_v1  ;;  %v3990_v1 = vld [vmem:[#allocation2 + $0x51] sm:$0xff] }
 0x224   :  { %9875 = vmatprep.mubr.msk.bf16.mxu0 %vm132_vm1, %v11865_v30  ;;  %v3991_v30 = vld [vmem:[#allocation2 + $0x61] sm:$0xff]  ;;  %v4052_v34 = vpack.c.bf16 %v3990_v1, %v3989_v12  ;;  %v4065_v12 = vpack.c.bf16 %v4016_v6, %v4015_v45 }
 0x22b   :  { %9876 = vmatmul.mubr.msk.bf16.gmra.mrb[36].mxu0 %vm132_vm1, %v11867_v41  ;;  %v3992_v41 = vld [vmem:[#allocation2 + $0x69] sm:$0xff] }
 0x22c   :  { %9879 = vmatprep.mubr.msk.bf16.mxu0 %vm132_vm1, %v11881_v47  ;;  %v4053_v37 = vpack.c.bf16 %v3992_v41, %v3991_v30  ;;  %v4728_v47 = vsel %vm565_vm0, %v11972_v20, 0  ;;  %v4017_v30 = vld [vmem:[#allocation2 + $0x199] sm:$0xff]  ;;  %v4018_v41 = vld [vmem:[#allocation2 + $0x1a1] sm:$0xff] }
 0x233   :  { %9880 = vmatmul.mubr.msk.bf16.gmra.mrb[40].mxu0 %vm132_vm1, %v11883_v54  ;;  %v3993_v54 = vld [vmem:[#allocation2 + $0x79] sm:$0xff] }
 0x234   :  { %9883 = vmatprep.mubr.msk.bf16.mxu0 %vm132_vm1, %v11897_v62  ;;  %v3995_v62 = vld [vmem:[#allocation2 + $0x91] sm:$0xff]  ;;  %v4054_v48 = vpack.c.bf16 %v3994_v55, %v3993_v54 }
 0x23b   :  { %9884 = vmatmul.mubr.msk.bf16.gmra.mrb[44].mxu0 %vm132_vm1, %v11899_v5  ;;  %v3996_v5 = vld [vmem:[#allocation2 + $0x99] sm:$0xff] }
 0x23c   :  { %9887 = vmatprep.mubr.msk.bf16.mxu0 %vm132_vm1, %v11913_v16  ;;  %v4055_v57 = vpack.c.bf16 %v3996_v5, %v3995_v62  ;;  %v12058_v16 = vpop.f32.mrb[1].mxu1  ;;  %v4066_v62 = vpack.c.bf16 %v4018_v41, %v4017_v30  ;;  %v4035_v41 = vld [vmem:[#allocation2 + $0x2a1] sm:$0xff] }
 0x23d   :  { %v12061_v29 = vpop.f32.mrb[2].mxu1 }
 0x23e   :  { %v12063_v10 = vpop.f32.mrb[3].mxu1 }
 0x23f   :  { %v12065_v26 = vpop.f32.mrb[4].mxu1 }
 0x240   :  { %v12068_v43 = vpop.f32.mrb[5].mxu1 }
 0x243   :  { %9888 = vmatmul.mubr.msk.bf16.gmra.mrb[48].mxu0 %vm132_vm1, %v11915_v4  ;;  %v3997_v4 = vld [vmem:[#allocation2 + $0xa9] sm:$0xff] }
 0x244   :  { %9891 = vmatprep.mubr.msk.bf16.mxu0 %vm132_vm1, %v11929_v40  ;;  %v3999_v40 = vld [vmem:[#allocation2 + $0xc1] sm:$0xff]  ;;  %v4056_v59 = vpack.c.bf16 %v3998_v27, %v3997_v4 }
 0x245   :  { %v4022_v4 = vld [vmem:[#allocation2 + $0x201] sm:$0xff] }
 0x24b   :  { %9892 = vmatmul.mubr.msk.bf16.gmra.mrb[52].mxu0 %vm132_vm1, %v11931_v50  ;;  %v4000_v50 = vld [vmem:[#allocation2 + $0xc9] sm:$0xff] }
 0x24c   :  { %9895 = vmatprep.mubr.msk.bf16.mxu0 %vm132_vm1, %v11939_v0  ;;  %v4057_v60 = vpack.c.bf16 %v4000_v50, %v3999_v40  ;;  %v12071_v0 = vpop.f32.mrb[6].mxu1  ;;  %v4023_v40 = vld [vmem:[#allocation2 + $0x211] sm:$0xff]  ;;  %v4024_v50 = vld [vmem:[#allocation2 + $0x219] sm:$0xff] }
 0x24d   :  { %v12073_v46 = vpop.f32.mrb[7].mxu1  ;;  %v4069_v61 = vpack.c.bf16 %v4024_v50, %v4023_v40  ;;  %v4037_v40 = vld [vmem:[#allocation2 + $0x2b9] sm:$0xff]  ;;  %v4038_v50 = vld [vmem:[#allocation2 + $0x2c1] sm:$0xff] }
 0x253   :  { %9896 = vmatmul.mubr.msk.bf16.gmra.mrb[56].mxu0 %vm132_vm1, %v11941_v11  ;;  %v12075_v11 = vpop.f32.mrb[8].mxu1 }
 0x254   :  { %9899 = vmatprep.mubr.msk.bf16.mxu0 %vm132_vm1, %v3533_v38  ;;  %v12078_v18 = vpop.f32.mrb[9].mxu1  ;;  %v4014_v38 = vld [vmem:[#allocation2 + $0x171] sm:$0xff] }
 0x255   :  { %v12081_v31 = vpop.f32.mrb[10].mxu1 }
 0x256   :  { %v12083_v44 = vpop.f32.mrb[11].mxu1 }
 0x257   :  { %v12085_v39 = vpop.f32.mrb[12].mxu1 }
 0x258   :  { %v12088_v52 = vpop.f32.mrb[13].mxu1 }
 0x259   :  { %v12091_v20 = vpop.f32.mrb[14].mxu1 }
 0x25a   :  { %v12093_v23 = vpop.f32.mrb[15].mxu1 }
 0x25b   :  { %9900 = vmatmul.mubr.msk.bf16.gmra.mrb[60].mxu0 %vm132_vm1, %v3534_v25  ;;  %v12095_v24 = vpop.f32.mrb[16].mxu1 }
 0x25c   :  { %9905 = vmatprep.mubr.msk.bf16.mxu0 %vm132_vm1, %v4051_v58  ;;  %v12098_v33 = vpop.f32.mrb[17].mxu1  ;;  %v4064_v58 = vpack.c.bf16 %v4014_v38, %v4013_v35  ;;  %v4072_v38 = vpack.c.bf16 %v4030_v8, %v4029_v49  ;;  %v4041_v49 = vld [vmem:[#allocation2 + $0x2e9] sm:$0xff]  ;;  %v4042_v8 = vld [vmem:[#allocation2 + $0x2f1] sm:$0xff] }
 0x25d   :  { %v12101_v51 = vpop.f32.mrb[18].mxu1 }
 0x25e   :  { %v12103_v53 = vpop.f32.mrb[19].mxu1 }
 0x25f   :  { %v12105_v25 = vpop.f32.mrb[20].mxu1 }
 0x260   :  { %v12108_v1 = vpop.f32.mrb[21].mxu1 }
 0x263   :  { %9906 = vmatmul.mubr.msk.bf16.vlgmr.msra.gmra.mrb[0].mxu0 %vm132_vm1, %v4052_v34  ;;  %v12111_v34 = vpop.f32.mrb[22].mxu1 }
 0x264   :  { %9970 = vmatpush3.bf16.msra.mxu0 %v4728_v47  ;;  %9909 = vmatprep.mubr.msk.bf16.mxu0 %vm132_vm1, %v4053_v37  ;;  %v4019_v37 = vld [vmem:[#allocation2 + $0x1e1] sm:$0xff]  ;;  %v4020_v47 = vld [vmem:[#allocation2 + $0x1e9] sm:$0xff]  ;;  %v12113_v54 = vpop.f32.mrb[23].mxu1 }
 0x265   :  { %v12115_v55 = vpop.f32.mrb[24].mxu1  ;;  %v4067_v5 = vpack.c.bf16 %v4020_v47, %v4019_v37  ;;  %v4036_v37 = vld [vmem:[#allocation2 + $0x2a9] sm:$0xff] }
 0x26b   :  { %9910 = vmatmul.mubr.msk.bf16.gmra.mrb[4].mxu0 %vm132_vm1, %v4054_v48  ;;  %v12118_v48 = vpop.f32.mrb[25].mxu1 }
 0x26c   :  { %9913 = vmatprep.mubr.msk.bf16.mxu0 %vm132_vm1, %v4055_v57  ;;  %v4021_v57 = vld [vmem:[#allocation2 + $0x1f9] sm:$0xff]  ;;  %v12121_v27 = vpop.f32.mrb[26].mxu1 }
 0x273   :  { %9914 = vmatmul.mubr.msk.bf16.gmra.mrb[8].mxu0 %vm132_vm1, %v4056_v59  ;;  %v12123_v59 = vpop.f32.mrb[27].mxu1 }
 0x274   :  { %9917 = vmatprep.mubr.msk.bf16.mxu0 %vm132_vm1, %v4057_v60  ;;  %v4068_v60 = vpack.c.bf16 %v4022_v4, %v4021_v57  ;;  %v4075_v57 = vpack.c.bf16 %v4036_v37, %v4035_v41 }
 0x27b   :  { %9918 = vmatmul.mubr.msk.bf16.gmra.mrb[12].mxu0 %vm132_vm1, %v4058_v14 }
 0x27c   :  { %9921 = vmatprep.mubr.msk.bf16.mxu0 %vm132_vm1, %v4059_v15  ;;  %v4027_v15 = vld [vmem:[#allocation2 + $0x241] sm:$0xff] }
 0x283   :  { %9922 = vmatmul.mubr.msk.bf16.gmra.mrb[16].mxu0 %vm132_vm1, %v4060_v7  ;;  %v4071_v7 = vpack.c.bf16 %v4028_v21, %v4027_v15  ;;  %v4076_v21 = vpack.c.bf16 %v4038_v50, %v4037_v40  ;;  %v4047_v50 = vld [vmem:[#allocation2 + $0x331] sm:$0xff] }
 0x284   :  { %9925 = vmatprep.mubr.msk.bf16.mxu0 %vm132_vm1, %v4061_v42 }
 0x28b   :  { %9926 = vmatmul.mubr.msk.bf16.gmra.mrb[20].mxu0 %vm132_vm1, %v4062_v28  ;;  %v4032_v28 = vld [vmem:[#allocation2 + $0x279] sm:$0xff] }
 0x28c   :  { %9929 = vmatprep.mubr.msk.bf16.mxu0 %vm132_vm1, %v4063_v32  ;;  %v4073_v45 = vpack.c.bf16 %v4032_v28, %v4031_v17  ;;  %v4043_v28 = vld [vmem:[#allocation2 + $0x301] sm:$0xff] }
 0x293   :  { %9930 = vmatmul.mubr.msk.bf16.gmra.mrb[24].mxu0 %vm132_vm1, %v4064_v58  ;;  %v4033_v58 = vld [vmem:[#allocation2 + $0x289] sm:$0xff] }
 0x294   :  { %9933 = vmatprep.mubr.msk.bf16.mxu0 %vm132_vm1, %v4065_v12  ;;  %v4034_v12 = vld [vmem:[#allocation2 + $0x291] sm:$0xff] }
 0x29b   :  { %9934 = vmatmul.mubr.msk.bf16.gmra.mrb[28].mxu0 %vm132_vm1, %v4066_v62  ;;  %v12126_v63 = vpop.f32.mrb[28].mxu1 }
 0x29c   :  { %9937 = vmatprep.mubr.msk.bf16.mxu0 %vm132_vm1, %v4067_v5  ;;  %v12129_v14 = vpop.f32.mrb[29].mxu1  ;;  %v4074_v5 = vpack.c.bf16 %v4034_v12, %v4033_v58  ;;  %v4078_v12 = vpack.c.bf16 %v4042_v8, %v4041_v49  ;;  %v4049_v8 = vld [vmem:[#allocation2 + $0x349] sm:$0xff] }
 0x29d   :  { %v12131_v22 = vpop.f32.mrb[30].mxu1 }
 0x29e   :  { %v12133_v19 = vpop.f32.mrb[31].mxu1 }
 0x2a3   :  { %9938 = vmatmul.mubr.msk.bf16.gmra.mrb[32].mxu0 %vm132_vm1, %v4068_v60  ;;  %v12136_v42 = vpop.f32.mrb[32].mxu1 }
 0x2a4   :  { %9941 = vmatprep.mubr.msk.bf16.mxu0 %vm132_vm1, %v4069_v61  ;;  %v12139_v13 = vpop.f32.mrb[33].mxu1  ;;  %v4039_v61 = vld [vmem:[#allocation2 + $0x2d1] sm:$0xff] }
 0x2a5   :  { %v12141_v32 = vpop.f32.mrb[34].mxu1 }
 0x2a6   :  { %v12143_v35 = vpop.f32.mrb[35].mxu1 }
 0x2ab   :  { %9942 = vmatmul.mubr.msk.bf16.gmra.mrb[36].mxu0 %vm132_vm1, %v4070_v36  ;;  %v12146_v6 = vpop.f32.mrb[36].mxu1  ;;  %v4077_v36 = vpack.c.bf16 %v4040_v3, %v4039_v61  ;;  %v4048_v61 = vld [vmem:[#allocation2 + $0x339] sm:$0xff] }
 0x2ac   :  { %9945 = vmatprep.mubr.msk.bf16.mxu0 %vm132_vm1, %v4071_v7  ;;  %v12149_v30 = vpop.f32.mrb[37].mxu1  ;;  %v4081_v2 = vpack.c.bf16 %v4048_v61, %v4047_v50  ;;  %v4539_v61 = vld [vmem:[#allocation2 + $0x62] sm:$0xff] }
 0x2ad   :  { %v12151_v47 = vpop.f32.mrb[38].mxu1 }
 0x2ae   :  { %v12153_v62 = vpop.f32.mrb[39].mxu1 }
 0x2b3   :  { %9946 = vmatmul.mubr.msk.bf16.gmra.mrb[40].mxu0 %vm132_vm1, %v4072_v38  ;;  %v12156_v4 = vpop.f32.mrb[40].mxu1  ;;  %v4044_v38 = vld [vmem:[#allocation2 + $0x309] sm:$0xff] }
 0x2b4   :  { %9949 = vmatprep.mubr.msk.bf16.mxu0 %vm132_vm1, %v4073_v45  ;;  %v12159_v60 = vpop.f32.mrb[41].mxu1  ;;  %v4079_v41 = vpack.c.bf16 %v4044_v38, %v4043_v28  ;;  %v4050_v28 = vld [vmem:[#allocation2 + $0x351] sm:$0xff] }
 0x2b5   :  { %v12161_v9 = vpop.f32.mrb[42].mxu1 }
 0x2b6   :  { %v12163_v15 = vpop.f32.mrb[43].mxu1 }
 0x2bb   :  { %9950 = vmatmul.mubr.msk.bf16.gmra.mrb[44].mxu0 %vm132_vm1, %v4074_v5  ;;  %v12166_v7 = vpop.f32.mrb[44].mxu1  ;;  %v4045_v5 = vld [vmem:[#allocation2 + $0x319] sm:$0xff] }
 0x2bc   :  { %9953 = vmatprep.mubr.msk.bf16.mxu0 %vm132_vm1, %v4075_v57  ;;  %v12169_v17 = vpop.f32.mrb[45].mxu1  ;;  %v4046_v57 = vld [vmem:[#allocation2 + $0x321] sm:$0xff] }
 0x2bd   :  { %v12171_v45 = vpop.f32.mrb[46].mxu1 }
 0x2be   :  { %v12173_v58 = vpop.f32.mrb[47].mxu1 }
 0x2c3   :  { %9954 = vmatmul.mubr.msk.bf16.gmra.mrb[48].mxu0 %vm132_vm1, %v4076_v21  ;;  %v12176_v37 = vpop.f32.mrb[48].mxu1 }
 0x2c4   :  { %9957 = vmatprep.mubr.msk.bf16.mxu0 %vm132_vm1, %v4077_v36  ;;  %13121 = vst [vmem:[#allocation11_spill] sm:$0xff] %v12176_v37  ;;  %v12179_v40 = vpop.f32.mrb[49].mxu1  ;;  %v4080_v36 = vpack.c.bf16 %v4046_v57, %v4045_v5  ;;  %v4537_v57 = vld [vmem:[#allocation2 + $0x4a] sm:$0xff] }
 0x2c5   :  { %13122 = vst [vmem:[#allocation12_spill] sm:$0xff] %v12179_v40  ;;  %v12181_v3 = vpop.f32.mrb[50].mxu1 }
 0x2c6   :  { %13123 = vst [vmem:[#allocation13_spill] sm:$0xff] %v12181_v3  ;;  %v12183_v21 = vpop.f32.mrb[51].mxu1  ;;  %v4082_v3 = vpack.c.bf16 %v4050_v28, %v4049_v8 }
 0x2c7   :  { %13124 = vst [vmem:[#allocation14_spill] sm:$0xff] %v12183_v21 }
 0x2cb   :  { %9958 = vmatmul.mubr.msk.bf16.gmra.mrb[52].mxu0 %vm132_vm1, %v4078_v12  ;;  %v12186_v49 = vpop.f32.mrb[52].mxu1  ;;  %v4535_v12 = vld [vmem:[#allocation2 + $0x32] sm:$0xff] }
 0x2cc   :  { %9961 = vmatprep.mubr.msk.bf16.mxu0 %vm132_vm1, %v4079_v41  ;;  %13125 = vst [vmem:[#allocation15_spill] sm:$0xff] %v12186_v49  ;;  %v12189_v38 = vpop.f32.mrb[53].mxu1  ;;  %v4536_v41 = vld [vmem:[#allocation2 + $0x3a] sm:$0xff] }
 0x2cd   :  { %13126 = vst [vmem:[#allocation16_spill] sm:$0xff] %v12189_v38  ;;  %v12191_v40 = vpop.f32.mrb[54].mxu1  ;;  %v4599_v21 = vpack.c.bf16 %v4536_v41, %v4535_v12  ;;  %v4543_v12 = vld [vmem:[#allocation2 + $0x92] sm:$0xff]  ;;  %v4544_v41 = vld [vmem:[#allocation2 + $0x9a] sm:$0xff] }
 0x2ce   :  { %13127 = vst [vmem:[#allocation17_spill] sm:$0xff] %v12191_v40  ;;  %v12193_v37 = vpop.f32.mrb[55].mxu1 }
 0x2cf   :  { %13128 = vst [vmem:[#allocation18_spill] sm:$0xff] %v12193_v37 }
 0x2d3   :  { %9962 = vmatmul.mubr.msk.bf16.gmra.mrb[56].mxu0 %vm132_vm1, %v4080_v36  ;;  %v12196_v5 = vpop.f32.mrb[56].mxu1  ;;  %v4540_v36 = vld [vmem:[#allocation2 + $0x6a] sm:$0xff] }
 0x2d4   :  { %9965 = vmatprep.mubr.msk.bf16.mxu0 %vm132_vm1, %v4081_v2  ;;  %13129 = vst [vmem:[#allocation19_spill] sm:$0xff] %v12196_v5  ;;  %v4538_v2 = vld [vmem:[#allocation2 + $0x52] sm:$0xff]  ;;  %v12199_v50 = vpop.f32.mrb[57].mxu1  ;;  %v4601_v37 = vpack.c.bf16 %v4540_v36, %v4539_v61 }
 0x2d5   :  { %13130 = vst [vmem:[#allocation20_spill] sm:$0xff] %v12199_v50  ;;  %v12201_v38 = vpop.f32.mrb[58].mxu1  ;;  %v4600_v40 = vpack.c.bf16 %v4538_v2, %v4537_v57  ;;  %v4546_v57 = vld [vmem:[#allocation2 + $0xb2] sm:$0xff]  ;;  %v4547_v2 = vld [vmem:[#allocation2 + $0xc2] sm:$0xff] }
 0x2d6   :  { %13131 = vst [vmem:[#allocation21_spill] sm:$0xff] %v12201_v38  ;;  %v12203_v49 = vpop.f32.mrb[59].mxu1 }
 0x2d7   :  { %13132 = vst [vmem:[#allocation22_spill] sm:$0xff] %v12203_v49  ;;  %v4603_v49 = vpack.c.bf16 %v4544_v41, %v4543_v12  ;;  %v4555_v12 = vld [vmem:[#allocation2 + $0x122] sm:$0xff]  ;;  %v4556_v41 = vld [vmem:[#allocation2 + $0x12a] sm:$0xff] }
 0x2db   :  { %9966 = vmatmul.mubr.msk.bf16.gmra.mrb[60].mxu0 %vm132_vm1, %v4082_v3  ;;  %v12206_v8 = vpop.f32.mrb[60].mxu1  ;;  %v4541_v3 = vld [vmem:[#allocation2 + $0x7a] sm:$0xff] }
 0x2dc   :  { %9971 = vmatprep.mubr.msk.bf16.mxu0 %vm132_vm1, %v4599_v21  ;;  %13133 = vst [vmem:[#allocation23_spill] sm:$0xff] %v12206_v8  ;;  %v4542_v21 = vld [vmem:[#allocation2 + $0x82] sm:$0xff]  ;;  %v12209_v28 = vpop.f32.mrb[61].mxu1  ;;  %v4551_v8 = vld [vmem:[#allocation2 + $0xf2] sm:$0xff] }
 0x2dd   :  { %13134 = vst [vmem:[#allocation24_spill] sm:$0xff] %v12209_v28  ;;  %v12211_v50 = vpop.f32.mrb[62].mxu1  ;;  %v4602_v38 = vpack.c.bf16 %v4542_v21, %v4541_v3  ;;  %v4549_v28 = vld [vmem:[#allocation2 + $0xda] sm:$0xff] }
 0x2de   :  { %13135 = vst [vmem:[#allocation25_spill] sm:$0xff] %v12211_v50  ;;  %v12213_v5 = vpop.f32.mrb[63].mxu1  ;;  %v4550_v50 = vld [vmem:[#allocation2 + $0xe2] sm:$0xff] }
 0x2df   :  { %13136 = vst [vmem:[#allocation26_spill] sm:$0xff] %v12213_v5  ;;  %v4552_v5 = vld [vmem:[#allocation2 + $0xfa] sm:$0xff]  ;;  %v4606_v3 = vpack.c.bf16 %v4550_v50, %v4549_v28  ;;  %v4562_v28 = vld [vmem:[#allocation2 + $0x172] sm:$0xff] }
 0x2e0   :  { %v4607_v21 = vpack.c.bf16 %v4552_v5, %v4551_v8  ;;  %v4561_v8 = vld [vmem:[#allocation2 + $0x16a] sm:$0xff] }
 0x2e3   :  { %9972 = vmatmul.mubr.msk.bf16.vlgmr.msra.gmra.mrb[0].mxu0 %vm132_vm1, %v4600_v40  ;;  %v4545_v40 = vld [vmem:[#allocation2 + $0xaa] sm:$0xff] }
 0x2e4   :  { %9975 = vmatprep.mubr.msk.bf16.mxu0 %vm132_vm1, %v4601_v37  ;;  %v4548_v37 = vld [vmem:[#allocation2 + $0xca] sm:$0xff]  ;;  %v4604_v61 = vpack.c.bf16 %v4546_v57, %v4545_v40  ;;  %v4609_v57 = vpack.c.bf16 %v4556_v41, %v4555_v12  ;;  %v4565_v12 = vld [vmem:[#allocation2 + $0x19a] sm:$0xff]  ;;  %v4566_v41 = vld [vmem:[#allocation2 + $0x1a2] sm:$0xff] }
 0x2e5   :  { %v4605_v36 = vpack.c.bf16 %v4548_v37, %v4547_v2  ;;  %v4557_v2 = vld [vmem:[#allocation2 + $0x13a] sm:$0xff]  ;;  %v4558_v37 = vld [vmem:[#allocation2 + $0x142] sm:$0xff] }
 0x2e6   :  { %v4610_v50 = vpack.c.bf16 %v4558_v37, %v4557_v2  ;;  %v4614_v2 = vpack.c.bf16 %v4566_v41, %v4565_v12 }
 0x2eb   :  { %9976 = vmatmul.mubr.msk.bf16.gmra.mrb[4].mxu0 %vm132_vm1, %v4602_v38  ;;  %v4554_v38 = vld [vmem:[#allocation2 + $0x112] sm:$0xff] }
 0x2ec   :  { %9979 = vmatprep.mubr.msk.bf16.mxu0 %vm132_vm1, %v4603_v49  ;;  %v4553_v49 = vld [vmem:[#allocation2 + $0x10a] sm:$0xff] }
 0x2ed   :  { %v4608_v40 = vpack.c.bf16 %v4554_v38, %v4553_v49  ;;  %v4612_v49 = vpack.c.bf16 %v4562_v28, %v4561_v8 }
 0x2f3   :  { %9980 = vmatmul.mubr.msk.bf16.gmra.mrb[8].mxu0 %vm132_vm1, %v4604_v61  ;;  %v4559_v61 = vld [vmem:[#allocation2 + $0x152] sm:$0xff] }
 0x2f4   :  { %9983 = vmatprep.mubr.msk.bf16.mxu0 %vm132_vm1, %v4605_v36  ;;  %v4560_v36 = vld [vmem:[#allocation2 + $0x15a] sm:$0xff] }
 0x2f5   :  { %v4611_v5 = vpack.c.bf16 %v4560_v36, %v4559_v61  ;;  %v4569_v61 = vld [vmem:[#allocation2 + $0x1fa] sm:$0xff]  ;;  %v4570_v36 = vld [vmem:[#allocation2 + $0x202] sm:$0xff] }
 0x2f6   :  { %v4616_v8 = vpack.c.bf16 %v4570_v36, %v4569_v61 }
 0x2fb   :  { %9984 = vmatmul.mubr.msk.bf16.gmra.mrb[12].mxu0 %vm132_vm1, %v4606_v3  ;;  %v4563_v3 = vld [vmem:[#allocation2 + $0x182] sm:$0xff] }
 0x2fc   :  { %9987 = vmatprep.mubr.msk.bf16.mxu0 %vm132_vm1, %v4607_v21  ;;  %v4564_v21 = vld [vmem:[#allocation2 + $0x18a] sm:$0xff] }
 0x2fd   :  { %v4613_v38 = vpack.c.bf16 %v4564_v21, %v4563_v3  ;;  %v4573_v3 = vld [vmem:[#allocation2 + $0x22a] sm:$0xff]  ;;  %v4574_v21 = vld [vmem:[#allocation2 + $0x232] sm:$0xff] }
 0x2fe   :  { %v4618_v12 = vpack.c.bf16 %v4574_v21, %v4573_v3 }
 0x303   :  { %9988 = vmatmul.mubr.msk.bf16.gmra.mrb[16].mxu0 %vm132_vm1, %v4608_v40  ;;  %v4567_v40 = vld [vmem:[#allocation2 + $0x1e2] sm:$0xff] }
 0x304   :  { %9991 = vmatprep.mubr.msk.bf16.mxu0 %vm132_vm1, %v4609_v57  ;;  %v4568_v57 = vld [vmem:[#allocation2 + $0x1ea] sm:$0xff] }
 0x305   :  { %v4615_v37 = vpack.c.bf16 %v4568_v57, %v4567_v40  ;;  %v4577_v40 = vld [vmem:[#allocation2 + $0x25a] sm:$0xff]  ;;  %v4578_v57 = vld [vmem:[#allocation2 + $0x262] sm:$0xff] }
 0x306   :  { %v4620_v61 = vpack.c.bf16 %v4578_v57, %v4577_v40  ;;  %v4588_v40 = vld [vmem:[#allocation2 + $0x2da] sm:$0xff] }
 0x30b   :  { %9992 = vmatmul.mubr.msk.bf16.gmra.mrb[20].mxu0 %vm132_vm1, %v4610_v50  ;;  %v4571_v50 = vld [vmem:[#allocation2 + $0x212] sm:$0xff] }
 0x30c   :  { %9995 = vmatprep.mubr.msk.bf16.mxu0 %vm132_vm1, %v4611_v5  ;;  %v4572_v5 = vld [vmem:[#allocation2 + $0x21a] sm:$0xff] }
 0x30d   :  { %v4617_v28 = vpack.c.bf16 %v4572_v5, %v4571_v50  ;;  %v4581_v50 = vld [vmem:[#allocation2 + $0x28a] sm:$0xff]  ;;  %v4582_v5 = vld [vmem:[#allocation2 + $0x292] sm:$0xff] }
 0x30e   :  { %v4622_v3 = vpack.c.bf16 %v4582_v5, %v4581_v50  ;;  %v4592_v50 = vld [vmem:[#allocation2 + $0x30a] sm:$0xff] }
 0x313   :  { %9996 = vmatmul.mubr.msk.bf16.gmra.mrb[24].mxu0 %vm132_vm1, %v4612_v49  ;;  %v4575_v49 = vld [vmem:[#allocation2 + $0x242] sm:$0xff] }
 0x314   :  { %9999 = vmatprep.mubr.msk.bf16.mxu0 %vm132_vm1, %v4613_v38  ;;  %v4576_v38 = vld [vmem:[#allocation2 + $0x24a] sm:$0xff] }
 0x315   :  { %v4619_v41 = vpack.c.bf16 %v4576_v38, %v4575_v49  ;;  %v13137_v49 = vmov 0.0   ;;  %v4585_v38 = vld [vmem:[#allocation2 + $0x2ba] sm:$0xff] }
 0x316   :  { %5360 = vst.msk [vmem:[#allocation4] sm:$0xff] %vm5083_vm4, %v13137_v49  ;;  %5363 = vst.msk [vmem:[#allocation4 + $0xa0] sm:$0xff] %vm5083_vm4, %v13137_v49 }
 0x317   :  { %5366 = vst.msk [vmem:[#allocation4 + $0x90] sm:$0xff] %vm5083_vm4, %v13137_v49  ;;  %5368 = vst.msk [vmem:[#allocation4 + $0x130] sm:$0xff] %vm5083_vm4, %v13137_v49 }
 0x318   :  { %7016 = vst.msk [vmem:[#allocation6] sm:$0xff] %vm5083_vm4, %v13137_v49  ;;  %7018 = vst.msk [vmem:[#allocation6 + $0x60] sm:$0xff] %vm5083_vm4, %v13137_v49 }
 0x319   :  { %7021 = vst.msk [vmem:[#allocation6 + $0x50] sm:$0xff] %vm5083_vm4, %v13137_v49  ;;  %7023 = vst.msk [vmem:[#allocation6 + $0xb0] sm:$0xff] %vm5083_vm4, %v13137_v49 }
 0x31a   :  { %5362 = vst.msk [vmem:[#allocation4 + $0x8] sm:$0x3] %vm5361_vm5, %v13137_v49  ;;  %5364 = vst.msk [vmem:[#allocation4 + $0xa8] sm:$0x3] %vm5361_vm5, %v13137_v49 }
 0x31b   :  { %10000 = vmatmul.mubr.msk.bf16.gmra.mrb[28].mxu0 %vm132_vm1, %v4614_v2  ;;  %v4579_v2 = vld [vmem:[#allocation2 + $0x272] sm:$0xff]  ;;  %5367 = vst.msk [vmem:[#allocation4 + $0x98] sm:$0x3] %vm5361_vm5, %v13137_v49  ;;  %5369 = vst.msk [vmem:[#allocation4 + $0x138] sm:$0x3] %vm5361_vm5, %v13137_v49 }
 0x31c   :  { %10003 = vmatprep.mubr.msk.bf16.mxu0 %vm132_vm1, %v4615_v37  ;;  %v4580_v37 = vld [vmem:[#allocation2 + $0x27a] sm:$0xff]  ;;  %7017 = vst.msk [vmem:[#allocation6 + $0x8] sm:$0x3] %vm5361_vm5, %v13137_v49  ;;  %7019 = vst.msk [vmem:[#allocation6 + $0x68] sm:$0x3] %vm5361_vm5, %v13137_v49 }
 0x31d   :  { %v4621_v36 = vpack.c.bf16 %v4580_v37, %v4579_v2  ;;  %v4589_v37 = vld [vmem:[#allocation2 + $0x2ea] sm:$0xff]  ;;  %7022 = vst.msk [vmem:[#allocation6 + $0x58] sm:$0x3] %vm5361_vm5, %v13137_v49  ;;  %7024 = vst.msk [vmem:[#allocation6 + $0xb8] sm:$0x3] %vm5361_vm5, %v13137_v49 }
 0x31e   :  { %5372 = vst.msk [vmem:[#allocation4 + $0x10] sm:$0x1] %vm5371_vm6, %v13137_v49  ;;  %5373 = vst.msk [vmem:[#allocation4 + $0x20] sm:$0x1] %vm5371_vm6, %v13137_v49 }
 0x31f   :  { %5374 = vst.msk [vmem:[#allocation4 + $0x30] sm:$0x1] %vm5371_vm6, %v13137_v49  ;;  %5375 = vst.msk [vmem:[#allocation4 + $0x40] sm:$0x1] %vm5371_vm6, %v13137_v49 }
 0x320   :  { %5376 = vst.msk [vmem:[#allocation4 + $0x50] sm:$0x1] %vm5371_vm6, %v13137_v49  ;;  %5377 = vst.msk [vmem:[#allocation4 + $0x60] sm:$0x1] %vm5371_vm6, %v13137_v49 }
 0x321   :  { %5378 = vst.msk [vmem:[#allocation4 + $0x70] sm:$0x1] %vm5371_vm6, %v13137_v49  ;;  %5379 = vst.msk [vmem:[#allocation4 + $0x80] sm:$0x1] %vm5371_vm6, %v13137_v49 }
 0x322   :  { %5380 = vst.msk [vmem:[#allocation4 + $0xb0] sm:$0x1] %vm5371_vm6, %v13137_v49  ;;  %5381 = vst.msk [vmem:[#allocation4 + $0xc0] sm:$0x1] %vm5371_vm6, %v13137_v49 }
 0x323   :  { %10004 = vmatmul.mubr.msk.bf16.gmra.mrb[32].mxu0 %vm132_vm1, %v4616_v8  ;;  %v4583_v8 = vld [vmem:[#allocation2 + $0x2a2] sm:$0xff]  ;;  %5382 = vst.msk [vmem:[#allocation4 + $0xd0] sm:$0x1] %vm5371_vm6, %v13137_v49  ;;  %5383 = vst.msk [vmem:[#allocation4 + $0xe0] sm:$0x1] %vm5371_vm6, %v13137_v49 }
 0x324   :  { %10007 = vmatprep.mubr.msk.bf16.mxu0 %vm132_vm1, %v4617_v28  ;;  %v4584_v28 = vld [vmem:[#allocation2 + $0x2aa] sm:$0xff]  ;;  %5384 = vst.msk [vmem:[#allocation4 + $0xf0] sm:$0x1] %vm5371_vm6, %v13137_v49  ;;  %5385 = vst.msk [vmem:[#allocation4 + $0x100] sm:$0x1] %vm5371_vm6, %v13137_v49 }
 0x325   :  { %v4623_v21 = vpack.c.bf16 %v4584_v28, %v4583_v8  ;;  %v4593_v28 = vld [vmem:[#allocation2 + $0x31a] sm:$0xff]  ;;  %5386 = vst.msk [vmem:[#allocation4 + $0x110] sm:$0x1] %vm5371_vm6, %v13137_v49  ;;  %5387 = vst.msk [vmem:[#allocation4 + $0x120] sm:$0x1] %vm5371_vm6, %v13137_v49 }
 0x326   :  { %5388 = vst.msk [vmem:[#allocation4 + $0x19] sm:$0x1] %vm5371_vm6, %v13137_v49  ;;  %5389 = vst.msk [vmem:[#allocation4 + $0x29] sm:$0x1] %vm5371_vm6, %v13137_v49 }
 0x327   :  { %5390 = vst.msk [vmem:[#allocation4 + $0x39] sm:$0x1] %vm5371_vm6, %v13137_v49  ;;  %5391 = vst.msk [vmem:[#allocation4 + $0x49] sm:$0x1] %vm5371_vm6, %v13137_v49 }
 0x328   :  { %5392 = vst.msk [vmem:[#allocation4 + $0x59] sm:$0x1] %vm5371_vm6, %v13137_v49  ;;  %5393 = vst.msk [vmem:[#allocation4 + $0x69] sm:$0x1] %vm5371_vm6, %v13137_v49 }
 0x329   :  { %5394 = vst.msk [vmem:[#allocation4 + $0x79] sm:$0x1] %vm5371_vm6, %v13137_v49  ;;  %5395 = vst.msk [vmem:[#allocation4 + $0x89] sm:$0x1] %vm5371_vm6, %v13137_v49 }
 0x32a   :  { %5396 = vst.msk [vmem:[#allocation4 + $0xb9] sm:$0x1] %vm5371_vm6, %v13137_v49  ;;  %5397 = vst.msk [vmem:[#allocation4 + $0xc9] sm:$0x1] %vm5371_vm6, %v13137_v49 }
 0x32b   :  { %10008 = vmatmul.mubr.msk.bf16.gmra.mrb[36].mxu0 %vm132_vm1, %v4618_v12  ;;  %v4586_v12 = vld [vmem:[#allocation2 + $0x2c2] sm:$0xff]  ;;  %5398 = vst.msk [vmem:[#allocation4 + $0xd9] sm:$0x1] %vm5371_vm6, %v13137_v49  ;;  %5399 = vst.msk [vmem:[#allocation4 + $0xe9] sm:$0x1] %vm5371_vm6, %v13137_v49 }
 0x32c   :  { %10011 = vmatprep.mubr.msk.bf16.mxu0 %vm132_vm1, %v4619_v41  ;;  %v4587_v41 = vld [vmem:[#allocation2 + $0x2d2] sm:$0xff]  ;;  %v4624_v57 = vpack.c.bf16 %v4586_v12, %v4585_v38  ;;  %5400 = vst.msk [vmem:[#allocation4 + $0xf9] sm:$0x1] %vm5371_vm6, %v13137_v49  ;;  %5401 = vst.msk [vmem:[#allocation4 + $0x109] sm:$0x1] %vm5371_vm6, %v13137_v49  ;;  %v4596_v38 = vld [vmem:[#allocation2 + $0x33a] sm:$0xff] }
 0x32d   :  { %v4625_v2 = vpack.c.bf16 %v4588_v40, %v4587_v41  ;;  %5402 = vst.msk [vmem:[#allocation4 + $0x119] sm:$0x1] %vm5371_vm6, %v13137_v49  ;;  %5403 = vst.msk [vmem:[#allocation4 + $0x129] sm:$0x1] %vm5371_vm6, %v13137_v49  ;;  %v4597_v40 = vld [vmem:[#allocation2 + $0x34a] sm:$0xff] }
 0x32e   :  { %7026 = vst.msk [vmem:[#allocation6 + $0x10] sm:$0x1] %vm5371_vm6, %v13137_v49  ;;  %7027 = vst.msk [vmem:[#allocation6 + $0x20] sm:$0x1] %vm5371_vm6, %v13137_v49 }
 0x32f   :  { %7028 = vst.msk [vmem:[#allocation6 + $0x30] sm:$0x1] %vm5371_vm6, %v13137_v49  ;;  %7029 = vst.msk [vmem:[#allocation6 + $0x40] sm:$0x1] %vm5371_vm6, %v13137_v49 }
 0x330   :  { %7030 = vst.msk [vmem:[#allocation6 + $0x70] sm:$0x1] %vm5371_vm6, %v13137_v49  ;;  %7031 = vst.msk [vmem:[#allocation6 + $0x80] sm:$0x1] %vm5371_vm6, %v13137_v49 }
 0x331   :  { %7032 = vst.msk [vmem:[#allocation6 + $0x90] sm:$0x1] %vm5371_vm6, %v13137_v49  ;;  %7033 = vst.msk [vmem:[#allocation6 + $0xa0] sm:$0x1] %vm5371_vm6, %v13137_v49 }
 0x333   :  { %10012 = vmatmul.mubr.msk.bf16.gmra.mrb[40].mxu0 %vm132_vm1, %v4620_v61  ;;  %v4590_v61 = vld [vmem:[#allocation2 + $0x2f2] sm:$0xff] }
 0x334   :  { %10015 = vmatprep.mubr.msk.bf16.mxu0 %vm132_vm1, %v4621_v36  ;;  %v4591_v36 = vld [vmem:[#allocation2 + $0x302] sm:$0xff]  ;;  %v4626_v5 = vpack.c.bf16 %v4590_v61, %v4589_v37 }
 0x335   :  { %v4627_v8 = vpack.c.bf16 %v4592_v50, %v4591_v36  ;;  %v11050_v37 = vld [vmem:[%s13112_s2 + $0x8] sm:$0xff]  }
 0x336   :  { %10035 = vmatprep.subr.bf16.mxu1 %v11050_v37 }
 0x337   :  { %10036 = vmatpush3.bf16.msra.mxu1 %v11050_v37 }
 0x33b   :  { %10016 = vmatmul.mubr.msk.bf16.gmra.mrb[44].mxu0 %vm132_vm1, %v4622_v3  ;;  %v4594_v3 = vld [vmem:[#allocation2 + $0x322] sm:$0xff] }
 0x33c   :  { %10019 = vmatprep.mubr.msk.bf16.mxu0 %vm132_vm1, %v4623_v21  ;;  %v4595_v21 = vld [vmem:[#allocation2 + $0x332] sm:$0xff]  ;;  %v4628_v12 = vpack.c.bf16 %v4594_v3, %v4593_v28 }
 0x33d   :  { %v4629_v41 = vpack.c.bf16 %v4596_v38, %v4595_v21 }
 0x343   :  { %10020 = vmatmul.mubr.msk.bf16.gmra.mrb[48].mxu0 %vm132_vm1, %v4624_v57  ;;  %v4598_v57 = vld [vmem:[#allocation2 + $0x352] sm:$0xff] }
 0x344   :  { %10023 = vmatprep.mubr.msk.bf16.mxu0 %vm132_vm1, %v4625_v2  ;;  %v4630_v2 = vpack.c.bf16 %v4598_v57, %v4597_v40 }
 0x34b   :  { %10024 = vmatmul.mubr.msk.bf16.gmra.mrb[52].mxu0 %vm132_vm1, %v4626_v5 }
 0x34c   :  { %10027 = vmatprep.mubr.msk.bf16.mxu0 %vm132_vm1, %v4627_v8 }
 0x353   :  { %10028 = vmatmul.mubr.msk.bf16.gmra.mrb[56].mxu0 %vm132_vm1, %v4628_v12 }
 0x354   :  { %10031 = vmatprep.mubr.msk.bf16.mxu0 %vm132_vm1, %v4629_v41 }
 0x35b   :  { %10032 = vmatmul.mubr.msk.bf16.gmra.mrb[60].mxu0 %vm132_vm1, %v4630_v2 }
 0x3b6   :  { %v9973_v61 = vpop.f32.mrb[0].mxu0 }
 0x3b7   :  { %v10333_v36 = vadd.f32 %v9973_v61, %v12055_v56  ;;  %v4764_v50 = vpop.f32.mrb[1].mxu0  ;;  %v12370_v56 = vld [vmem:[%s13112_s2] sm:$0xff]  }
 0x3b8   :  { %v10334_v5 = vadd.f32 %v4764_v50, %v12058_v16  ;;  %v9974_v8 = vpop.f32.mrb[2].mxu0  ;;  %10053 = vmatprep.subr.bf16.mxu1 %v12370_v56 }
 0x3b9   :  { %5086 = vst.msk [vmem:[#allocation3 + $0x10] sm:$0xff] %vm5083_vm4, %v10333_v36  ;;  %v10335_v28 = vadd.f32 %v9974_v8, %v12061_v29  ;;  %v4767_v3 = vpop.f32.mrb[3].mxu0 }
 0x3ba   :  { %5084 = vst.msk [vmem:[#allocation3] sm:$0xff] %vm5083_vm4, %v10334_v5  ;;  %v10336_v21 = vadd.f32 %v4767_v3, %v12063_v10 }
 0x3bb   :  { %5087 = vst.msk [vmem:[#allocation3 + $0x18] sm:$0xff] %vm5083_vm4, %v10335_v28 }
 0x3bc   :  { %5085 = vst.msk [vmem:[#allocation3 + $0x8] sm:$0xff] %vm5083_vm4, %v10336_v21 }
 0x3be   :  { %v9977_v16 = vpop.f32.mrb[4].mxu0 }
 0x3bf   :  { %v10337_v38 = vadd.f32 %v9977_v16, %v12065_v26  ;;  %v4780_v29 = vpop.f32.mrb[5].mxu0 }
 0x3c0   :  { %v10338_v12 = vadd.f32 %v4780_v29, %v12068_v43  ;;  %v9978_v41 = vpop.f32.mrb[6].mxu0  ;;  %v12384_v43 = vld [vmem:[%s13114_s4] ss:$0 sm:$0xff] }
 0x3c1   :  { %5090 = vst.msk [vmem:[#allocation3 + $0x30] sm:$0xff] %vm5083_vm4, %v10337_v38  ;;  %v10339_v10 = vadd.f32 %v9978_v41, %v12071_v0  ;;  %v4783_v40 = vpop.f32.mrb[7].mxu0 }
 0x3c2   :  { %v5150_v57 = vld [vmem:[#allocation3 + $0x10] ss:$2 sm:$0xff]  ;;  %v5214_v2 = vld [vmem:[#allocation3 + $0x11] ss:$2 sm:$0xff]  ;;  %5088 = vst.msk [vmem:[#allocation3 + $0x20] sm:$0xff] %vm5083_vm4, %v10338_v12  ;;  %v10340_v37 = vadd.f32 %v4783_v40, %v12073_v46 }
 0x3c3   :  { %v5276_v61 = vmax.f32 %v5150_v57, %v5214_v2  ;;  %v5148_v36 = vld [vmem:[#allocation3] ss:$2 sm:$0xff]  ;;  %v5212_v50 = vld [vmem:[#allocation3 + $0x1] ss:$2 sm:$0xff]  ;;  %5091 = vst.msk [vmem:[#allocation3 + $0x38] sm:$0xff] %vm5083_vm4, %v10339_v10 }
 0x3c4   :  { %v5275_v26 = vmax.f32 %v5148_v36, %v5212_v50  ;;  %5089 = vst.msk [vmem:[#allocation3 + $0x28] sm:$0xff] %vm5083_vm4, %v10340_v37 }
 0x3c6   :  { %v5307_v0 = vmax.f32 %v5275_v26, %v5276_v61  ;;  %v9981_v5 = vpop.f32.mrb[8].mxu0 }
 0x3c7   :  { %v10341_v8 = vadd.f32 %v9981_v5, %v12075_v11  ;;  %v4796_v28 = vpop.f32.mrb[9].mxu0  ;;  %v5444_v5 = vld [vmem:[#allocation4 + $0x1] sm:$0xff] }
 0x3c8   :  { %v5327_v46 = vadd.f32 %v12384_v43, %v5307_v0  ;;  %v10342_v3 = vadd.f32 %v4796_v28, %v12078_v18  ;;  %v9982_v21 = vpop.f32.mrb[10].mxu0 }
 0x3c9   :  { %5094 = vst.msk [vmem:[#allocation3 + $0x50] sm:$0xff] %vm5083_vm4, %v10341_v8  ;;  %v10343_v16 = vadd.f32 %v9982_v21, %v12081_v31  ;;  %v4799_v38 = vpop.f32.mrb[11].mxu0 }
 0x3ca   :  { %v5343_v29 = vmax.f32 %v5327_v46, 0.0  ;;  %v5154_v12 = vld [vmem:[#allocation3 + $0x30] ss:$2 sm:$0xff]  ;;  %v5218_v41 = vld [vmem:[#allocation3 + $0x31] ss:$2 sm:$0xff]  ;;  %5092 = vst.msk [vmem:[#allocation3 + $0x40] sm:$0xff] %vm5083_vm4, %v10342_v3  ;;  %v10344_v10 = vadd.f32 %v4799_v38, %v12083_v44 }
 0x3cb   :  { %v5278_v40 = vmax.f32 %v5154_v12, %v5218_v41  ;;  %v5152_v11 = vld [vmem:[#allocation3 + $0x20] ss:$2 sm:$0xff]  ;;  %v5216_v57 = vld [vmem:[#allocation3 + $0x21] ss:$2 sm:$0xff]  ;;  %5095 = vst.msk [vmem:[#allocation3 + $0x58] sm:$0xff] %vm5083_vm4, %v10343_v16 }
 0x3cc   :  { %5404 = vst.msk [vmem:[#allocation4 + $0x11] sm:$0xff] %vm5083_vm4, %v5343_v29  ;;  %v5277_v18 = vmax.f32 %v5152_v11, %v5216_v57  ;;  %5093 = vst.msk [vmem:[#allocation3 + $0x48] sm:$0xff] %vm5083_vm4, %v10344_v10 }
 0x3ce   :  { %v5308_v2 = vmax.f32 %v5277_v18, %v5278_v40  ;;  %v9985_v31 = vpop.f32.mrb[12].mxu0 }
 0x3cf   :  { %v10345_v37 = vadd.f32 %v9985_v31, %v12085_v39  ;;  %v4812_v61 = vpop.f32.mrb[13].mxu0 }
 0x3d0   :  { %v5328_v36 = vadd.f32 %v12384_v43, %v5308_v2  ;;  %v10346_v50 = vadd.f32 %v4812_v61, %v12088_v52  ;;  %v9986_v44 = vpop.f32.mrb[14].mxu0 }
 0x3d1   :  { %5098 = vst.msk [vmem:[#allocation3 + $0x70] sm:$0xff] %vm5083_vm4, %v10345_v37  ;;  %v10347_v26 = vadd.f32 %v9986_v44, %v12091_v20  ;;  %v4815_v0 = vpop.f32.mrb[15].mxu0 }
 0x3d2   :  { %v5344_v8 = vmax.f32 %v5328_v36, 0.0  ;;  %v5158_v28 = vld [vmem:[#allocation3 + $0x50] ss:$2 sm:$0xff]  ;;  %v5222_v46 = vld [vmem:[#allocation3 + $0x51] ss:$2 sm:$0xff]  ;;  %5096 = vst.msk [vmem:[#allocation3 + $0x60] sm:$0xff] %vm5083_vm4, %v10346_v50  ;;  %v10348_v3 = vadd.f32 %v4815_v0, %v12093_v23 }
 0x3d3   :  { %v5280_v39 = vmax.f32 %v5158_v28, %v5222_v46  ;;  %v5156_v21 = vld [vmem:[#allocation3 + $0x40] ss:$2 sm:$0xff]  ;;  %v5220_v16 = vld [vmem:[#allocation3 + $0x41] ss:$2 sm:$0xff]  ;;  %5099 = vst.msk [vmem:[#allocation3 + $0x78] sm:$0xff] %vm5083_vm4, %v10347_v26  ;;  %v12404_v52 = vld [vmem:[#allocation4 + $0x11] sm:$0xff] }
 0x3d4   :  { %5405 = vst.msk [vmem:[#allocation4 + $0x21] sm:$0xff] %vm5083_vm4, %v5344_v8  ;;  %v5279_v38 = vmax.f32 %v5156_v21, %v5220_v16  ;;  %5097 = vst.msk [vmem:[#allocation3 + $0x68] sm:$0xff] %vm5083_vm4, %v10348_v3  ;;  %v5460_v20 = vpack.c.bf16 %v12404_v52, %v5444_v5  ;;  %v11055_v0 = vld [vmem:[%s13112_s2 + $0x28] sm:$0xff]  }
 0x3d6   :  { %v5309_v29 = vmax.f32 %v5279_v38, %v5280_v39  ;;  %v9989_v12 = vpop.f32.mrb[16].mxu0  ;;  %10037 = vmatprep.mubr.msk.bf16.mxu1 %vm5083_vm4, %v5460_v20 }
 0x3d7   :  { %v10349_v23 = vadd.f32 %v9989_v12, %v12095_v24  ;;  %v4828_v41 = vpop.f32.mrb[17].mxu0 }
 0x3d8   :  { %v5329_v10 = vadd.f32 %v12384_v43, %v5309_v29  ;;  %v10350_v40 = vadd.f32 %v4828_v41, %v12098_v33  ;;  %v9990_v11 = vpop.f32.mrb[18].mxu0 }
 0x3d9   :  { %5102 = vst.msk [vmem:[#allocation3 + $0x90] sm:$0xff] %vm5083_vm4, %v10349_v23  ;;  %v10351_v57 = vadd.f32 %v9990_v11, %v12101_v51  ;;  %v4831_v18 = vpop.f32.mrb[19].mxu0  ;;  %v12422_v51 = vld [vmem:[#allocation4 + $0x12] sm:$0xff] }
 0x3da   :  { %v5345_v2 = vmax.f32 %v5329_v10, 0.0  ;;  %v5162_v31 = vld [vmem:[#allocation3 + $0x70] ss:$2 sm:$0xff]  ;;  %v5226_v37 = vld [vmem:[#allocation3 + $0x71] ss:$2 sm:$0xff]  ;;  %5100 = vst.msk [vmem:[#allocation3 + $0x80] sm:$0xff] %vm5083_vm4, %v10350_v40  ;;  %v10352_v61 = vadd.f32 %v4831_v18, %v12103_v53 }
 0x3db   :  { %v5282_v36 = vmax.f32 %v5162_v31, %v5226_v37  ;;  %v5160_v24 = vld [vmem:[#allocation3 + $0x60] ss:$2 sm:$0xff]  ;;  %v5224_v50 = vld [vmem:[#allocation3 + $0x61] ss:$2 sm:$0xff]  ;;  %5103 = vst.msk [vmem:[#allocation3 + $0x98] sm:$0xff] %vm5083_vm4, %v10351_v57  ;;  %v12447_v11 = vld [vmem:[%s13112_s2 + $0x10] sm:$0xff]  }
 0x3dc   :  { %v12418_v44 = vld [vmem:[#allocation4 + $0x21] sm:$0xff]  ;;  %5406 = vst.msk [vmem:[#allocation4 + $0x31] sm:$0xff] %vm5083_vm4, %v5345_v2  ;;  %v5281_v33 = vmax.f32 %v5160_v24, %v5224_v50  ;;  %5101 = vst.msk [vmem:[#allocation3 + $0x88] sm:$0xff] %vm5083_vm4, %v10352_v61 }
 0x3dd   :  { %v12424_v26 = vld [vmem:[#allocation4 + $0x22] sm:$0xff] }
 0x3de   :  { %v5310_v5 = vmax.f32 %v5281_v33, %v5282_v36  ;;  %v9993_v8 = vpop.f32.mrb[20].mxu0 }
 0x3df   :  { %v10353_v28 = vadd.f32 %v9993_v8, %v12105_v25  ;;  %v4844_v46 = vpop.f32.mrb[21].mxu0 }
 0x3e0   :  { %v5330_v3 = vadd.f32 %v12384_v43, %v5310_v5  ;;  %v10354_v39 = vadd.f32 %v4844_v46, %v12108_v1  ;;  %v9994_v21 = vpop.f32.mrb[22].mxu0 }
 0x3e1   :  { %5106 = vst.msk [vmem:[#allocation3 + $0xb0] sm:$0xff] %vm5083_vm4, %v10353_v28  ;;  %v10355_v16 = vadd.f32 %v9994_v21, %v12111_v34  ;;  %v4847_v38 = vpop.f32.mrb[23].mxu0 }
 0x3e2   :  { %v5346_v20 = vmax.f32 %v5330_v3, 0.0  ;;  %v5166_v29 = vld [vmem:[#allocation3 + $0x90] ss:$2 sm:$0xff]  ;;  %v5230_v12 = vld [vmem:[#allocation3 + $0x91] ss:$2 sm:$0xff]  ;;  %5104 = vst.msk [vmem:[#allocation3 + $0xa0] sm:$0xff] %vm5083_vm4, %v10354_v39  ;;  %v10356_v23 = vadd.f32 %v4847_v38, %v12113_v54 }
 0x3e3   :  { %v5284_v41 = vmax.f32 %v5166_v29, %v5230_v12  ;;  %v5164_v25 = vld [vmem:[#allocation3 + $0x80] ss:$2 sm:$0xff]  ;;  %v5228_v10 = vld [vmem:[#allocation3 + $0x81] ss:$2 sm:$0xff]  ;;  %5107 = vst.msk [vmem:[#allocation3 + $0xb8] sm:$0xff] %vm5083_vm4, %v10355_v16  ;;  %v12438_v40 = vld [vmem:[#allocation4 + $0x31] sm:$0xff] }
 0x3e4   :  { %5407 = vst.msk [vmem:[#allocation4 + $0x41] sm:$0xff] %vm5083_vm4, %v5346_v20  ;;  %v5283_v1 = vmax.f32 %v5164_v25, %v5228_v10  ;;  %5105 = vst.msk [vmem:[#allocation3 + $0xa8] sm:$0xff] %vm5083_vm4, %v10356_v23  ;;  %v5461_v34 = vpack.c.bf16 %v12438_v40, %v12418_v44 }
 0x3e6   :  { %v5311_v54 = vmax.f32 %v5283_v1, %v5284_v41  ;;  %v9997_v57 = vpop.f32.mrb[24].mxu0  ;;  %10038 = vmatmul.mubr.msk.bf16.vlgmr.msra.gmra.mrb[64].mxu1 %vm5083_vm4, %v5461_v34 }
 0x3e7   :  { %v10357_v18 = vadd.f32 %v9997_v57, %v12115_v55  ;;  %v4860_v2 = vpop.f32.mrb[25].mxu0  ;;  %10054 = vmatpush3.bf16.msra.mxu1 %v12370_v56 }
 0x3e8   :  { %v5331_v31 = vadd.f32 %v12384_v43, %v5311_v54  ;;  %v10358_v37 = vadd.f32 %v4860_v2, %v12118_v48  ;;  %v9998_v61 = vpop.f32.mrb[26].mxu0  ;;  %10071 = vmatprep.subr.bf16.mxu1 %v12447_v11 }
 0x3e9   :  { %5110 = vst.msk [vmem:[#allocation3 + $0xd0] sm:$0xff] %vm5083_vm4, %v10357_v18  ;;  %v10359_v36 = vadd.f32 %v9998_v61, %v12121_v27  ;;  %v4863_v24 = vpop.f32.mrb[27].mxu0  ;;  %v12464_v27 = vld [vmem:[#allocation4 + $0x32] sm:$0xff] }
 0x3ea   :  { %v5347_v50 = vmax.f32 %v5331_v31, 0.0  ;;  %v5170_v33 = vld [vmem:[#allocation3 + $0xb0] ss:$2 sm:$0xff]  ;;  %v5234_v5 = vld [vmem:[#allocation3 + $0xb1] ss:$2 sm:$0xff]  ;;  %5108 = vst.msk [vmem:[#allocation3 + $0xc0] sm:$0xff] %vm5083_vm4, %v10358_v37  ;;  %v10360_v55 = vadd.f32 %v4863_v24, %v12123_v59 }
 0x3eb   :  { %v5286_v56 = vmax.f32 %v5170_v33, %v5234_v5  ;;  %v5168_v8 = vld [vmem:[#allocation3 + $0xa0] ss:$2 sm:$0xff]  ;;  %v5232_v28 = vld [vmem:[#allocation3 + $0xa1] ss:$2 sm:$0xff]  ;;  %5111 = vst.msk [vmem:[#allocation3 + $0xd8] sm:$0xff] %vm5083_vm4, %v10359_v36 }
 0x3ec   :  { %v12460_v48 = vld [vmem:[#allocation4 + $0x41] sm:$0xff]  ;;  %5408 = vst.msk [vmem:[#allocation4 + $0x51] sm:$0xff] %vm5083_vm4, %v5347_v50  ;;  %v5285_v46 = vmax.f32 %v5168_v8, %v5232_v28  ;;  %5109 = vst.msk [vmem:[#allocation3 + $0xc8] sm:$0xff] %vm5083_vm4, %v10360_v55 }
 0x3ed   :  { %v12466_v3 = vld [vmem:[#allocation4 + $0x42] sm:$0xff] }
 0x3ee   :  { %v5312_v21 = vmax.f32 %v5285_v46, %v5286_v56  ;;  %v10001_v16 = vpop.f32.mrb[28].mxu0  ;;  %v11054_v59 = vld [vmem:[%s13112_s2 + $0x20] sm:$0xff]  }
 0x3ef   :  { %v10361_v38 = vadd.f32 %v10001_v16, %v12126_v63  ;;  %v4876_v20 = vpop.f32.mrb[29].mxu0 }
 0x3f0   :  { %v5332_v29 = vadd.f32 %v12384_v43, %v5312_v21  ;;  %v10362_v12 = vadd.f32 %v4876_v20, %v12129_v14  ;;  %v10002_v23 = vpop.f32.mrb[30].mxu0 }
 0x3f1   :  { %5114 = vst.msk [vmem:[#allocation3 + $0xf0] sm:$0xff] %vm5083_vm4, %v10361_v38  ;;  %v10363_v41 = vadd.f32 %v10002_v23, %v12131_v22  ;;  %v4879_v25 = vpop.f32.mrb[31].mxu0 }
 0x3f2   :  { %v5348_v10 = vmax.f32 %v5332_v29, 0.0  ;;  %v5174_v1 = vld [vmem:[#allocation3 + $0xd0] ss:$2 sm:$0xff]  ;;  %v5238_v34 = vld [vmem:[#allocation3 + $0xd1] ss:$2 sm:$0xff]  ;;  %5112 = vst.msk [vmem:[#allocation3 + $0xe0] sm:$0xff] %vm5083_vm4, %v10362_v12  ;;  %v10364_v54 = vadd.f32 %v4879_v25, %v12133_v19 }
 0x3f3   :  { %v5288_v57 = vmax.f32 %v5174_v1, %v5238_v34  ;;  %v5172_v63 = vld [vmem:[#allocation3 + $0xc0] ss:$2 sm:$0xff]  ;;  %v5236_v18 = vld [vmem:[#allocation3 + $0xc1] ss:$2 sm:$0xff]  ;;  %5115 = vst.msk [vmem:[#allocation3 + $0xf8] sm:$0xff] %vm5083_vm4, %v10363_v41  ;;  %v12480_v2 = vld [vmem:[#allocation4 + $0x51] sm:$0xff] }
 0x3f4   :  { %5409 = vst.msk [vmem:[#allocation4 + $0x61] sm:$0xff] %vm5083_vm4, %v5348_v10  ;;  %v5287_v14 = vmax.f32 %v5172_v63, %v5236_v18  ;;  %5113 = vst.msk [vmem:[#allocation3 + $0xe8] sm:$0xff] %vm5083_vm4, %v10364_v54  ;;  %v12486_v22 = vpack.c.bf16 %v12480_v2, %v12460_v48 }
 0x3f6   :  { %v5313_v31 = vmax.f32 %v5287_v14, %v5288_v57  ;;  %v10005_v37 = vpop.f32.mrb[32].mxu0  ;;  %10041 = vmatprep.mubr.msk.bf16.mxu1 %vm5083_vm4, %v12486_v22 }
 0x3f7   :  { %v10365_v19 = vadd.f32 %v10005_v37, %v12136_v42  ;;  %v4892_v61 = vpop.f32.mrb[33].mxu0 }
 0x3f8   :  { %v5333_v36 = vadd.f32 %v12384_v43, %v5313_v31  ;;  %v10366_v24 = vadd.f32 %v4892_v61, %v12139_v13  ;;  %v10006_v50 = vpop.f32.mrb[34].mxu0 }
 0x3f9   :  { %5118 = vst.msk [vmem:[#allocation3 + $0x110] sm:$0xff] %vm5083_vm4, %v10365_v19  ;;  %v10367_v33 = vadd.f32 %v10006_v50, %v12141_v32  ;;  %v4895_v5 = vpop.f32.mrb[35].mxu0  ;;  %v12502_v32 = vld [vmem:[#allocation4 + $0x52] sm:$0xff] }
 0x3fa   :  { %v5349_v55 = vmax.f32 %v5333_v36, 0.0  ;;  %v5178_v56 = vld [vmem:[#allocation3 + $0xf0] ss:$2 sm:$0xff]  ;;  %v5242_v8 = vld [vmem:[#allocation3 + $0xf1] ss:$2 sm:$0xff]  ;;  %5116 = vst.msk [vmem:[#allocation3 + $0x100] sm:$0xff] %vm5083_vm4, %v10366_v24  ;;  %v10368_v28 = vadd.f32 %v4895_v5, %v12143_v35  ;;  %v12687_v35 = vpack.c.bf16 %v12464_v27, %v12424_v26  ;;  %v12694_v53 = vpack.c.bf16 %v12502_v32, %v12466_v3 }
 0x3fb   :  { %v5290_v46 = vmax.f32 %v5178_v56, %v5242_v8  ;;  %v5176_v42 = vld [vmem:[#allocation3 + $0xe0] ss:$2 sm:$0xff]  ;;  %v5240_v21 = vld [vmem:[#allocation3 + $0xe1] ss:$2 sm:$0xff]  ;;  %5119 = vst.msk [vmem:[#allocation3 + $0x118] sm:$0xff] %vm5083_vm4, %v10367_v33 }
 0x3fc   :  { %v12498_v16 = vld [vmem:[#allocation4 + $0x61] sm:$0xff]  ;;  %5410 = vst.msk [vmem:[#allocation4 + $0x71] sm:$0xff] %vm5083_vm4, %v5349_v55  ;;  %v5289_v13 = vmax.f32 %v5176_v42, %v5240_v21  ;;  %5117 = vst.msk [vmem:[#allocation3 + $0x108] sm:$0xff] %vm5083_vm4, %v10368_v28 }
 0x3fd   :  { %v12504_v38 = vld [vmem:[#allocation4 + $0x62] sm:$0xff] }
 0x3fe   :  { %v5314_v29 = vmax.f32 %v5289_v13, %v5290_v46  ;;  %v10009_v12 = vpop.f32.mrb[36].mxu0 }
 0x3ff   :  { %v10369_v23 = vadd.f32 %v10009_v12, %v12146_v6  ;;  %v4908_v41 = vpop.f32.mrb[37].mxu0 }
 0x400   :  { %v5334_v25 = vadd.f32 %v12384_v43, %v5314_v29  ;;  %v10370_v10 = vadd.f32 %v4908_v41, %v12149_v30  ;;  %v10010_v1 = vpop.f32.mrb[38].mxu0 }
 0x401   :  { %5122 = vst.msk [vmem:[#allocation3 + $0x130] sm:$0xff] %vm5083_vm4, %v10369_v23  ;;  %v10371_v34 = vadd.f32 %v10010_v1, %v12151_v47  ;;  %v4911_v54 = vpop.f32.mrb[39].mxu0 }
 0x402   :  { %v5350_v57 = vmax.f32 %v5334_v25, 0.0  ;;  %v5182_v63 = vld [vmem:[#allocation3 + $0x110] ss:$2 sm:$0xff]  ;;  %v5246_v18 = vld [vmem:[#allocation3 + $0x111] ss:$2 sm:$0xff]  ;;  %5120 = vst.msk [vmem:[#allocation3 + $0x120] sm:$0xff] %vm5083_vm4, %v10370_v10  ;;  %v10372_v14 = vadd.f32 %v4911_v54, %v12153_v62 }
 0x403   :  { %v5292_v31 = vmax.f32 %v5182_v63, %v5246_v18  ;;  %v5180_v6 = vld [vmem:[#allocation3 + $0x100] ss:$2 sm:$0xff]  ;;  %v5244_v37 = vld [vmem:[#allocation3 + $0x101] ss:$2 sm:$0xff]  ;;  %5123 = vst.msk [vmem:[#allocation3 + $0x138] sm:$0xff] %vm5083_vm4, %v10371_v34  ;;  %v12518_v19 = vld [vmem:[#allocation4 + $0x71] sm:$0xff] }
 0x404   :  { %5411 = vst.msk [vmem:[#allocation4 + $0x81] sm:$0xff] %vm5083_vm4, %v5350_v57  ;;  %v5291_v30 = vmax.f32 %v5180_v6, %v5244_v37  ;;  %5121 = vst.msk [vmem:[#allocation3 + $0x128] sm:$0xff] %vm5083_vm4, %v10372_v14  ;;  %v12524_v47 = vpack.c.bf16 %v12518_v19, %v12498_v16  ;;  %v5452_v34 = vld [vmem:[#allocation4 + $0xa1] sm:$0xff] }
 0x406   :  { %v5315_v61 = vmax.f32 %v5291_v30, %v5292_v31  ;;  %v10013_v36 = vpop.f32.mrb[40].mxu0  ;;  %10042 = vmatmul.mubr.msk.bf16.gmra.mrb[68].mxu1 %vm5083_vm4, %v12524_v47 }
 0x407   :  { %v10373_v62 = vadd.f32 %v10013_v36, %v12156_v4  ;;  %v4924_v24 = vpop.f32.mrb[41].mxu0 }
 0x408   :  { %v5335_v50 = vadd.f32 %v12384_v43, %v5315_v61  ;;  %v10374_v33 = vadd.f32 %v4924_v24, %v12159_v60  ;;  %v10014_v5 = vpop.f32.mrb[42].mxu0  ;;  %v13138_v61 = vld [vmem:[#allocation11_spill] sm:$0xff]  ;;  %v13139_v24 = vld [vmem:[#allocation12_spill] sm:$0xff] }
 0x409   :  { %5126 = vst.msk [vmem:[#allocation3 + $0x150] sm:$0xff] %vm5083_vm4, %v10373_v62  ;;  %v10375_v55 = vadd.f32 %v10014_v5, %v12161_v9  ;;  %v4927_v56 = vpop.f32.mrb[43].mxu0  ;;  %v13140_v5 = vld [vmem:[#allocation13_spill] sm:$0xff] }
 0x40a   :  { %v5351_v8 = vmax.f32 %v5335_v50, 0.0  ;;  %v5186_v28 = vld [vmem:[#allocation3 + $0x130] ss:$2 sm:$0xff]  ;;  %v5250_v46 = vld [vmem:[#allocation3 + $0x131] ss:$2 sm:$0xff]  ;;  %5124 = vst.msk [vmem:[#allocation3 + $0x140] sm:$0xff] %vm5083_vm4, %v10374_v33  ;;  %v10376_v42 = vadd.f32 %v4927_v56, %v12163_v15 }
 0x40b   :  { %v5294_v21 = vmax.f32 %v5186_v28, %v5250_v46  ;;  %v5184_v4 = vld [vmem:[#allocation3 + $0x120] ss:$2 sm:$0xff]  ;;  %v5248_v13 = vld [vmem:[#allocation3 + $0x121] ss:$2 sm:$0xff]  ;;  %5127 = vst.msk [vmem:[#allocation3 + $0x158] sm:$0xff] %vm5083_vm4, %v10375_v55 }
 0x40c   :  { %5412 = vst.msk [vmem:[#allocation4 + $0xb1] sm:$0xff] %vm5083_vm4, %v5351_v8  ;;  %v5293_v60 = vmax.f32 %v5184_v4, %v5248_v13  ;;  %5125 = vst.msk [vmem:[#allocation3 + $0x148] sm:$0xff] %vm5083_vm4, %v10376_v42  ;;  %v13141_v42 = vld [vmem:[#allocation14_spill] sm:$0xff] }
 0x40e   :  { %v5316_v29 = vmax.f32 %v5293_v60, %v5294_v21  ;;  %v10017_v9 = vpop.f32.mrb[44].mxu0 }
 0x40f   :  { %v10377_v12 = vadd.f32 %v10017_v9, %v12166_v7  ;;  %v4940_v23 = vpop.f32.mrb[45].mxu0 }
 0x410   :  { %v5336_v41 = vadd.f32 %v12384_v43, %v5316_v29  ;;  %v10378_v25 = vadd.f32 %v4940_v23, %v12169_v17  ;;  %v10018_v15 = vpop.f32.mrb[46].mxu0 }
 0x411   :  { %5130 = vst.msk [vmem:[#allocation3 + $0x170] sm:$0xff] %vm5083_vm4, %v10377_v12  ;;  %v10379_v10 = vadd.f32 %v10018_v15, %v12171_v45  ;;  %v4943_v1 = vpop.f32.mrb[47].mxu0 }
 0x412   :  { %v5352_v54 = vmax.f32 %v5336_v41, 0.0  ;;  %v5190_v57 = vld [vmem:[#allocation3 + $0x150] ss:$2 sm:$0xff]  ;;  %v5254_v63 = vld [vmem:[#allocation3 + $0x151] ss:$2 sm:$0xff]  ;;  %5128 = vst.msk [vmem:[#allocation3 + $0x160] sm:$0xff] %vm5083_vm4, %v10378_v25  ;;  %v10380_v18 = vadd.f32 %v4943_v1, %v12173_v58 }
 0x413   :  { %v5296_v7 = vmax.f32 %v5190_v57, %v5254_v63  ;;  %v5188_v14 = vld [vmem:[#allocation3 + $0x140] ss:$2 sm:$0xff]  ;;  %v5252_v31 = vld [vmem:[#allocation3 + $0x141] ss:$2 sm:$0xff]  ;;  %5131 = vst.msk [vmem:[#allocation3 + $0x178] sm:$0xff] %vm5083_vm4, %v10379_v10  ;;  %v12546_v17 = vld [vmem:[#allocation4 + $0xb1] sm:$0xff] }
 0x414   :  { %5413 = vst.msk [vmem:[#allocation4 + $0xc1] sm:$0xff] %vm5083_vm4, %v5352_v54  ;;  %v5295_v6 = vmax.f32 %v5188_v14, %v5252_v31  ;;  %5129 = vst.msk [vmem:[#allocation3 + $0x168] sm:$0xff] %vm5083_vm4, %v10380_v18  ;;  %v5464_v45 = vpack.c.bf16 %v12546_v17, %v5452_v34  ;;  %v12564_v12 = vld [vmem:[#allocation4 + $0xb2] sm:$0xff]  ;;  %v13142_v1 = vld [vmem:[#allocation15_spill] sm:$0xff] }
 0x415   :  { %v13143_v63 = vld [vmem:[#allocation16_spill] sm:$0xff]  ;;  %v13144_v14 = vld [vmem:[#allocation17_spill] sm:$0xff] }
 0x416   :  { %v5317_v37 = vmax.f32 %v5295_v6, %v5296_v7  ;;  %v10021_v30 = vpop.f32.mrb[48].mxu0  ;;  %10045 = vmatprep.mubr.msk.bf16.mxu1 %vm5083_vm4, %v5464_v45 }
 0x417   :  { %v10381_v58 = vadd.f32 %v10021_v30, %v13138_v61  ;;  %v4956_v36 = vpop.f32.mrb[49].mxu0  ;;  %v13145_v61 = vld [vmem:[#allocation18_spill] sm:$0xff] }
 0x418   :  { %v5337_v62 = vadd.f32 %v12384_v43, %v5317_v37  ;;  %v10382_v50 = vadd.f32 %v4956_v36, %v13139_v24  ;;  %v10022_v33 = vpop.f32.mrb[50].mxu0 }
 0x419   :  { %5134 = vst.msk [vmem:[#allocation3 + $0x190] sm:$0xff] %vm5083_vm4, %v10381_v58  ;;  %v10383_v55 = vadd.f32 %v10022_v33, %v13140_v5  ;;  %v4959_v56 = vpop.f32.mrb[51].mxu0 }
 0x41a   :  { %v5353_v8 = vmax.f32 %v5337_v62, 0.0  ;;  %v5194_v28 = vld [vmem:[#allocation3 + $0x170] ss:$2 sm:$0xff]  ;;  %v5258_v46 = vld [vmem:[#allocation3 + $0x171] ss:$2 sm:$0xff]  ;;  %5132 = vst.msk [vmem:[#allocation3 + $0x180] sm:$0xff] %vm5083_vm4, %v10382_v50  ;;  %v10384_v21 = vadd.f32 %v4959_v56, %v13141_v42 }
 0x41b   :  { %v5298_v4 = vmax.f32 %v5194_v28, %v5258_v46  ;;  %v5192_v13 = vld [vmem:[#allocation3 + $0x160] ss:$2 sm:$0xff]  ;;  %v5256_v60 = vld [vmem:[#allocation3 + $0x161] ss:$2 sm:$0xff]  ;;  %5135 = vst.msk [vmem:[#allocation3 + $0x198] sm:$0xff] %vm5083_vm4, %v10383_v55 }
 0x41c   :  { %v12560_v29 = vld [vmem:[#allocation4 + $0xc1] sm:$0xff]  ;;  %5414 = vst.msk [vmem:[#allocation4 + $0xd1] sm:$0xff] %vm5083_vm4, %v5353_v8  ;;  %v5297_v9 = vmax.f32 %v5192_v13, %v5256_v60  ;;  %5133 = vst.msk [vmem:[#allocation3 + $0x188] sm:$0xff] %vm5083_vm4, %v10384_v21  ;;  %v13147_v21 = vld [vmem:[#allocation20_spill] sm:$0xff] }
 0x41d   :  { %v12566_v23 = vld [vmem:[#allocation4 + $0xc2] sm:$0xff]  ;;  %v13148_v60 = vld [vmem:[#allocation21_spill] sm:$0xff] }
 0x41e   :  { %v5318_v15 = vmax.f32 %v5297_v9, %v5298_v4  ;;  %v10025_v10 = vpop.f32.mrb[52].mxu0  ;;  %v13146_v8 = vld [vmem:[#allocation19_spill] sm:$0xff] }
 0x41f   :  { %v10385_v34 = vadd.f32 %v10025_v10, %v13142_v1  ;;  %v4972_v54 = vpop.f32.mrb[53].mxu0 }
 0x420   :  { %v5338_v57 = vadd.f32 %v12384_v43, %v5318_v15  ;;  %v10386_v18 = vadd.f32 %v4972_v54, %v13143_v63  ;;  %v10026_v7 = vpop.f32.mrb[54].mxu0  ;;  %v13149_v54 = vld [vmem:[#allocation22_spill] sm:$0xff] }
 0x421   :  { %5138 = vst.msk [vmem:[#allocation3 + $0x1b0] sm:$0xff] %vm5083_vm4, %v10385_v34  ;;  %v10387_v31 = vadd.f32 %v10026_v7, %v13144_v14  ;;  %v4975_v6 = vpop.f32.mrb[55].mxu0 }
 0x422   :  { %v5354_v45 = vmax.f32 %v5338_v57, 0.0  ;;  %v5198_v37 = vld [vmem:[#allocation3 + $0x190] ss:$2 sm:$0xff]  ;;  %v5262_v30 = vld [vmem:[#allocation3 + $0x191] ss:$2 sm:$0xff]  ;;  %5136 = vst.msk [vmem:[#allocation3 + $0x1a0] sm:$0xff] %vm5083_vm4, %v10386_v18  ;;  %v10388_v58 = vadd.f32 %v4975_v6, %v13145_v61 }
 0x423   :  { %v5300_v36 = vmax.f32 %v5198_v37, %v5262_v30  ;;  %v5196_v62 = vld [vmem:[#allocation3 + $0x180] ss:$2 sm:$0xff]  ;;  %v5260_v24 = vld [vmem:[#allocation3 + $0x181] ss:$2 sm:$0xff]  ;;  %5139 = vst.msk [vmem:[#allocation3 + $0x1b8] sm:$0xff] %vm5083_vm4, %v10387_v31  ;;  %v12580_v50 = vld [vmem:[#allocation4 + $0xd1] sm:$0xff] }
 0x424   :  { %5415 = vst.msk [vmem:[#allocation4 + $0xe1] sm:$0xff] %vm5083_vm4, %v5354_v45  ;;  %v5299_v33 = vmax.f32 %v5196_v62, %v5260_v24  ;;  %5137 = vst.msk [vmem:[#allocation3 + $0x1a8] sm:$0xff] %vm5083_vm4, %v10388_v58  ;;  %v12586_v5 = vpack.c.bf16 %v12580_v50, %v12560_v29  ;;  %v12602_v6 = vld [vmem:[#allocation4 + $0xd2] sm:$0xff] }
 0x425   :  { %v12709_v41 = vpack.c.bf16 %v12602_v6, %v12566_v23 }
 0x426   :  { %v5319_v55 = vmax.f32 %v5299_v33, %v5300_v36  ;;  %v10029_v56 = vpop.f32.mrb[56].mxu0  ;;  %10046 = vmatmul.mubr.msk.bf16.gmra.mrb[72].mxu1 %vm5083_vm4, %v12586_v5  ;;  %v13150_v36 = vld [vmem:[#allocation23_spill] sm:$0xff] }
 0x427   :  { %v10389_v28 = vadd.f32 %v10029_v56, %v13146_v8  ;;  %v4988_v46 = vpop.f32.mrb[57].mxu0  ;;  %13154 = vst [vmem:[#allocation11_spill] sm:$0xff] %v12709_v41 }
 0x428   :  { %v5339_v42 = vadd.f32 %v12384_v43, %v5319_v55  ;;  %v10390_v4 = vadd.f32 %v4988_v46, %v13147_v21  ;;  %v10030_v13 = vpop.f32.mrb[58].mxu0  ;;  %v13151_v55 = vld [vmem:[#allocation24_spill] sm:$0xff] }
 0x429   :  { %5142 = vst.msk [vmem:[#allocation3 + $0x1d0] sm:$0xff] %vm5083_vm4, %v10389_v28  ;;  %v10391_v9 = vadd.f32 %v10030_v13, %v13148_v60  ;;  %v4991_v15 = vpop.f32.mrb[59].mxu0  ;;  %v13152_v28 = vld [vmem:[#allocation25_spill] sm:$0xff]  ;;  %v13153_v60 = vld [vmem:[#allocation26_spill] sm:$0xff] }
 0x42a   :  { %v5355_v10 = vmax.f32 %v5339_v42, 0.0  ;;  %v5202_v1 = vld [vmem:[#allocation3 + $0x1b0] ss:$2 sm:$0xff]  ;;  %v5266_v34 = vld [vmem:[#allocation3 + $0x1b1] ss:$2 sm:$0xff]  ;;  %5140 = vst.msk [vmem:[#allocation3 + $0x1c0] sm:$0xff] %vm5083_vm4, %v10390_v4  ;;  %v10392_v57 = vadd.f32 %v4991_v15, %v13149_v54 }
 0x42b   :  { %v5302_v63 = vmax.f32 %v5202_v1, %v5266_v34  ;;  %v5200_v18 = vld [vmem:[#allocation3 + $0x1a0] ss:$2 sm:$0xff]  ;;  %v5264_v7 = vld [vmem:[#allocation3 + $0x1a1] ss:$2 sm:$0xff]  ;;  %5143 = vst.msk [vmem:[#allocation3 + $0x1d8] sm:$0xff] %vm5083_vm4, %v10391_v9 }
 0x42c   :  { %v12598_v14 = vld [vmem:[#allocation4 + $0xe1] sm:$0xff]  ;;  %5416 = vst.msk [vmem:[#allocation4 + $0xf1] sm:$0xff] %vm5083_vm4, %v5355_v10  ;;  %v5301_v31 = vmax.f32 %v5200_v18, %v5264_v7  ;;  %5141 = vst.msk [vmem:[#allocation3 + $0x1c8] sm:$0xff] %vm5083_vm4, %v10392_v57 }
 0x42d   :  { %v12604_v45 = vld [vmem:[#allocation4 + $0xe2] sm:$0xff] }
 0x42e   :  { %v5320_v61 = vmax.f32 %v5301_v31, %v5302_v63  ;;  %v10033_v58 = vpop.f32.mrb[60].mxu0 }
 0x42f   :  { %v10393_v62 = vadd.f32 %v10033_v58, %v13150_v36  ;;  %v5004_v24 = vpop.f32.mrb[61].mxu0 }
 0x430   :  { %v5340_v33 = vadd.f32 %v12384_v43, %v5320_v61  ;;  %v10394_v56 = vadd.f32 %v5004_v24, %v13151_v55  ;;  %v10034_v8 = vpop.f32.mrb[62].mxu0 }
 0x431   :  { %5146 = vst.msk [vmem:[#allocation3 + $0x1f0] sm:$0xff] %vm5083_vm4, %v10393_v62  ;;  %v10395_v46 = vadd.f32 %v10034_v8, %v13152_v28  ;;  %v5007_v42 = vpop.f32.mrb[63].mxu0  ;;  %v5722_v28 = vld [vmem:[#allocation4 + $0x2] sm:$0xff] }
 0x432   :  { %v5356_v21 = vmax.f32 %v5340_v33, 0.0  ;;  %v5206_v4 = vld [vmem:[#allocation3 + $0x1d0] ss:$2 sm:$0xff]  ;;  %v5270_v13 = vld [vmem:[#allocation3 + $0x1d1] ss:$2 sm:$0xff]  ;;  %5144 = vst.msk [vmem:[#allocation3 + $0x1e0] sm:$0xff] %vm5083_vm4, %v10394_v56  ;;  %v10396_v9 = vadd.f32 %v5007_v42, %v13153_v60 }
 0x433   :  { %v5304_v15 = vmax.f32 %v5206_v4, %v5270_v13  ;;  %v5204_v10 = vld [vmem:[#allocation3 + $0x1c0] ss:$2 sm:$0xff]  ;;  %v5268_v1 = vld [vmem:[#allocation3 + $0x1c1] ss:$2 sm:$0xff]  ;;  %5147 = vst.msk [vmem:[#allocation3 + $0x1f8] sm:$0xff] %vm5083_vm4, %v10395_v46  ;;  %v12618_v34 = vld [vmem:[#allocation4 + $0xf1] sm:$0xff] }
 0x434   :  { %5417 = vst.msk [vmem:[#allocation4 + $0x101] sm:$0xff] %vm5083_vm4, %v5356_v21  ;;  %v5303_v54 = vmax.f32 %v5204_v10, %v5268_v1  ;;  %5145 = vst.msk [vmem:[#allocation3 + $0x1e8] sm:$0xff] %vm5083_vm4, %v10396_v9  ;;  %v12624_v57 = vpack.c.bf16 %v12618_v34, %v12598_v14  ;;  %v12632_v55 = vld [vmem:[#allocation4 + $0xf2] sm:$0xff]  ;;  %v5420_v4 = vld [vmem:[#allocation4] sm:$0xff] }
 0x435   :  { %v12641_v13 = vld [vmem:[#allocation4 + $0x10] sm:$0xff]  ;;  %v5422_v1 = vld [vmem:[#allocation4 + $0x20] sm:$0xff] }
 0x436   :  { %v5321_v63 = vmax.f32 %v5303_v54, %v5304_v15  ;;  %10049 = vmatprep.mubr.msk.bf16.mxu1 %vm5083_vm4, %v12624_v57  ;;  %v5436_v15 = vpack.c.bf16 %v12641_v13, %v5420_v4  ;;  %v5425_v10 = vld [vmem:[#allocation4 + $0x50] sm:$0xff]  ;;  %v5432_v4 = vld [vmem:[#allocation4 + $0xe0] sm:$0xff] }
 0x438   :  { %v5341_v18 = vadd.f32 %v12384_v43, %v5321_v63  ;;  %v5424_v63 = vld [vmem:[#allocation4 + $0x40] sm:$0xff] }
 0x43a   :  { %v5357_v7 = vmax.f32 %v5341_v18, 0.0  ;;  %v5210_v31 = vld [vmem:[#allocation3 + $0x1f0] ss:$2 sm:$0xff]  ;;  %v5274_v61 = vld [vmem:[#allocation3 + $0x1f1] ss:$2 sm:$0xff] }
 0x43b   :  { %v5306_v58 = vmax.f32 %v5210_v31, %v5274_v61  ;;  %v5208_v36 = vld [vmem:[#allocation3 + $0x1e0] ss:$2 sm:$0xff]  ;;  %v5272_v62 = vld [vmem:[#allocation3 + $0x1e1] ss:$2 sm:$0xff]  ;;  %v11053_v18 = vld [vmem:[%s13112_s2 + $0x18] sm:$0xff]  }
 0x43c   :  { %v12629_v24 = vld [vmem:[#allocation4 + $0x101] sm:$0xff]  ;;  %5418 = vst.msk [vmem:[#allocation4 + $0x111] sm:$0xff] %vm5083_vm4, %v5357_v7  ;;  %v5305_v33 = vmax.f32 %v5208_v36, %v5272_v62  ;;  %v12659_v7 = vpack.c.bf16 %v5425_v10, %v5424_v63  ;;  %v5427_v31 = vld [vmem:[#allocation4 + $0x70] sm:$0xff] }
 0x43d   :  { %v12634_v56 = vld [vmem:[#allocation4 + $0x102] sm:$0xff] }
 0x43e   :  { %v5322_v46 = vmax.f32 %v5305_v33, %v5306_v58  ;;  %v5428_v61 = vld [vmem:[#allocation4 + $0xa0] sm:$0xff]  ;;  %v5429_v58 = vld [vmem:[#allocation4 + $0xb0] sm:$0xff] }
 0x43f   :  { %v5426_v36 = vld [vmem:[#allocation4 + $0x60] sm:$0xff]  ;;  %v5440_v33 = vpack.c.bf16 %v5429_v58, %v5428_v61 }
 0x440   :  { %v5342_v42 = vadd.f32 %v12384_v43, %v5322_v46  ;;  %v5423_v43 = vld [vmem:[#allocation4 + $0x30] sm:$0xff]  ;;  %v12666_v62 = vpack.c.bf16 %v5427_v31, %v5426_v36  ;;  %v5434_v30 = vld [vmem:[#allocation4 + $0x100] sm:$0xff]  ;;  %v5907_v49 = vpack.c.bf16 %v5426_v36, %v5425_v10 }
 0x441   :  { %v12654_v54 = vpack.c.bf16 %v5423_v43, %v5422_v1  ;;  %v5431_v46 = vld [vmem:[#allocation4 + $0xd0] sm:$0xff]  ;;  %v5906_v39 = vpack.c.bf16 %v5424_v63, %v5423_v43 }
 0x442   :  { %v5358_v21 = vmax.f32 %v5342_v42, 0.0  ;;  %v5433_v42 = vld [vmem:[#allocation4 + $0xf0] sm:$0xff] }
 0x443   :  { %v12643_v60 = vld [vmem:[#allocation4 + $0x111] sm:$0xff]  ;;  %v5911_v43 = vpack.c.bf16 %v5434_v30, %v5433_v42 }
 0x444   :  { %5419 = vst.msk [vmem:[#allocation4 + $0x121] sm:$0xff] %vm5083_vm4, %v5358_v21  ;;  %v12648_v9 = vpack.c.bf16 %v12643_v60, %v12629_v24  ;;  %v5430_v21 = vld [vmem:[#allocation4 + $0xc0] sm:$0xff]  ;;  %v5435_v61 = vld [vmem:[#allocation4 + $0x110] sm:$0xff] }
 0x445   :  { %v12679_v25 = vpack.c.bf16 %v5435_v61, %v5434_v30  ;;  %v6063_v30 = vld [vmem:[#allocation4 + $0x81] sm:$0xff] }
 0x446   :  { %10050 = vmatmul.mubr.msk.bf16.gmra.mrb[76].mxu1 %vm5083_vm4, %v12648_v9 }
 0x447   :  { %10055 = vmatprep.mubr.msk.bf16.mxu1 %vm5083_vm4, %v5436_v15  ;;  %v12673_v15 = vpack.c.bf16 %v5433_v42, %v5432_v4 }
 0x44b   :  { %v5904_v10 = vld [vmem:[#allocation4 + $0x120] sm:$0xff] }
 0x44c   :  { %v5912_v63 = vpack.c.bf16 %v5904_v10, %v5435_v61 }
 0x44e   :  { %10056 = vmatmul.mubr.msk.bf16.vlgmr.msra.gmra.mrb[64].mxu1 %vm5083_vm4, %v12654_v54 }
 0x44f   :  { %10072 = vmatpush3.bf16.msra.mxu1 %v12447_v11  ;;  %10059 = vmatprep.mubr.msk.bf16.mxu1 %vm5083_vm4, %v12659_v7  ;;  %v12671_v11 = vpack.c.bf16 %v5431_v46, %v5430_v21 }
 0x450   :  { %10089 = vmatprep.subr.bf16.mxu1 %v11053_v18 }
 0x456   :  { %10060 = vmatmul.mubr.msk.bf16.gmra.mrb[68].mxu1 %vm5083_vm4, %v12666_v62 }
 0x457   :  { %10063 = vmatprep.mubr.msk.bf16.mxu1 %vm5083_vm4, %v5440_v33  ;;  %v5738_v33 = vpack.c.bf16 %v12422_v51, %v5722_v28  ;;  %v5729_v28 = vld [vmem:[#allocation4 + $0x72] sm:$0xff] }
 0x458   :  { %v12701_v8 = vpack.c.bf16 %v5729_v28, %v12504_v38 }
 0x45e   :  { %10064 = vmatmul.mubr.msk.bf16.gmra.mrb[72].mxu1 %vm5083_vm4, %v12671_v11 }
 0x45f   :  { %10067 = vmatprep.mubr.msk.bf16.mxu1 %vm5083_vm4, %v12673_v15 }
 0x466   :  { %10068 = vmatmul.mubr.msk.bf16.gmra.mrb[76].mxu1 %vm5083_vm4, %v12679_v25 }
 0x467   :  { %10073 = vmatprep.mubr.msk.bf16.mxu1 %vm5083_vm4, %v5738_v33  ;;  %v5730_v33 = vld [vmem:[#allocation4 + $0xa2] sm:$0xff] }
 0x468   :  { %v5742_v37 = vpack.c.bf16 %v12564_v12, %v5730_v33  ;;  %v5737_v33 = vld [vmem:[#allocation4 + $0x112] sm:$0xff] }
 0x469   :  { %v12720_v20 = vpack.c.bf16 %v5737_v33, %v12634_v56 }
 0x46e   :  { %10074 = vmatmul.mubr.msk.bf16.vlgmr.msra.gmra.mrb[64].mxu1 %vm5083_vm4, %v12687_v35 }
 0x46f   :  { %10090 = vmatpush3.bf16.msra.mxu1 %v11053_v18  ;;  %10077 = vmatprep.mubr.msk.bf16.mxu1 %vm5083_vm4, %v12694_v53  ;;  %v12713_v18 = vpack.c.bf16 %v12632_v55, %v12604_v45 }
 0x470   :  { %10107 = vmatprep.subr.bf16.mxu1 %v11054_v59 }
 0x471   :  { %13155 = vst [vmem:[#allocation12_spill] sm:$0xff] %v12713_v18 }
 0x476   :  { %10078 = vmatmul.mubr.msk.bf16.gmra.mrb[68].mxu1 %vm5083_vm4, %v12701_v8 }
 0x477   :  { %10081 = vmatprep.mubr.msk.bf16.mxu1 %vm5083_vm4, %v5742_v37  ;;  %v5905_v37 = vpack.c.bf16 %v5422_v1, %v12641_v13  ;;  %v5909_v13 = vpack.c.bf16 %v5430_v21, %v5429_v58  ;;  %v5910_v1 = vpack.c.bf16 %v5432_v4, %v5431_v46 }
 0x47e   :  { %10082 = vmatmul.mubr.msk.bf16.gmra.mrb[72].mxu1 %vm5083_vm4, %v12709_v41 }
 0x47f   :  { %10085 = vmatprep.mubr.msk.bf16.mxu1 %vm5083_vm4, %v12713_v18  ;;  %v5896_v18 = vld [vmem:[#allocation4 + $0x80] sm:$0xff] }
 0x480   :  { %v5908_v41 = vpack.c.bf16 %v5896_v18, %v5427_v31 }
 0x486   :  { %10086 = vmatmul.mubr.msk.bf16.gmra.mrb[76].mxu1 %vm5083_vm4, %v12720_v20 }
 0x487   :  { %10091 = vmatprep.mubr.msk.bf16.mxu1 %vm5083_vm4, %v5905_v37  ;;  %v12864_v37 = vld [vmem:[%s13114_s4 + $0x1] ss:$0 sm:$0xff] }
 0x48e   :  { %10092 = vmatmul.mubr.msk.bf16.vlgmr.msra.gmra.mrb[64].mxu1 %vm5083_vm4, %v5906_v39  ;;  %v11056_v39 = vld [vmem:[%s13112_s2 + $0x30] sm:$0xff]  }
 0x48f   :  { %10108 = vmatpush3.bf16.msra.mxu1 %v11054_v59  ;;  %10095 = vmatprep.mubr.msk.bf16.mxu1 %vm5083_vm4, %v5907_v49  ;;  %v13156_v49 = vpack.c.bf16 %v12418_v44, %v12404_v52  ;;  %v13157_v59 = vpack.c.bf16 %v12460_v48, %v12438_v40  ;;  %v6075_v52 = vpack.c.bf16 %v6063_v30, %v12518_v19  ;;  %v6071_v48 = vld [vmem:[#allocation4 + $0x121] sm:$0xff]  ;;  %v11057_v19 = vld [vmem:[%s13112_s2 + $0x38] sm:$0xff]  }
 0x490   :  { %10125 = vmatprep.subr.bf16.mxu1 %v11055_v0  ;;  %v13159_v44 = vpack.c.bf16 %v12560_v29, %v12546_v17  ;;  %v13160_v40 = vpack.c.bf16 %v12598_v14, %v12580_v50  ;;  %v13163_v17 = vpack.c.bf16 %v12466_v3, %v12464_v27  ;;  %v13164_v29 = vpack.c.bf16 %v12504_v38, %v12502_v32  ;;  %v6230_v50 = vld [vmem:[#allocation4 + $0x82] sm:$0xff] }
 0x491   :  { %v13166_v27 = vpack.c.bf16 %v12604_v45, %v12602_v6  ;;  %v13167_v3 = vpack.c.bf16 %v12634_v56, %v12632_v55  ;;  %v6238_v32 = vld [vmem:[#allocation4 + $0x122] sm:$0xff]  ;;  %v6406_v6 = vld [vmem:[#allocation4 + $0x130] sm:$0xff] }
 0x492   :  { %v6246_v38 = vpack.c.bf16 %v6238_v32, %v5737_v33  ;;  %v6559_v45 = vld [vmem:[#allocation4 + $0x31] sm:$0xff] }
 0x493   :  { %v6565_v56 = vld [vmem:[#allocation4 + $0x91] sm:$0xff] }
 0x496   :  { %10096 = vmatmul.mubr.msk.bf16.gmra.mrb[68].mxu1 %vm5083_vm4, %v5908_v41  ;;  %v13158_v41 = vpack.c.bf16 %v12498_v16, %v12480_v2  ;;  %v6079_v2 = vpack.c.bf16 %v6071_v48, %v12643_v60  ;;  %v13162_v16 = vpack.c.bf16 %v12424_v26, %v12422_v51  ;;  %v6242_v51 = vpack.c.bf16 %v6230_v50, %v5729_v28 }
 0x497   :  { %10099 = vmatprep.mubr.msk.bf16.mxu1 %vm5083_vm4, %v5909_v13  ;;  %v13165_v26 = vpack.c.bf16 %v12566_v23, %v12564_v12  ;;  %v11058_v12 = vld [vmem:[%s13112_s2 + $0x40] sm:$0xff]   ;;  %v6398_v23 = vld [vmem:[#allocation4 + $0x90] sm:$0xff]  ;;  %v6577_v60 = vpack.c.bf16 %v6565_v56, %v6063_v30 }
 0x498   :  { %v6410_v14 = vpack.c.bf16 %v6398_v23, %v5896_v18 }
 0x49e   :  { %10100 = vmatmul.mubr.msk.bf16.gmra.mrb[72].mxu1 %vm5083_vm4, %v5910_v1 }
 0x49f   :  { %10103 = vmatprep.mubr.msk.bf16.mxu1 %vm5083_vm4, %v5911_v43 }
 0x4a6   :  { %10104 = vmatmul.mubr.msk.bf16.gmra.mrb[76].mxu1 %vm5083_vm4, %v5912_v63 }
 0x4a7   :  { %10109 = vmatprep.mubr.msk.bf16.mxu1 %vm5083_vm4, %v13156_v49 }
 0x4ae   :  { %10110 = vmatmul.mubr.msk.bf16.vlgmr.msra.gmra.mrb[64].mxu1 %vm5083_vm4, %v13157_v59 }
 0x4af   :  { %10126 = vmatpush3.bf16.msra.mxu1 %v11055_v0  ;;  %10113 = vmatprep.mubr.msk.bf16.mxu1 %vm5083_vm4, %v13158_v41  ;;  %v13161_v0 = vpack.c.bf16 %v12629_v24, %v12618_v34  ;;  %v6414_v34 = vpack.c.bf16 %v6406_v6, %v5904_v10  ;;  %v6558_v24 = vld [vmem:[#allocation4 + $0x21] sm:$0xff] }
 0x4b0   :  { %10143 = vmatprep.subr.bf16.mxu1 %v11056_v39  ;;  %v6574_v55 = vpack.c.bf16 %v6559_v45, %v6558_v24 }
 0x4b6   :  { %10114 = vmatmul.mubr.msk.bf16.gmra.mrb[68].mxu1 %vm5083_vm4, %v6075_v52 }
 0x4b7   :  { %10117 = vmatprep.mubr.msk.bf16.mxu1 %vm5083_vm4, %v13159_v44 }
 0x4be   :  { %10118 = vmatmul.mubr.msk.bf16.gmra.mrb[72].mxu1 %vm5083_vm4, %v13160_v40 }
 0x4bf   :  { %10121 = vmatprep.mubr.msk.bf16.mxu1 %vm5083_vm4, %v13161_v0 }
 0x4c6   :  { %10122 = vmatmul.mubr.msk.bf16.gmra.mrb[76].mxu1 %vm5083_vm4, %v6079_v2 }
 0x4c7   :  { %10127 = vmatprep.mubr.msk.bf16.mxu1 %vm5083_vm4, %v13162_v16 }
 0x4ce   :  { %10128 = vmatmul.mubr.msk.bf16.vlgmr.msra.gmra.mrb[64].mxu1 %vm5083_vm4, %v13163_v17 }
 0x4cf   :  { %10144 = vmatpush3.bf16.msra.mxu1 %v11056_v39  ;;  %10131 = vmatprep.mubr.msk.bf16.mxu1 %vm5083_vm4, %v13164_v29 }
 0x4d0   :  { %10161 = vmatprep.subr.bf16.mxu1 %v11057_v19 }
 0x4d6   :  { %10132 = vmatmul.mubr.msk.bf16.gmra.mrb[68].mxu1 %vm5083_vm4, %v6242_v51 }
 0x4d7   :  { %10135 = vmatprep.mubr.msk.bf16.mxu1 %vm5083_vm4, %v13165_v26 }
 0x4de   :  { %10136 = vmatmul.mubr.msk.bf16.gmra.mrb[72].mxu1 %vm5083_vm4, %v13166_v27 }
 0x4df   :  { %10139 = vmatprep.mubr.msk.bf16.mxu1 %vm5083_vm4, %v13167_v3 }
 0x4e6   :  { %10140 = vmatmul.mubr.msk.bf16.gmra.mrb[76].mxu1 %vm5083_vm4, %v6246_v38 }
 0x4e7   :  { %10145 = vmatprep.mubr.msk.bf16.mxu1 %vm5083_vm4, %v12654_v54 }
 0x4ee   :  { %10146 = vmatmul.mubr.msk.bf16.vlgmr.msra.gmra.mrb[64].mxu1 %vm5083_vm4, %v12659_v7 }
 0x4ef   :  { %10162 = vmatpush3.bf16.msra.mxu1 %v11057_v19  ;;  %10149 = vmatprep.mubr.msk.bf16.mxu1 %vm5083_vm4, %v12666_v62 }
 0x4f0   :  { %10179 = vmatprep.subr.bf16.mxu1 %v11058_v12 }
 0x4f6   :  { %10150 = vmatmul.mubr.msk.bf16.gmra.mrb[68].mxu1 %vm5083_vm4, %v6410_v14  ;;  %v7064_v14 = vld [vmem:[#allocation6 + $0x1] sm:$0xff] }
 0x4f7   :  { %10153 = vmatprep.mubr.msk.bf16.mxu1 %vm5083_vm4, %v12671_v11 }
 0x4fe   :  { %10154 = vmatmul.mubr.msk.bf16.gmra.mrb[72].mxu1 %vm5083_vm4, %v12673_v15 }
 0x4ff   :  { %10157 = vmatprep.mubr.msk.bf16.mxu1 %vm5083_vm4, %v12679_v25  ;;  %v6573_v25 = vld [vmem:[#allocation4 + $0x131] sm:$0xff] }
 0x500   :  { %v6581_v54 = vpack.c.bf16 %v6573_v25, %v6071_v48 }
 0x506   :  { %10158 = vmatmul.mubr.msk.bf16.gmra.mrb[76].mxu1 %vm5083_vm4, %v6414_v34 }
 0x507   :  { %10163 = vmatprep.mubr.msk.bf16.mxu1 %vm5083_vm4, %v6574_v55 }
 0x50e   :  { %10164 = vmatmul.mubr.msk.bf16.vlgmr.msra.gmra.mrb[64].mxu1 %vm5083_vm4, %v12486_v22  ;;  %v6732_v22 = vld [vmem:[#allocation4 + $0x92] sm:$0xff] }
 0x50f   :  { %10180 = vmatpush3.bf16.msra.mxu1 %v11058_v12  ;;  %10167 = vmatprep.mubr.msk.bf16.mxu1 %vm5083_vm4, %v12524_v47  ;;  %v6744_v47 = vpack.c.bf16 %v6732_v22, %v6230_v50 }
 0x516   :  { %10168 = vmatmul.mubr.msk.bf16.gmra.mrb[68].mxu1 %vm5083_vm4, %v6577_v60 }
 0x517   :  { %10171 = vmatprep.mubr.msk.bf16.mxu1 %vm5083_vm4, %v12586_v5  ;;  %v13168_v5 = vld [vmem:[#allocation11_spill] sm:$0xff] }
 0x51e   :  { %10172 = vmatmul.mubr.msk.bf16.gmra.mrb[72].mxu1 %vm5083_vm4, %v12624_v57  ;;  %v13169_v57 = vld [vmem:[#allocation12_spill] sm:$0xff] }
 0x51f   :  { %10175 = vmatprep.mubr.msk.bf16.mxu1 %vm5083_vm4, %v12648_v9 }
 0x526   :  { %10176 = vmatmul.mubr.msk.bf16.gmra.mrb[76].mxu1 %vm5083_vm4, %v6581_v54 }
 0x527   :  { %10181 = vmatprep.mubr.msk.bf16.mxu1 %vm5083_vm4, %v12687_v35  ;;  %v6740_v35 = vld [vmem:[#allocation4 + $0x132] sm:$0xff] }
 0x528   :  { %v6748_v9 = vpack.c.bf16 %v6740_v35, %v6238_v32 }
 0x52e   :  { %10182 = vmatmul.mubr.msk.bf16.vlgmr.msra.gmra.mrb[64].mxu1 %vm5083_vm4, %v12694_v53  ;;  %v13170_v53 = vmov 0.0  }
 0x52f   :  { %10185 = vmatprep.mubr.msk.bf16.mxu1 %vm5083_vm4, %v12701_v8  ;;  %7035 = vst.msk [vmem:[#allocation6 + $0x15] sm:$0x1f] %vm7034_vm7, %v13170_v53  ;;  %7036 = vst.msk [vmem:[#allocation6 + $0x25] sm:$0x1f] %vm7034_vm7, %v13170_v53  ;;  %v12854_v8 = vld [vmem:[%s13112_s2 + $0x48] sm:$0xff]  }
 0x530   :  { %7037 = vst.msk [vmem:[#allocation6 + $0x35] sm:$0x1f] %vm7034_vm7, %v13170_v53  ;;  %7038 = vst.msk [vmem:[#allocation6 + $0x45] sm:$0x1f] %vm7034_vm7, %v13170_v53 }
 0x531   :  { %7039 = vst.msk [vmem:[#allocation6 + $0x75] sm:$0x1f] %vm7034_vm7, %v13170_v53  ;;  %7040 = vst.msk [vmem:[#allocation6 + $0x85] sm:$0x1f] %vm7034_vm7, %v13170_v53 }
 0x532   :  { %7041 = vst.msk [vmem:[#allocation6 + $0x95] sm:$0x1f] %vm7034_vm7, %v13170_v53  ;;  %7042 = vst.msk [vmem:[#allocation6 + $0xa5] sm:$0x1f] %vm7034_vm7, %v13170_v53 }
 0x536   :  { %10186 = vmatmul.mubr.msk.bf16.gmra.mrb[68].mxu1 %vm5083_vm4, %v6744_v47 }
 0x537   :  { %10189 = vmatprep.mubr.msk.bf16.mxu1 %vm5083_vm4, %v13168_v5 }
 0x53e   :  { %10190 = vmatmul.mubr.msk.bf16.gmra.mrb[72].mxu1 %vm5083_vm4, %v13169_v57 }
 0x53f   :  { %10193 = vmatprep.mubr.msk.bf16.mxu1 %vm5083_vm4, %v12720_v20  ;;  %v11059_v20 = vld [vmem:[%s13112_s2 + $0x50] sm:$0xff]  }
 0x540   :  { %10197 = vmatprep.subr.bf16.mxu1 %v11059_v20 }
 0x541   :  { %10198 = vmatpush3.bf16.msra.mxu1 %v11059_v20 }
 0x542   :  { %10207 = vmatprep.subr.bf16.mxu1 %v12854_v8 }
 0x546   :  { %10194 = vmatmul.mubr.msk.bf16.gmra.mrb[76].mxu1 %vm5083_vm4, %v6748_v9 }
 0x601   :  { %v10183_v7 = vpop.f32.mrb[64].mxu1 }
 0x602   :  { %6894 = vst.msk [vmem:[#allocation5 + $0x10] sm:$0xff] %vm5083_vm4, %v10183_v7  ;;  %v6813_v31 = vpop.f32.mrb[65].mxu1 }
 0x603   :  { %6892 = vst.msk [vmem:[#allocation5] sm:$0xff] %vm5083_vm4, %v6813_v31  ;;  %v10184_v58 = vpop.f32.mrb[66].mxu1 }
 0x604   :  { %6895 = vst.msk [vmem:[#allocation5 + $0x18] sm:$0xff] %vm5083_vm4, %v10184_v58  ;;  %v6816_v36 = vpop.f32.mrb[67].mxu1 }
 0x605   :  { %6893 = vst.msk [vmem:[#allocation5 + $0x8] sm:$0xff] %vm5083_vm4, %v6816_v36 }
 0x609   :  { %v6912_v62 = vld [vmem:[#allocation5 + $0x10] ss:$2 sm:$0xf]  ;;  %v6944_v46 = vld [vmem:[#allocation5 + $0x11] ss:$2 sm:$0xf] }
 0x60a   :  { %v6908_v42 = vld [vmem:[#allocation5] ss:$2 sm:$0xf]  ;;  %v6940_v21 = vld [vmem:[#allocation5 + $0x1] ss:$2 sm:$0xf]  ;;  %v6973_v15 = vmax.f32 %v6912_v62, %v6944_v46 }
 0x60b   :  { %v6914_v11 = vld [vmem:[#allocation5 + $0x18] ss:$2 sm:$0xf]  ;;  %v6946_v4 = vld [vmem:[#allocation5 + $0x19] ss:$2 sm:$0xf]  ;;  %v6971_v33 = vmax.f32 %v6908_v42, %v6940_v21 }
 0x60c   :  { %v6974_v61 = vmax.f32 %v6914_v11, %v6946_v4  ;;  %v6910_v28 = vld [vmem:[#allocation5 + $0x8] ss:$2 sm:$0xf]  ;;  %v6942_v18 = vld [vmem:[#allocation5 + $0x9] ss:$2 sm:$0xf] }
 0x60d   :  { %v6972_v13 = vmax.f32 %v6910_v28, %v6942_v18  ;;  %v10187_v1 = vpop.f32.mrb[68].mxu1 }
 0x60e   :  { %v6988_v43 = vmax.f32 %v6973_v15, %v6974_v61  ;;  %6898 = vst.msk [vmem:[#allocation5 + $0x30] sm:$0xff] %vm5083_vm4, %v10187_v1  ;;  %v6829_v10 = vpop.f32.mrb[69].mxu1 }
 0x60f   :  { %v6987_v63 = vmax.f32 %v6971_v33, %v6972_v13  ;;  %6896 = vst.msk [vmem:[#allocation5 + $0x20] sm:$0xff] %vm5083_vm4, %v6829_v10  ;;  %v10188_v49 = vpop.f32.mrb[70].mxu1 }
 0x610   :  { %v7000_v39 = vadd.f32 %v12864_v37, %v6988_v43  ;;  %6899 = vst.msk [vmem:[#allocation5 + $0x38] sm:$0xff] %vm5083_vm4, %v10188_v49  ;;  %v6832_v59 = vpop.f32.mrb[71].mxu1 }
 0x611   :  { %v6999_v41 = vadd.f32 %v12864_v37, %v6987_v63  ;;  %6897 = vst.msk [vmem:[#allocation5 + $0x28] sm:$0xff] %vm5083_vm4, %v6832_v59  ;;  %v10191_v30 = vpop.f32.mrb[72].mxu1 }
 0x612   :  { %v7008_v52 = vmax.f32 %v7000_v39, 0.0  ;;  %6902 = vst.msk [vmem:[#allocation5 + $0x50] sm:$0xff] %vm5083_vm4, %v10191_v30  ;;  %v6845_v44 = vpop.f32.mrb[73].mxu1 }
 0x613   :  { %v7007_v40 = vmax.f32 %v6999_v41, 0.0  ;;  %6900 = vst.msk [vmem:[#allocation5 + $0x40] sm:$0xff] %vm5083_vm4, %v6845_v44  ;;  %v10192_v0 = vpop.f32.mrb[74].mxu1 }
 0x614   :  { %7045 = vst.msk [vmem:[#allocation6 + $0x21] sm:$0xf] %vm7043_vm8, %v7008_v52  ;;  %v6848_v48 = vpop.f32.mrb[75].mxu1 }
 0x615   :  { %6903 = vst.msk [vmem:[#allocation5 + $0x58] sm:$0xff] %vm5083_vm4, %v10192_v0  ;;  %v6920_v2 = vld [vmem:[#allocation5 + $0x30] ss:$2 sm:$0xf]  ;;  %6901 = vst.msk [vmem:[#allocation5 + $0x48] sm:$0xff] %vm5083_vm4, %v6848_v48  ;;  %v7068_v48 = vld [vmem:[#allocation6 + $0x61] sm:$0xff] }
 0x616   :  { %7044 = vst.msk [vmem:[#allocation6 + $0x11] sm:$0xf] %vm7043_vm8, %v7007_v40  ;;  %v6952_v16 = vld [vmem:[#allocation5 + $0x31] ss:$2 sm:$0xf] }
 0x617   :  { %v6916_v19 = vld [vmem:[#allocation5 + $0x20] ss:$2 sm:$0xf]  ;;  %v6948_v17 = vld [vmem:[#allocation5 + $0x21] ss:$2 sm:$0xf]  ;;  %v6977_v51 = vmax.f32 %v6920_v2, %v6952_v16 }
 0x618   :  { %v6922_v29 = vld [vmem:[#allocation5 + $0x38] ss:$2 sm:$0xf]  ;;  %v6954_v50 = vld [vmem:[#allocation5 + $0x39] ss:$2 sm:$0xf]  ;;  %v6975_v32 = vmax.f32 %v6916_v19, %v6948_v17 }
 0x619   :  { %v6978_v26 = vmax.f32 %v6922_v29, %v6954_v50  ;;  %v6918_v27 = vld [vmem:[#allocation5 + $0x28] ss:$2 sm:$0xf]  ;;  %v6950_v3 = vld [vmem:[#allocation5 + $0x29] ss:$2 sm:$0xf] }
 0x61a   :  { %v6976_v38 = vmax.f32 %v6918_v27, %v6950_v3  ;;  %v6928_v12 = vld [vmem:[#allocation5 + $0x50] ss:$2 sm:$0xf]  ;;  %v6960_v23 = vld [vmem:[#allocation5 + $0x51] ss:$2 sm:$0xf] }
 0x61b   :  { %v6990_v6 = vmax.f32 %v6977_v51, %v6978_v26  ;;  %v6924_v45 = vld [vmem:[#allocation5 + $0x40] ss:$2 sm:$0xf]  ;;  %v6956_v34 = vld [vmem:[#allocation5 + $0x41] ss:$2 sm:$0xf]  ;;  %v6981_v25 = vmax.f32 %v6928_v12, %v6960_v23 }
 0x61c   :  { %v6989_v24 = vmax.f32 %v6975_v32, %v6976_v38  ;;  %v6930_v55 = vld [vmem:[#allocation5 + $0x58] ss:$2 sm:$0xf]  ;;  %v6962_v56 = vld [vmem:[#allocation5 + $0x59] ss:$2 sm:$0xf]  ;;  %v6979_v57 = vmax.f32 %v6924_v45, %v6956_v34 }
 0x61d   :  { %v7002_v60 = vadd.f32 %v12864_v37, %v6990_v6  ;;  %v6982_v54 = vmax.f32 %v6930_v55, %v6962_v56  ;;  %v6926_v22 = vld [vmem:[#allocation5 + $0x48] ss:$2 sm:$0xf]  ;;  %v6958_v47 = vld [vmem:[#allocation5 + $0x49] ss:$2 sm:$0xf] }
 0x61e   :  { %v7001_v5 = vadd.f32 %v12864_v37, %v6989_v24  ;;  %v6980_v35 = vmax.f32 %v6926_v22, %v6958_v47  ;;  %v10195_v9 = vpop.f32.mrb[76].mxu1  ;;  %v12880_v20 = vld [vmem:[#allocation6 + $0x11] sm:$0xff]  ;;  %v12882_v7 = vld [vmem:[#allocation6 + $0x21] sm:$0xff] }
 0x61f   :  { %v7010_v31 = vmax.f32 %v7002_v60, 0.0  ;;  %v6992_v58 = vmax.f32 %v6981_v25, %v6982_v54  ;;  %6906 = vst.msk [vmem:[#allocation5 + $0x70] sm:$0xff] %vm5083_vm4, %v10195_v9  ;;  %v6861_v36 = vpop.f32.mrb[77].mxu1  ;;  %v7072_v62 = vpack.c.bf16 %v12880_v20, %v7064_v14  ;;  %v7456_v15 = vpack.c.bf16 %v12882_v7, %v12880_v20  ;;  %v11061_v2 = vld [vmem:[%s13112_s2 + $0x58] sm:$0xff]   ;;  %v7052_v27 = vld [vmem:[#allocation6] sm:$0xff]  ;;  %v7053_v3 = vld [vmem:[#allocation6 + $0x10] sm:$0xff] }
 0x620   :  { %v7009_v46 = vmax.f32 %v7001_v5, 0.0  ;;  %v6991_v42 = vmax.f32 %v6979_v57, %v6980_v35  ;;  %6904 = vst.msk [vmem:[#allocation5 + $0x60] sm:$0xff] %vm5083_vm4, %v6861_v36  ;;  %v10196_v21 = vpop.f32.mrb[78].mxu1  ;;  %v7060_v12 = vpack.c.bf16 %v7053_v3, %v7052_v27  ;;  %v7056_v23 = vld [vmem:[#allocation6 + $0x60] sm:$0xff]  ;;  %v7243_v60 = vld [vmem:[#allocation6 + $0x12] sm:$0xff] }
 0x621   :  { %7047 = vst.msk [vmem:[#allocation6 + $0x41] sm:$0xf] %vm7043_vm8, %v7010_v31  ;;  %v7004_v11 = vadd.f32 %v12864_v37, %v6992_v58  ;;  %v6864_v4 = vpop.f32.mrb[79].mxu1  ;;  %10199 = vmatprep.mubr.msk.bf16.mxu1 %vm5083_vm4, %v7072_v62  ;;  %v7054_v6 = vld [vmem:[#allocation6 + $0x20] sm:$0xff]  ;;  %v11063_v31 = vld [vmem:[%s13112_s2 + $0x68] sm:$0xff]  }
 0x622   :  { %6907 = vst.msk [vmem:[#allocation5 + $0x78] sm:$0xff] %vm5083_vm4, %v10196_v21  ;;  %v7003_v61 = vadd.f32 %v12864_v37, %v6991_v42  ;;  %6905 = vst.msk [vmem:[#allocation5 + $0x68] sm:$0xff] %vm5083_vm4, %v6864_v4  ;;  %v11062_v34 = vld [vmem:[%s13112_s2 + $0x60] sm:$0xff]   ;;  %v7353_v42 = vpack.c.bf16 %v7054_v6, %v7053_v3  ;;  %v11064_v4 = vld [vmem:[%s13112_s2 + $0x70] sm:$0xff]  }
 0x623   :  { %7046 = vst.msk [vmem:[#allocation6 + $0x31] sm:$0xf] %vm7043_vm8, %v7009_v46  ;;  %v7012_v28 = vmax.f32 %v7004_v11, 0.0  ;;  %v7242_v56 = vld [vmem:[#allocation6 + $0x2] sm:$0xff] }
 0x624   :  { %v7011_v18 = vmax.f32 %v7003_v61, 0.0  ;;  %v7250_v22 = vpack.c.bf16 %v7243_v60, %v7242_v56  ;;  %v7246_v5 = vld [vmem:[#allocation6 + $0x62] sm:$0xff] }
 0x625   :  { %7049 = vst.msk [vmem:[#allocation6 + $0x81] sm:$0xf] %vm7043_vm8, %v7012_v28  ;;  %v7244_v35 = vld [vmem:[#allocation6 + $0x22] sm:$0xff] }
 0x626   :  { %7048 = vst.msk [vmem:[#allocation6 + $0x71] sm:$0xf] %vm7043_vm8, %v7011_v18  ;;  %v6936_v33 = vld [vmem:[#allocation5 + $0x70] ss:$2 sm:$0xf] }
 0x627   :  { %v6968_v13 = vld [vmem:[#allocation5 + $0x71] ss:$2 sm:$0xf]  ;;  %v6932_v1 = vld [vmem:[#allocation5 + $0x60] ss:$2 sm:$0xf] }
 0x628   :  { %v6964_v43 = vld [vmem:[#allocation5 + $0x61] ss:$2 sm:$0xf]  ;;  %v6985_v49 = vmax.f32 %v6936_v33, %v6968_v13  ;;  %v8978_v56 = vld [vmem:[%s13114_s4 + $0x2] ss:$0 sm:$0xff] }
 0x629   :  { %v6938_v10 = vld [vmem:[#allocation5 + $0x78] ss:$2 sm:$0xf]  ;;  %v6970_v63 = vld [vmem:[#allocation5 + $0x79] ss:$2 sm:$0xf]  ;;  %v6983_v30 = vmax.f32 %v6932_v1, %v6964_v43 }
 0x62a   :  { %v6986_v39 = vmax.f32 %v6938_v10, %v6970_v63  ;;  %v6934_v59 = vld [vmem:[#allocation5 + $0x68] ss:$2 sm:$0xf]  ;;  %v6966_v41 = vld [vmem:[#allocation5 + $0x69] ss:$2 sm:$0xf] }
 0x62b   :  { %v6984_v52 = vmax.f32 %v6934_v59, %v6966_v41  ;;  %v12898_v44 = vld [vmem:[#allocation6 + $0x31] sm:$0xff]  ;;  %v7348_v21 = vld [vmem:[#allocation6 + $0x40] sm:$0xff] }
 0x62c   :  { %v6994_v40 = vmax.f32 %v6985_v49, %v6986_v39  ;;  %v12902_v0 = vpack.c.bf16 %v12898_v44, %v12882_v7  ;;  %v7070_v32 = vld [vmem:[#allocation6 + $0x81] sm:$0xff]  ;;  %v7245_v47 = vld [vmem:[#allocation6 + $0x32] sm:$0xff]  ;;  %v7559_v7 = vpack.c.bf16 %v7244_v35, %v7243_v60 }
 0x62d   :  { %v6993_v16 = vmax.f32 %v6983_v30, %v6984_v52  ;;  %v12910_v17 = vld [vmem:[#allocation6 + $0x71] sm:$0xff]  ;;  %v7058_v25 = vld [vmem:[#allocation6 + $0x80] sm:$0xff]  ;;  %v12939_v9 = vpack.c.bf16 %v7245_v47, %v7244_v35 }
 0x62e   :  { %v7006_v19 = vadd.f32 %v12864_v37, %v6994_v40  ;;  %10200 = vmatmul.mubr.msk.bf16.vlgmr.msra.gmra.mrb[80].mxu1 %vm5083_vm4, %v12902_v0  ;;  %v7074_v50 = vpack.c.bf16 %v12910_v17, %v7068_v48  ;;  %v7057_v14 = vld [vmem:[#allocation6 + $0x70] sm:$0xff]  ;;  %v7248_v62 = vld [vmem:[#allocation6 + $0x82] sm:$0xff]  ;;  %v11065_v1 = vld [vmem:[%s13112_s2 + $0x78] sm:$0xff]   ;;  %v7458_v43 = vpack.c.bf16 %v7070_v32, %v12910_v17 }
 0x62f   :  { %v7005_v29 = vadd.f32 %v12864_v37, %v6993_v16  ;;  %10208 = vmatpush3.bf16.msra.mxu1 %v12854_v8  ;;  %v7055_v8 = vld [vmem:[#allocation6 + $0x30] sm:$0xff]  ;;  %v7062_v24 = vpack.c.bf16 %v7057_v14, %v7056_v23  ;;  %v7355_v61 = vpack.c.bf16 %v7058_v25, %v7057_v14  ;;  %v7451_v33 = vld [vmem:[#allocation6 + $0x41] sm:$0xff] }
 0x630   :  { %v7014_v51 = vmax.f32 %v7006_v19, 0.0  ;;  %10217 = vmatprep.subr.bf16.mxu1 %v11061_v2  ;;  %10203 = vmatprep.mubr.msk.bf16.mxu1 %vm5083_vm4, %v7074_v50  ;;  %v12926_v45 = vpack.c.bf16 %v7055_v8, %v7054_v6  ;;  %v7247_v57 = vld [vmem:[#allocation6 + $0x72] sm:$0xff]  ;;  %v7354_v11 = vpack.c.bf16 %v7348_v21, %v7055_v8  ;;  %v7457_v13 = vpack.c.bf16 %v7451_v33, %v12898_v44  ;;  %v11066_v49 = vld [vmem:[%s13112_s2 + $0x80] sm:$0xff]   ;;  %v11067_v44 = vld [vmem:[%s13112_s2 + $0x88] sm:$0xff]  }
 0x631   :  { %v7013_v26 = vmax.f32 %v7005_v29, 0.0  ;;  %v7252_v58 = vpack.c.bf16 %v7247_v57, %v7246_v5  ;;  %v7561_v39 = vpack.c.bf16 %v7248_v62, %v7247_v57  ;;  %v7658_v30 = vld [vmem:[#allocation6 + $0x50] sm:$0xff] }
 0x632   :  { %7051 = vst.msk [vmem:[#allocation6 + $0xa1] sm:$0xf] %vm7043_vm8, %v7014_v51  ;;  %v7664_v52 = vpack.c.bf16 %v7658_v30, %v7348_v21  ;;  %v7662_v40 = vld [vmem:[#allocation6 + $0xb0] sm:$0xff]  ;;  %v11069_v30 = vld [vmem:[%s13113_s3] sm:$0xff]  }
 0x633   :  { %7050 = vst.msk [vmem:[#allocation6 + $0x91] sm:$0xf] %vm7043_vm8, %v7013_v26  ;;  %v7765_v19 = vld [vmem:[#allocation6 + $0xb1] sm:$0xff]  ;;  %v11068_v26 = vld [vmem:[%s13113_s3 + $0x8] sm:$0xff]  }
 0x634   :  { %v7864_v29 = vld [vmem:[#allocation6 + $0x52] sm:$0xff] }
 0x639   :  { %v7352_v28 = vld [vmem:[#allocation6 + $0xa0] sm:$0xff] }
 0x63a   :  { %v12918_v38 = vld [vmem:[#allocation6 + $0x91] sm:$0xff]  ;;  %v7455_v10 = vld [vmem:[#allocation6 + $0xa1] sm:$0xff]  ;;  %v7666_v48 = vpack.c.bf16 %v7662_v40, %v7352_v28 }
 0x63b   :  { %v12921_v37 = vpack.c.bf16 %v12918_v38, %v7070_v32  ;;  %v7059_v55 = vld [vmem:[#allocation6 + $0x90] sm:$0xff]  ;;  %v7459_v20 = vpack.c.bf16 %v7455_v10, %v12918_v38  ;;  %v7558_v59 = vld [vmem:[#allocation6 + $0xa2] sm:$0xff]  ;;  %v7769_v17 = vpack.c.bf16 %v7765_v19, %v7455_v10 }
 0x63c   :  { %v12934_v54 = vpack.c.bf16 %v7059_v55, %v7058_v25  ;;  %v7249_v36 = vld [vmem:[#allocation6 + $0x92] sm:$0xff]  ;;  %v7356_v18 = vpack.c.bf16 %v7352_v28, %v7059_v55 }
 0x63d   :  { %10204 = vmatmul.mubr.msk.bf16.gmra.mrb[84].mxu1 %vm5083_vm4, %v12921_v37  ;;  %v12947_v46 = vpack.c.bf16 %v7249_v36, %v7248_v62  ;;  %v7562_v41 = vpack.c.bf16 %v7558_v59, %v7249_v36 }
 0x63e   :  { %10209 = vmatprep.mubr.msk.bf16.mxu1 %vm5083_vm4, %v7060_v12 }
 0x645   :  { %10210 = vmatmul.mubr.msk.bf16.vlgmr.msra.gmra.mrb[80].mxu1 %vm5083_vm4, %v12926_v45 }
 0x646   :  { %10218 = vmatpush3.bf16.msra.mxu1 %v11061_v2  ;;  %10213 = vmatprep.mubr.msk.bf16.mxu1 %vm5083_vm4, %v7062_v24  ;;  %v7761_v2 = vld [vmem:[#allocation6 + $0x51] sm:$0xff] }
 0x647   :  { %10227 = vmatprep.subr.bf16.mxu1 %v11062_v34  ;;  %v7767_v16 = vpack.c.bf16 %v7761_v2, %v7451_v33 }
 0x64d   :  { %10214 = vmatmul.mubr.msk.bf16.gmra.mrb[84].mxu1 %vm5083_vm4, %v12934_v54 }
 0x64e   :  { %10219 = vmatprep.mubr.msk.bf16.mxu1 %vm5083_vm4, %v7250_v22 }
 0x655   :  { %10220 = vmatmul.mubr.msk.bf16.vlgmr.msra.gmra.mrb[80].mxu1 %vm5083_vm4, %v12939_v9 }
 0x656   :  { %10228 = vmatpush3.bf16.msra.mxu1 %v11062_v34  ;;  %10223 = vmatprep.mubr.msk.bf16.mxu1 %vm5083_vm4, %v7252_v58 }
 0x657   :  { %10237 = vmatprep.subr.bf16.mxu1 %v11063_v31 }
 0x65d   :  { %10224 = vmatmul.mubr.msk.bf16.gmra.mrb[84].mxu1 %vm5083_vm4, %v12947_v46 }
 0x65e   :  { %10229 = vmatprep.mubr.msk.bf16.mxu1 %vm5083_vm4, %v7353_v42 }
 0x665   :  { %10230 = vmatmul.mubr.msk.bf16.vlgmr.msra.gmra.mrb[80].mxu1 %vm5083_vm4, %v7354_v11 }
 0x666   :  { %10238 = vmatpush3.bf16.msra.mxu1 %v11063_v31  ;;  %10233 = vmatprep.mubr.msk.bf16.mxu1 %vm5083_vm4, %v7355_v61 }
 0x667   :  { %10247 = vmatprep.subr.bf16.mxu1 %v11064_v4 }
 0x66d   :  { %10234 = vmatmul.mubr.msk.bf16.gmra.mrb[84].mxu1 %vm5083_vm4, %v7356_v18 }
 0x66e   :  { %10239 = vmatprep.mubr.msk.bf16.mxu1 %vm5083_vm4, %v7456_v15  ;;  %v7554_v15 = vld [vmem:[#allocation6 + $0x42] sm:$0xff] }
 0x66f   :  { %v7560_v63 = vpack.c.bf16 %v7554_v15, %v7245_v47  ;;  %v7870_v50 = vpack.c.bf16 %v7864_v29, %v7554_v15 }
 0x675   :  { %10240 = vmatmul.mubr.msk.bf16.vlgmr.msra.gmra.mrb[80].mxu1 %vm5083_vm4, %v7457_v13 }
 0x676   :  { %10248 = vmatpush3.bf16.msra.mxu1 %v11064_v4  ;;  %10243 = vmatprep.mubr.msk.bf16.mxu1 %vm5083_vm4, %v7458_v43 }
 0x677   :  { %10257 = vmatprep.subr.bf16.mxu1 %v11065_v1 }
 0x67d   :  { %10244 = vmatmul.mubr.msk.bf16.gmra.mrb[84].mxu1 %vm5083_vm4, %v7459_v20 }
 0x67e   :  { %10249 = vmatprep.mubr.msk.bf16.mxu1 %vm5083_vm4, %v7559_v7 }
 0x685   :  { %10250 = vmatmul.mubr.msk.bf16.vlgmr.msra.gmra.mrb[80].mxu1 %vm5083_vm4, %v7560_v63 }
 0x686   :  { %10258 = vmatpush3.bf16.msra.mxu1 %v11065_v1  ;;  %10253 = vmatprep.mubr.msk.bf16.mxu1 %vm5083_vm4, %v7561_v39 }
 0x687   :  { %10267 = vmatprep.subr.bf16.mxu1 %v11066_v49 }
 0x68d   :  { %10254 = vmatmul.mubr.msk.bf16.gmra.mrb[84].mxu1 %vm5083_vm4, %v7562_v41 }
 0x68e   :  { %10259 = vmatprep.mubr.msk.bf16.mxu1 %vm5083_vm4, %v12926_v45 }
 0x695   :  { %10260 = vmatmul.mubr.msk.bf16.vlgmr.msra.gmra.mrb[80].mxu1 %vm5083_vm4, %v7664_v52 }
 0x696   :  { %10268 = vmatpush3.bf16.msra.mxu1 %v11066_v49  ;;  %10263 = vmatprep.mubr.msk.bf16.mxu1 %vm5083_vm4, %v12934_v54 }
 0x697   :  { %10277 = vmatprep.subr.bf16.mxu1 %v11067_v44 }
 0x69d   :  { %10264 = vmatmul.mubr.msk.bf16.gmra.mrb[84].mxu1 %vm5083_vm4, %v7666_v48 }
 0x69e   :  { %10269 = vmatprep.mubr.msk.bf16.mxu1 %vm5083_vm4, %v12902_v0  ;;  %v7868_v0 = vld [vmem:[#allocation6 + $0xb2] sm:$0xff] }
 0x69f   :  { %v7872_v51 = vpack.c.bf16 %v7868_v0, %v7558_v59 }
 0x6a5   :  { %10270 = vmatmul.mubr.msk.bf16.vlgmr.msra.gmra.mrb[80].mxu1 %vm5083_vm4, %v7767_v16 }
 0x6a6   :  { %10278 = vmatpush3.bf16.msra.mxu1 %v11067_v44  ;;  %10273 = vmatprep.mubr.msk.bf16.mxu1 %vm5083_vm4, %v12921_v37 }
 0x6a7   :  { %10287 = vmatprep.subr.bf16.mxu1 %v13170_v53 }
 0x6ad   :  { %10274 = vmatmul.mubr.msk.bf16.gmra.mrb[84].mxu1 %vm5083_vm4, %v7769_v17  ;;  %v11070_v17 = vld [vmem:[%s13113_s3 + $0x10] sm:$0xff]  }
 0x6ae   :  { %10279 = vmatprep.mubr.msk.bf16.mxu1 %vm5083_vm4, %v12939_v9 }
 0x6b5   :  { %10280 = vmatmul.mubr.msk.bf16.vlgmr.msra.gmra.mrb[80].mxu1 %vm5083_vm4, %v7870_v50 }
 0x6b6   :  { %10283 = vmatprep.mubr.msk.bf16.mxu1 %vm5083_vm4, %v12947_v46  ;;  %10288 = vmatpush3.bf16.msra.mxu1 %v11068_v26 }
 0x6b7   :  { %10293 = vmatprep.subr.bf16.mxu1 %v13170_v53 }
 0x6bd   :  { %10284 = vmatmul.mubr.msk.bf16.gmra.mrb[84].mxu1 %vm5083_vm4, %v7872_v51 }
 0x6be   :  { %10289 = vmatprep.mubr.msk.bf16.mxu1 %vm11107_vm9, %v13170_v53 }
 0x788   :  { %v10281_v27 = vpop.f32.mrb[80].mxu1 }
 0x789   :  { %7966 = vst.msk [vmem:[#allocation7 + $0x10] sm:$0xff] %vm5083_vm4, %v10281_v27  ;;  %v7925_v3 = vpop.f32.mrb[81].mxu1  ;;  %v11071_v27 = vld [vmem:[%s13113_s3 + $0x18] sm:$0xff]  }
 0x78a   :  { %7964 = vst.msk [vmem:[#allocation7] sm:$0xff] %vm5083_vm4, %v7925_v3  ;;  %v10282_v32 = vpop.f32.mrb[82].mxu1 }
 0x78b   :  { %7967 = vst.msk [vmem:[#allocation7 + $0x18] sm:$0xff] %vm5083_vm4, %v10282_v32  ;;  %v7928_v38 = vpop.f32.mrb[83].mxu1 }
 0x78c   :  { %7965 = vst.msk [vmem:[#allocation7 + $0x8] sm:$0xff] %vm5083_vm4, %v7928_v38 }
 0x790   :  { %v10285_v37 = vpop.f32.mrb[84].mxu1  ;;  %v7976_v18 = vld [vmem:[#allocation7 + $0x10] ss:$2 sm:$0x3] }
 0x791   :  { %7970 = vst.msk [vmem:[#allocation7 + $0x30] sm:$0xff] %vm5083_vm4, %v10285_v37  ;;  %v7941_v12 = vpop.f32.mrb[85].mxu1  ;;  %v7972_v8 = vld [vmem:[#allocation7] ss:$2 sm:$0x3] }
 0x792   :  { %7968 = vst.msk [vmem:[#allocation7 + $0x20] sm:$0xff] %vm5083_vm4, %v7941_v12  ;;  %v10286_v23 = vpop.f32.mrb[86].mxu1  ;;  %v7988_v14 = vld [vmem:[#allocation7 + $0x1] ss:$2 sm:$0x3] }
 0x793   :  { %7971 = vst.msk [vmem:[#allocation7 + $0x38] sm:$0xff] %vm5083_vm4, %v10286_v23  ;;  %v7944_v6 = vpop.f32.mrb[87].mxu1  ;;  %v7974_v45 = vld [vmem:[#allocation7 + $0x8] ss:$2 sm:$0x3]  ;;  %v8003_v24 = vmax.f32 %v7972_v8, %v7988_v14  ;;  %v11072_v12 = vld [vmem:[%s13113_s3 + $0x20] sm:$0xff]  }
 0x794   :  { %7969 = vst.msk [vmem:[#allocation7 + $0x28] sm:$0xff] %vm5083_vm4, %v7944_v6  ;;  %v7990_v34 = vld [vmem:[#allocation7 + $0x9] ss:$2 sm:$0x3] }
 0x795   :  { %v8004_v55 = vmax.f32 %v7974_v45, %v7990_v34  ;;  %v7978_v21 = vld [vmem:[#allocation7 + $0x18] ss:$2 sm:$0x3]  ;;  %v7994_v11 = vld [vmem:[#allocation7 + $0x19] ss:$2 sm:$0x3] }
 0x796   :  { %v7992_v33 = vld [vmem:[#allocation7 + $0x11] ss:$2 sm:$0x3]  ;;  %v8006_v1 = vmax.f32 %v7978_v21, %v7994_v11  ;;  %v11073_v8 = vld [vmem:[%s13113_s3 + $0x28] sm:$0xff]  }
 0x797   :  { %v8011_v60 = vmax.f32 %v8003_v24, %v8004_v55  ;;  %v8005_v20 = vmax.f32 %v7976_v18, %v7992_v33 }
 0x798   :  { %v7984_v25 = vld [vmem:[#allocation7 + $0x30] ss:$2 sm:$0x3]  ;;  %v8000_v54 = vld [vmem:[#allocation7 + $0x31] ss:$2 sm:$0x3] }
 0x799   :  { %v7980_v22 = vld [vmem:[#allocation7 + $0x20] ss:$2 sm:$0x3]  ;;  %v7996_v47 = vld [vmem:[#allocation7 + $0x21] ss:$2 sm:$0x3]  ;;  %v8019_v5 = vadd.f32 %v8978_v56, %v8011_v60  ;;  %v8009_v42 = vmax.f32 %v7984_v25, %v8000_v54  ;;  %v8012_v63 = vmax.f32 %v8005_v20, %v8006_v1 }
 0x79a   :  { %v7986_v57 = vld [vmem:[#allocation7 + $0x38] ss:$2 sm:$0x3]  ;;  %v8002_v35 = vld [vmem:[#allocation7 + $0x39] ss:$2 sm:$0x3]  ;;  %v8007_v36 = vmax.f32 %v7980_v22, %v7996_v47 }
 0x79b   :  { %v7982_v9 = vld [vmem:[#allocation7 + $0x28] ss:$2 sm:$0x3]  ;;  %v7998_v31 = vld [vmem:[#allocation7 + $0x29] ss:$2 sm:$0x3]  ;;  %v8010_v58 = vmax.f32 %v7986_v57, %v8002_v35  ;;  %v8020_v52 = vadd.f32 %v8978_v56, %v8012_v63 }
 0x79c   :  { %v8008_v62 = vmax.f32 %v7982_v9, %v7998_v31  ;;  %v8023_v46 = vmax.f32 %v8019_v5, 0.0  ;;  %v8987_v35 = vld [vmem:[%s13114_s4 + $0x3] ss:$0 sm:$0xff] }
 0x79d   :  { %v8014_v28 = vmax.f32 %v8009_v42, %v8010_v58  ;;  %v8024_v2 = vmax.f32 %v8020_v52, 0.0 }
 0x79e   :  { %v8013_v4 = vmax.f32 %v8007_v36, %v8008_v62  ;;  %v8027_v61 = vpack.c.bf16 %v8023_v46, %v8023_v46 }
 0x79f   :  { %v8022_v7 = vadd.f32 %v8978_v56, %v8014_v28  ;;  %v8142_v29 = vpack.c.bf16 %v8024_v2, %v8024_v2 }
 0x7a0   :  { %v8021_v13 = vadd.f32 %v8978_v56, %v8013_v4  ;;  %v8035_v10 = vunpack.c.l.b16 %v8027_v61 }
 0x7a1   :  { %v8026_v59 = vmax.f32 %v8022_v7, 0.0  ;;  %v8148_v51 = vunpack.c.l.b16 %v8142_v29 }
 0x7a2   :  { %v8025_v43 = vmax.f32 %v8021_v13, 0.0  ;;  %v8037_v39 = vrot.slane %v8035_v10, 1 }
 0x7a3   :  { %v8143_v48 = vpack.c.bf16 %v8026_v59, %v8026_v59  ;;  %v8205_v32 = vrot.slane %v8148_v51, 1 }
 0x7a4   :  { %v8028_v15 = vpack.c.bf16 %v8025_v43, %v8025_v43 }
 0x7a5   :  { %v8149_v19 = vunpack.c.l.b16 %v8143_v48 }
 0x7a6   :  { %v8036_v49 = vunpack.c.l.b16 %v8028_v15 }
 0x7a7   :  { %v8150_v0 = vrot.slane %v8149_v19, 7  ;;  %v8206_v38 = vsel %vm8038_vm10, %v8149_v19, %v8205_v32  ;;  %v8990_v19 = vld [vmem:[%s13114_s4 + $0x4] ss:$0 sm:$0xff] }
 0x7a8   :  { %v8039_v41 = vsel %vm8038_vm10, %v8036_v49, %v8037_v39  ;;  %v8090_v40 = vrot.slane %v8036_v49, 7  ;;  %v8207_v37 = vpack.c.b16 %v8206_v38, %v8206_v38 }
 0x7a9   :  { %v8040_v44 = vpack.c.b16 %v8039_v41, %v8039_v41  ;;  %v8151_v26 = vsel %vm8038_vm10, %v8150_v0, %v8148_v51 }
 0x7aa   :  { %v8091_v16 = vsel %vm8038_vm10, %v8090_v40, %v8035_v10  ;;  %v8152_v3 = vpack.c.b16 %v8151_v26, %v8151_v26 }
 0x7ab   :  { %10290 = vmatmul.mubr.msk.bf16.vlgmr.msra.gmra.mrb[88].mxu1 %vm5083_vm4, %v8040_v44  ;;  %v8092_v50 = vpack.c.b16 %v8091_v16, %v8091_v16  ;;  %v8989_v44 = vld [vmem:[%s13114_s4 + $0xa] ss:$0 sm:$0xff]  ;;  %v11074_v16 = vld [vmem:[%s13113_s3 + $0x30] sm:$0xff]  }
 0x7ac   :  { %10294 = vmatpush3.bf16.msra.mxu1 %v11069_v30  ;;  %10295 = vmatprep.mubr.msk.bf16.mxu1 %vm11107_vm9, %v13170_v53  ;;  %v8988_v30 = vld [vmem:[%s13114_s4 + $0x7] ss:$0 sm:$0xff] }
 0x7ad   :  { %10299 = vmatprep.subr.bf16.mxu1 %v13170_v53 }
 0x7b3   :  { %10296 = vmatmul.mubr.msk.bf16.vlgmr.msra.gmra.mrb[92].mxu1 %vm5083_vm4, %v8092_v50 }
 0x7b4   :  { %10300 = vmatpush3.bf16.msra.mxu1 %v11070_v17  ;;  %10301 = vmatprep.mubr.msk.bf16.mxu1 %vm11107_vm9, %v13170_v53 }
 0x7b5   :  { %10305 = vmatprep.subr.bf16.mxu1 %v13170_v53 }
 0x7bb   :  { %10302 = vmatmul.mubr.msk.bf16.vlgmr.msra.gmra.mrb[96].mxu1 %vm5083_vm4, %v8152_v3 }
 0x7bc   :  { %10306 = vmatpush3.bf16.msra.mxu1 %v11071_v27  ;;  %10307 = vmatprep.mubr.msk.bf16.mxu1 %vm11107_vm9, %v13170_v53 }
 0x7bd   :  { %10311 = vmatprep.subr.bf16.mxu1 %v13170_v53 }
 0x7c3   :  { %10308 = vmatmul.mubr.msk.bf16.vlgmr.msra.gmra.mrb[100].mxu1 %vm5083_vm4, %v8207_v37 }
 0x7c4   :  { %10315 = vmatprep.mubr.msk.bf16.mxu1 %vm11107_vm9, %v13170_v53  ;;  %10312 = vmatpush3.bf16.msra.mxu1 %v11072_v12 }
 0x7c5   :  { %10313 = vmatprep.subr.bf16.mxu1 %v13170_v53 }
 0x7c8   :  { %10314 = vmatpush3.bf16.msra.mxu1 %v11073_v8 }
 0x7c9   :  { %10319 = vmatprep.subr.bf16.mxu1 %v13170_v53 }
 0x87e   :  { %v8084_v23 = vpop.f32.mrb[88].mxu1 }
 0x87f   :  { %v10291_v14 = vpop.f32.mrb[89].mxu1 }
 0x880   :  { %v8087_v6 = vpop.f32.mrb[90].mxu1 }
 0x881   :  { %v10292_v45 = vpop.f32.mrb[91].mxu1 }
 0x886   :  { %v8136_v34 = vpop.f32.mrb[92].mxu1 }
 0x887   :  { %v8137_v24 = vadd.f32 %v8136_v34, %v8084_v23  ;;  %v10297_v55 = vpop.f32.mrb[93].mxu1 }
 0x888   :  { %v8139_v56 = vpop.f32.mrb[94].mxu1 }
 0x889   :  { %v10298_v60 = vpop.f32.mrb[95].mxu1 }
 0x88e   :  { %v8196_v25 = vpop.f32.mrb[96].mxu1 }
 0x88f   :  { %v8202_v54 = vadd.f32 %v8196_v25, %v8137_v24  ;;  %v10303_v22 = vpop.f32.mrb[97].mxu1 }
 0x890   :  { %v8199_v47 = vpop.f32.mrb[98].mxu1 }
 0x891   :  { %v10304_v5 = vpop.f32.mrb[99].mxu1 }
 0x892   :  { %v8994_v5 = vld [vmem:[%s13114_s4 + $0x8] ss:$0 sm:$0xff] }
 0x896   :  { %v8251_v57 = vpop.f32.mrb[100].mxu1 }
 0x897   :  { %v8257_v9 = vadd.f32 %v8251_v57, %v8202_v54  ;;  %v10309_v31 = vpop.f32.mrb[101].mxu1 }
 0x898   :  { %v8254_v58 = vpop.f32.mrb[102].mxu1 }
 0x899   :  { %v8263_v36 = vadd.f32 %v8987_v35, %v8257_v9  ;;  %v10310_v62 = vpop.f32.mrb[103].mxu1  ;;  %v8995_v35 = vld [vmem:[%s13114_s4 + $0xb] ss:$0 sm:$0xff] }
 0x89b   :  { %v8264_v46 = vmax.f32 %v8263_v36, 0.0  ;;  %v8493_v36 = vld [vmem:[%s13113_s3 + $0x38] sm:$0xf] }
 0x89c   :  { %v8505_v62 = vsel %vm8503_vm13, %v8493_v36, 0 }
 0x89d   :  { %v8266_v42 = vsel %vm8265_vm11, %v8264_v46, 0.0 }
 0x89e   :  { %v8267_v21 = vrot.slane %v8266_v42, 4 }
 0x8a0   :  { %v8268_v11 = vadd.f32 %v8267_v21, %v8266_v42 }
 0x8a2   :  { %v8269_v4 = vrot.slane %v8268_v11, 2 }
 0x8a4   :  { %v8270_v61 = vadd.f32 %v8269_v4, %v8268_v11 }
 0x8a6   :  { %v8271_v28 = vrot.slane %v8270_v61, 1 }
 0x8a8   :  { %v8272_v18 = vadd.f32 %v8271_v28, %v8270_v61 }
 0x8aa   :  { %v8274_v33 = vmul.f32 0.5, %v8272_v18 }
 0x8ac   :  { %v8275_v13 = vsub.f32 %v8264_v46, %v8274_v33  ;;  %v8996_v46 = vld [vmem:[%s13114_s4 + $0x5] ss:$0 sm:$0xff] }
 0x8ae   :  { %v8276_v1 = vmul.f32 %v8275_v13, %v8275_v13 }
 0x8b0   :  { %v8277_v43 = vsel %vm8265_vm11, %v8276_v1, 0.0 }
 0x8b1   :  { %v8278_v10 = vrot.slane %v8277_v43, 4 }
 0x8b3   :  { %v8279_v20 = vadd.f32 %v8278_v10, %v8277_v43 }
 0x8b5   :  { %v8280_v7 = vrot.slane %v8279_v20, 2 }
 0x8b7   :  { %v8281_v15 = vadd.f32 %v8280_v7, %v8279_v20 }
 0x8b9   :  { %v8282_v63 = vrot.slane %v8281_v15, 1 }
 0x8bb   :  { %v8283_v49 = vadd.f32 %v8282_v63, %v8281_v15 }
 0x8bd   :  { %v8284_v39 = vmul.f32 0.5, %v8283_v49 }
 0x8bf   :  { %v8285_v59 = vadd.f32 1e-05, %v8284_v39 }
 0x8c1   :  { %11075 = vrsqrt.f32 %v8285_v59 }
 0x8cb   :  { %v11076_v41 = vpop.eup %11075 }
 0x8cc   :  { %v8287_v52 = vmul.f32 %v11076_v41, %v8275_v13 }
 0x8ce   :  { %v8293_v40 = vmul.f32 %v8988_v30, %v8287_v52 }
 0x8d0   :  { %v8299_v48 = vadd.f32 %v8989_v44, %v8293_v40 }
 0x8d2   :  { %v8300_v2 = vpack.c.bf16 %v8299_v48, %v8299_v48 }
 0x8d4   :  { %10316 = vmatmul.mubr.msk.bf16.vlgmr.msra.gmra.mrb[104].mxu1 %vm8322_vm12, %v8300_v2  ;;  %v8999_v2 = vld [vmem:[%s13114_s4 + $0x9] ss:$0 sm:$0xff] }
 0x8d5   :  { %10321 = vmatprep.mubr.msk.bf16.mxu1 %vm11107_vm9, %v13170_v53  ;;  %10320 = vmatpush3.bf16.msra.mxu1 %v11074_v16 }
 0x8d6   :  { %10325 = vmatprep.subr.bf16.mxu1 %v13170_v53 }
 0x9a7   :  { %v8360_v17 = vpop.f32.mrb[104].mxu1 }
 0x9a8   :  { %v8361_v29 = vadd.f32 %v8990_v19, %v8360_v17  ;;  %v10317_v50 = vpop.f32.mrb[105].mxu1  ;;  %v9000_v19 = vld [vmem:[%s13114_s4 + $0xc] ss:$0 sm:$0xff] }
 0x9a9   :  { %v8363_v0 = vpop.f32.mrb[106].mxu1 }
 0x9aa   :  { %v8366_v51 = vmax.f32 %v8361_v29, 0.0  ;;  %v10318_v26 = vpop.f32.mrb[107].mxu1  ;;  %v9001_v0 = vld [vmem:[%s13114_s4 + $0x6] ss:$0 sm:$0xff] }
 0x9ac   :  { %v8367_v27 = vsel %vm5361_vm5, %v8366_v51, 0.0 }
 0x9ad   :  { %v8368_v3 = vrot.slane %v8367_v27, 4 }
 0x9af   :  { %v8369_v32 = vadd.f32 %v8368_v3, %v8367_v27 }
 0x9b1   :  { %v8370_v38 = vrot.slane %v8369_v32, 2 }
 0x9b3   :  { %v8371_v37 = vadd.f32 %v8370_v38, %v8369_v32 }
 0x9b5   :  { %v8372_v12 = vrot.slane %v8371_v37, 1 }
 0x9b7   :  { %v8373_v8 = vadd.f32 %v8372_v12, %v8371_v37 }
 0x9b9   :  { %v8374_v23 = vmul.f32 0.5, %v8373_v8 }
 0x9bb   :  { %v8375_v14 = vsub.f32 %v8366_v51, %v8374_v23 }
 0x9bd   :  { %v8376_v6 = vmul.f32 %v8375_v14, %v8375_v14 }
 0x9bf   :  { %v8377_v45 = vsel %vm5361_vm5, %v8376_v6, 0.0 }
 0x9c0   :  { %v8378_v34 = vrot.slane %v8377_v45, 4 }
 0x9c2   :  { %v8379_v24 = vadd.f32 %v8378_v34, %v8377_v45 }
 0x9c4   :  { %v8380_v55 = vrot.slane %v8379_v24, 2 }
 0x9c6   :  { %v8381_v56 = vadd.f32 %v8380_v55, %v8379_v24 }
 0x9c8   :  { %v8382_v60 = vrot.slane %v8381_v56, 1 }
 0x9ca   :  { %v8383_v25 = vadd.f32 %v8382_v60, %v8381_v56 }
 0x9cc   :  { %v8384_v54 = vmul.f32 0.5, %v8383_v25 }
 0x9ce   :  { %v8385_v22 = vadd.f32 1e-05, %v8384_v54 }
 0x9d0   :  { %11077 = vrsqrt.f32 %v8385_v22 }
 0x9da   :  { %v11078_v47 = vpop.eup %11077 }
 0x9db   :  { %v8387_v57 = vmul.f32 %v11078_v47, %v8375_v14 }
 0x9dd   :  { %v8393_v9 = vmul.f32 %v8994_v5, %v8387_v57 }
 0x9df   :  { %v8399_v31 = vadd.f32 %v8995_v35, %v8393_v9 }
 0x9e1   :  { %v8400_v58 = vpack.c.bf16 %v8399_v31, %v8399_v31 }
 0x9e3   :  { %10322 = vmatmul.mubr.msk.bf16.vlgmr.msra.gmra.mrb[108].mxu1 %vm5083_vm4, %v8400_v58 }
 0x9e4   :  { %10327 = vmatprep.mubr.msk.bf16.mxu1 %vm11107_vm9, %v13170_v53  ;;  %10326 = vmatpush3.bf16.msra.mxu1 %v8505_v62 }
 0xab6   :  { %v8451_v42 = vpop.f32.mrb[108].mxu1 }
 0xab7   :  { %v8452_v21 = vadd.f32 %v8996_v46, %v8451_v42  ;;  %v10323_v11 = vpop.f32.mrb[109].mxu1 }
 0xab8   :  { %v8454_v4 = vpop.f32.mrb[110].mxu1 }
 0xab9   :  { %v8457_v61 = vmax.f32 %v8452_v21, 0.0  ;;  %v10324_v28 = vpop.f32.mrb[111].mxu1 }
 0xabb   :  { %v8459_v18 = vsel %vm8458_vm14, %v8457_v61, 0.0 }
 0xabc   :  { %v8460_v53 = vrot.slane %v8459_v18, 4 }
 0xabe   :  { %v8461_v33 = vadd.f32 %v8460_v53, %v8459_v18 }
 0xac0   :  { %v8462_v13 = vrot.slane %v8461_v33, 2 }
 0xac2   :  { %v8463_v1 = vadd.f32 %v8462_v13, %v8461_v33 }
 0xac4   :  { %v8464_v43 = vrot.slane %v8463_v1, 1 }
 0xac6   :  { %v8465_v10 = vadd.f32 %v8464_v43, %v8463_v1 }
 0xac8   :  { %v8466_v20 = vmul.f32 0.5, %v8465_v10 }
 0xaca   :  { %v8467_v7 = vsub.f32 %v8457_v61, %v8466_v20 }
 0xacc   :  { %v8468_v15 = vmul.f32 %v8467_v7, %v8467_v7 }
 0xace   :  { %v8469_v63 = vsel %vm8458_vm14, %v8468_v15, 0.0 }
 0xacf   :  { %v8470_v49 = vrot.slane %v8469_v63, 4 }
 0xad1   :  { %v8471_v39 = vadd.f32 %v8470_v49, %v8469_v63 }
 0xad3   :  { %v8472_v59 = vrot.slane %v8471_v39, 2 }
 0xad5   :  { %v8473_v41 = vadd.f32 %v8472_v59, %v8471_v39 }
 0xad7   :  { %v8474_v30 = vrot.slane %v8473_v41, 1 }
 0xad9   :  { %v8475_v52 = vadd.f32 %v8474_v30, %v8473_v41 }
 0xadb   :  { %v8476_v44 = vmul.f32 0.5, %v8475_v52 }
 0xadd   :  { %v8477_v40 = vadd.f32 1e-05, %v8476_v44 }
 0xadf   :  { %11079 = vrsqrt.f32 %v8477_v40 }
 0xae9   :  { %v11080_v48 = vpop.eup %11079 }
 0xaea   :  { %v8479_v16 = vmul.f32 %v11080_v48, %v8467_v7 }
 0xaec   :  { %v8485_v17 = vmul.f32 %v8999_v2, %v8479_v16 }
 0xaee   :  { %v8491_v29 = vadd.f32 %v9000_v19, %v8485_v17 }
 0xaf0   :  { %v8492_v50 = vpack.c.bf16 %v8491_v29, %v8491_v29 }
 0xaf2   :  { %10328 = vmatmul.mubr.msk.bf16.vlgmr.msra.gmra.mrb[112].mxu1 %vm8499_vm15, %v8492_v50 }
 0xbc5   :  { %v8541_v51 = vpop.f32.mrb[112].mxu1 }
 0xbc6   :  { %v8542_v26 = vadd.f32 %v9001_v0, %v8541_v51  ;;  %v10329_v27 = vpop.f32.mrb[113].mxu1 }
 0xbc7   :  { %v8544_v3 = vpop.f32.mrb[114].mxu1 }
 0xbc8   :  { %8547 = vst.msk [vmem:[#allocation8] sm:$0x3] %vm135_vm2, %v8542_v26  ;;  %v10330_v32 = vpop.f32.mrb[115].mxu1 }
 0xbc9   :  { %11093 = shalt.err (!%p11090_p4)
}
 0xbca   :  { %s11094_s4 = scalar_lea.hbm %s13115_s5, 32 }
 0xbcb   :  { %p11095_p5 = scmp.ne.s32.totalorder %s13115_s5, %s11094_s4  ;;  %p11098_p6 = scmp.lt.u32.totalorder %s11094_s4, %s13115_s5 }
 0xbcd   :  { %p11100_p7 = pnand %p11098_p6, %p11095_p5 }
 0xbcf   :  { %11103 = shalt.err (!%p11100_p7)
}
 0xbd0   :  { %8557 = dma.vmem_to_hbm [thread:$0]  %s8555_s10, 32, %s13115_s5, [#allocation9]  }
 0xbd1   :  { %11104 = dma.done.wait [#allocation9], 32  }
 0xbd2   :  { %11105 = vsyncadd [#allocation9], 4294967264 }
 0xbd3   :  { %8561 = vsyncpa [#allocation9], 1 }

</bundles_post_ra>
